<compile_context>
chip_gen: v5e
topology: v5e:2x2
jax: 0.10.0
libtpu: 0.0.40
codegen_flags: <defaults>
</compile_context>

<pallas_src>
import functools

import jax
import jax.numpy as jnp
from jax.experimental import pallas as pl
from jax.experimental.pallas import tpu as pltpu

CUTOFF = 7.0          # RadialBasis cutoff
ENV_P = 5.0           # polynomial-envelope exponent (GemNet default)
NORM_EPS = 1e-12      # stable_norm epsilon
OUT_PAD = 128         # lane-dense packed-output width


def _round_up(x, m):
    return (x + m - 1) // m * m


# ----------------------------- Pallas kernel --------------------------------
def _ffn_kernel(x_ref, w1a_ref, w1r_ref, b1_ref, w2_ref, b2_ref, out_ref,
                *, k1, n_rbf, compute_dtype):
    x = x_ref[...]                                   # (tm, k1+3), compute_dtype
    zo = x[:, k1:k1 + 3].astype(jnp.float32)         # Zo columns; f32 elementwise

    # --- RadialBasis: polynomial envelope * Gaussian smearing (f32 VPU/EUP) ---
    # NOTE: rows past N in the (ragged) last tile hold garbage; all math here
    # is per-row independent and Pallas masks the out-of-bounds writeback, so
    # this is safe.  Do NOT add cross-row reductions/accumulators here.
    d = jnp.sqrt(jnp.sum(zo * zo, axis=-1, keepdims=True) + NORM_EPS)  # stable_norm
    ds = d * (1.0 / CUTOFF)
    a = -(ENV_P + 1.0) * (ENV_P + 2.0) / 2.0
    b = ENV_P * (ENV_P + 2.0)
    c = -ENV_P * (ENV_P + 1.0) / 2.0
    ds2 = ds * ds
    ds4 = ds2 * ds2
    ds5 = ds4 * ds
    env = 1.0 + ds5 * (a + ds * (b + ds * c))        # 1 + a*ds^5 + b*ds^6 + c*ds^7
    env = jnp.where(ds < 1.0, env, 0.0)
    delta = 1.0 / (n_rbf - 1)
    coeff = -0.5 / (delta * delta)
    offs = jax.lax.broadcasted_iota(jnp.int32, (1, n_rbf), 1).astype(jnp.float32) * delta
    diff = ds - offs                                  # (tm, n_rbf)
    radial = env * jnp.exp(coeff * diff * diff)       # f32

    # --- fused first layer: 2 MXU pushes ------------------------------------
    # x = [H | Hc | Ea | Zo]; the Zo rows of w1a are zero so they contribute
    # nothing, and the radial contribution comes in via the second dot.
    hid = (jnp.dot(x, w1a_ref[...], preferred_element_type=jnp.float32)
           + jnp.dot(radial.astype(compute_dtype), w1r_ref[...],
                     preferred_element_type=jnp.float32)
           + b1_ref[...])                             # (tm, 3*dh4) f32
    hid = hid * jax.nn.sigmoid(hid)                   # SiLU (sigmoid -> EUP slot)
    # TODO(synk): nn.Dropout(p=0.1) is identity at inference (eval) and is skipped.

    # --- fused block-diagonal second layer -> lane-dense 128-wide slab ------
    # columns: [ h_update (d_out) | edge_out (hid_edge) | z_scale (1) | zeros ]
    out_ref[...] = (jnp.dot(hid.astype(compute_dtype), w2_ref[...],
                            preferred_element_type=jnp.float32)
                    + b2_ref[...])


# ------------------------------- wrapper -------------------------------------
def ffn_pallas(x, w1a, w1r, b1, w2, b2, *, n_rbf, k1, tm_cap=1024,
               compute_dtype=jnp.float32):
    """Fused FFN over nodes, tiled on the row axis. Returns the lane-dense
    packed slab [hup | eout | z_scale | 0...] of shape (N, OUT_PAD)."""
    assert n_rbf >= 2, "RadialBasis needs n_rbf >= 2 (delta = 1/(n_rbf-1))"
    N, xw = x.shape
    out_pad = w2.shape[-1]
    dh3 = w1a.shape[-1]                 # 3 * (4*d_hidden)

    # Tile policy: no minimum grid-step count (extra steps are pure ~0.35 us
    # per-step overhead on 1-TC v5e/v6e).  One step when N fits, else the
    # largest 16-row-aligned tile (16 keeps bf16 sublane packing clean).
    # VMEM footprint is a few MB at most at these feature widths on any chip.
    tm = min(_round_up(N, 16), _round_up(int(tm_cap), 16))
    grid = (pl.cdiv(N, tm),)            # ragged last tile masked by Pallas

    cd = compute_dtype
    kernel = functools.partial(_ffn_kernel, k1=k1, n_rbf=n_rbf, compute_dtype=cd)

    itemsize = jnp.dtype(cd).itemsize
    flops = 2 * N * ((xw + n_rbf) * dh3 + dh3 * out_pad)
    transcendentals = N * (n_rbf + dh3)            # exp (RBF) + sigmoid (SiLU)
    bytes_accessed = (N * xw * itemsize + N * out_pad * 4
                      + (w1a.size + w1r.size + w2.size) * itemsize
                      + (b1.size + b2.size) * 4)

    const = lambda arr: pl.BlockSpec(arr.shape, lambda i: (0, 0))

    packed = pl.pallas_call(
        kernel,
        grid=grid,
        in_specs=[pl.BlockSpec((tm, xw), lambda i: (i, 0)),   # single row stream
                  const(w1a), const(w1r), const(b1), const(w2), const(b2)],
        out_specs=pl.BlockSpec((tm, out_pad), lambda i: (i, 0)),
        out_shape=jax.ShapeDtypeStruct((N, out_pad), jnp.float32),
        compiler_params=pltpu.CompilerParams(
            dimension_semantics=("parallel",)),
        cost_estimate=pl.CostEstimate(flops=flops,
                                      transcendentals=transcendentals,
                                      bytes_accessed=bytes_accessed),
    )(x.astype(cd),
      w1a.astype(cd), w1r.astype(cd), b1, w2.astype(cd), b2)
    return packed


# ------------------------------ JAX glue -------------------------------------
def scatter_mean(x, idx, num_segments):
    s = jax.ops.segment_sum(x, idx, num_segments=num_segments)
    cnt = jax.ops.segment_sum(jnp.ones((x.shape[0], 1), x.dtype), idx,
                              num_segments=num_segments)
    return s / jnp.maximum(cnt, 1.0)


def fuse_params(params, *, d_in, n_rbf, out_pad=OUT_PAD):
    """Fold the 12 per-head weights into 5 arrays.

    Per-head first-layer weights have rows ordered [H | Hc | radial | Ea]
    (the reference input concat order).  The kernel's row-input slab is
    x = [H | Hc | Ea | Zo], so rows are reordered to [H | Hc | Ea | 0(Zo)] for
    w1a and the radial rows are split off into w1r.  Heads are stacked
    [h | e | z] along the hidden axis; W2 is the matching block-diagonal,
    zero-padded to `out_pad` columns (lane-dense packed output)."""
    dh4 = params['w2h'].shape[0]
    d_out = params['w2h'].shape[1]
    hid_edge = params['w2e'].shape[1]
    w_out = d_out + hid_edge + 1
    assert w_out <= out_pad

    def split_rows(w):
        h_hc = w[:2 * d_in]
        rad = w[2 * d_in:2 * d_in + n_rbf]
        ea = w[2 * d_in + n_rbf:]
        a = jnp.concatenate([h_hc, ea, jnp.zeros((3, w.shape[1]), w.dtype)], axis=0)
        return a, rad

    a_h, r_h = split_rows(params['w1h'])
    a_e, r_e = split_rows(params['w1e'])
    a_z, r_z = split_rows(params['w1z'])
    w1a = jnp.concatenate([a_h, a_e, a_z], axis=1)       # (2*d_in+hid_edge+3, 3*dh4)
    w1r = jnp.concatenate([r_h, r_e, r_z], axis=1)       # (n_rbf, 3*dh4)
    b1 = jnp.concatenate([params['b1h'], params['b1e'], params['b1z']], axis=1)

    w2 = jnp.zeros((3 * dh4, out_pad), jnp.float32)
    w2 = w2.at[0:dh4, 0:d_out].set(params['w2h'])
    w2 = w2.at[dh4:2 * dh4, d_out:d_out + hid_edge].set(params['w2e'])
    w2 = w2.at[2 * dh4:, d_out + hid_edge:w_out].set(params['w2z'])
    b2 = jnp.zeros((1, out_pad), jnp.float32)
    b2 = b2.at[:, 0:d_out].set(params['b2h'])
    b2 = b2.at[:, d_out:d_out + hid_edge].set(params['b2e'])
    b2 = b2.at[:, d_out + hid_edge:w_out].set(params['b2z'])
    return {'w1a': w1a, 'w1r': w1r, 'b1': b1, 'w2': w2, 'b2': b2}


@functools.partial(jax.jit, static_argnames=("num_blocks", "n_rbf", "d_out",
                                             "residual", "tm_cap",
                                             "compute_dtype"))
def equivariant_ffn_forward(fparams, H, Z, edge_attr, block_id, edge_id,
                            num_blocks, n_rbf, d_out, residual=True,
                            tm_cap=1024, compute_dtype=jnp.float32):
    N, d_in = H.shape
    hid_edge = edge_attr.shape[-1]
    k1 = 2 * d_in + hid_edge

    Zc = scatter_mean(Z, block_id, num_blocks)[block_id]
    Zo = Z - Zc
    Hc = scatter_mean(H, block_id, num_blocks)[block_id]
    Ea = scatter_mean(edge_attr, edge_id[0], N)

    # One lane-dense row stream for the kernel: [H | Hc | Ea | Zo].
    x = jnp.concatenate([H, Hc, Ea, Zo], axis=-1)

    packed = ffn_pallas(x, fparams['w1a'], fparams['w1r'], fparams['b1'],
                        fparams['w2'], fparams['b2'],
                        n_rbf=n_rbf, k1=k1, tm_cap=tm_cap,
                        compute_dtype=compute_dtype)

    hup = packed[:, :d_out]
    eout = packed[:, d_out:d_out + hid_edge]
    z_scale = packed[:, d_out + hid_edge:d_out + hid_edge + 1]
    zup = z_scale * Zo                  # tiny elementwise; fused with residual by XLA

    edge_update = eout[edge_id[0]] * edge_attr
    H_new = H + hup if residual else hup
    Z_new = Z + zup if residual else zup
    edge_new = edge_attr + edge_update if residual else edge_update
    return H_new, Z_new, edge_new


# --------------------------- plain-JAX reference ------------------------------
def reference_forward(params, H, Z, edge_attr, block_id, edge_id,
                      num_blocks, n_rbf, residual=True):
    N = H.shape[0]
    Zc = scatter_mean(Z, block_id, num_blocks)[block_id]
    Zo = Z - Zc
    Hc = scatter_mean(H, block_id, num_blocks)[block_id]
    Ea = scatter_mean(edge_attr, edge_id[0], N)

    d = jnp.sqrt(jnp.sum(Zo * Zo, -1, keepdims=True) + NORM_EPS)
    ds = d / CUTOFF
    a = -(ENV_P + 1) * (ENV_P + 2) / 2
    b = ENV_P * (ENV_P + 2)
    c = -ENV_P * (ENV_P + 1) / 2
    env = jnp.where(ds < 1.0, 1 + a * ds ** 5 + b * ds ** 6 + c * ds ** 7, 0.0)
    offs = jnp.linspace(0.0, 1.0, n_rbf, dtype=jnp.float32)[None, :]
    delta = 1.0 / (n_rbf - 1)
    radial = env * jnp.exp(-0.5 / delta ** 2 * (ds - offs) ** 2)

    x = jnp.concatenate([H, Hc, radial, Ea], axis=-1)

    def mlp(w1, b1, w2, b2):
        h1 = x @ w1 + b1
        h1 = h1 * jax.nn.sigmoid(h1)
        return h1 @ w2 + b2

    p = params
    hup = mlp(p['w1h'], p['b1h'], p['w2h'], p['b2h'])
    zup = mlp(p['w1z'], p['b1z'], p['w2z'], p['b2z']) * Zo
    eout = mlp(p['w1e'], p['b1e'], p['w2e'], p['b2e'])
    edge_update = eout[edge_id[0]] * edge_attr
    return (H + hup if residual else hup,
            Z + zup if residual else zup,
            edge_attr + edge_update if residual else edge_update)


# ------------------------------ params ---------------------------------------
def init_params(key, d_in, d_hidden, d_out, hid_edge, n_rbf):
    F = 2 * d_in + n_rbf + hid_edge
    dh4 = 4 * d_hidden
    ks = jax.random.split(key, 12)

    def lin(k, fi, fo):
        return jax.random.normal(k, (fi, fo), jnp.float32) / jnp.sqrt(float(fi))

    def bias(k, fo):
        return jax.random.normal(k, (1, fo), jnp.float32) * 0.01

    return {
        'w1h': lin(ks[0], F, dh4), 'b1h': bias(ks[1], dh4),
        'w2h': lin(ks[2], dh4, d_out), 'b2h': bias(ks[3], d_out),
        'w1z': lin(ks[4], F, dh4), 'b1z': bias(ks[5], dh4),
        'w2z': lin(ks[6], dh4, 1), 'b2z': bias(ks[7], 1),
        'w1e': lin(ks[8], F, dh4), 'b1e': bias(ks[9], dh4),
        'w2e': lin(ks[10], dh4, hid_edge), 'b2e': bias(ks[11], hid_edge),
    }


# -------------------------------- main ----------------------------------------
if __name__ == "__main__":
    d_in = 8
    d_hidden = 16
    d_out = 8          # residual H + H_update requires d_out == d_in
    hid_edge = 8       # d_edge != 0 -> edge branch active
    n_rbf = 16
    N = 200            # nodes (single ragged tile: tm = 208 > N)
    E = 400            # edges
    num_blocks = 5

    key = jax.random.PRNGKey(0)
    kH, kZ, kE, kEid, kP = jax.random.split(key, 5)

    H = jax.random.normal(kH, (N, d_in), jnp.float32)
    Z = jax.random.normal(kZ, (N, 3), jnp.float32)
    edge_attr = jax.random.normal(kE, (E, hid_edge), jnp.float32)
    block_id = jnp.repeat(jnp.arange(num_blocks, dtype=jnp.int32), N // num_blocks)
    edge_id = jax.random.randint(kEid, (2, E), 0, N, dtype=jnp.int32)

    params = init_params(kP, d_in, d_hidden, d_out, hid_edge, n_rbf)
    fparams = fuse_params(params, d_in=d_in, n_rbf=n_rbf)

    H_ref, Z_ref, E_ref = reference_forward(
        params, H, Z, edge_attr, block_id, edge_id, num_blocks, n_rbf)
    jax.block_until_ready((H_ref, Z_ref, E_ref))

    # f32 MXU operands.  Tolerance accounts for TPU matmul default precision
    # (bf16 MXU passes) possibly differing between the XLA reference dots and
    # the Mosaic in-kernel dots; a structural bug would show O(1) deviations.
    H_new, Z_new, E_new = equivariant_ffn_forward(
        fparams, H, Z, edge_attr, block_id, edge_id,
        num_blocks=num_blocks, n_rbf=n_rbf, d_out=d_out)
    jax.block_until_ready((H_new, Z_new, E_new))
    assert jnp.allclose(H_new, H_ref, atol=5e-2, rtol=5e-2)
    assert jnp.allclose(Z_new, Z_ref, atol=5e-2, rtol=5e-2)
    assert jnp.allclose(E_new, E_ref, atol=5e-2, rtol=5e-2)

    # bf16 MXU operands (wrapper-side cast of the row slab), f32 accumulation
    # and f32 elementwise math — looser tolerance.
    H_bf, Z_bf, E_bf = equivariant_ffn_forward(
        fparams, H, Z, edge_attr, block_id, edge_id,
        num_blocks=num_blocks, n_rbf=n_rbf, d_out=d_out,
        compute_dtype=jnp.bfloat16)
    jax.block_until_ready((H_bf, Z_bf, E_bf))
    assert jnp.allclose(H_bf, H_ref, atol=1.5e-1, rtol=1.5e-1)
    assert jnp.allclose(Z_bf, Z_ref, atol=1.5e-1, rtol=1.5e-1)
    assert jnp.allclose(E_bf, E_ref, atol=1.5e-1, rtol=1.5e-1)

    print("KERNEL_OK")
</pallas_src>

<mosaic_0001>
module attributes {stable_mosaic.version = 11 : i64} {
  func.func @_ffn_kernel(%arg0: i32, %arg1: memref<208x27xf32, #tpu.memory_space<vmem>>, %arg2: memref<27x192xf32, #tpu.memory_space<vmem>>, %arg3: memref<16x192xf32, #tpu.memory_space<vmem>>, %arg4: memref<1x192xf32, #tpu.memory_space<vmem>>, %arg5: memref<192x128xf32, #tpu.memory_space<vmem>>, %arg6: memref<1x128xf32, #tpu.memory_space<vmem>>, %arg7: memref<208x128xf32, #tpu.memory_space<vmem>>) attributes {dimension_semantics = [#tpu.dimension_semantics<parallel>], iteration_bounds = array<i64: 1>, scalar_prefetch = 0 : i64, scratch_operands = 0 : i64, tpu.core_type = #tpu.core_type<tc>, window_params = [{transform_indices = @transform_0, window_bounds = array<i64: 208, 27>}, {pipeline_mode = #tpu.pipeline_mode<synchronous>, transform_indices = @transform_1, window_bounds = array<i64: 27, 192>}, {pipeline_mode = #tpu.pipeline_mode<synchronous>, transform_indices = @transform_2, window_bounds = array<i64: 16, 192>}, {pipeline_mode = #tpu.pipeline_mode<synchronous>, transform_indices = @transform_3, window_bounds = array<i64: 1, 192>}, {pipeline_mode = #tpu.pipeline_mode<synchronous>, transform_indices = @transform_4, window_bounds = array<i64: 192, 128>}, {pipeline_mode = #tpu.pipeline_mode<synchronous>, transform_indices = @transform_5, window_bounds = array<i64: 1, 128>}, {transform_indices = @transform_6, window_bounds = array<i64: 208, 128>}]} {
    %c0 = arith.constant 0 : index
    %c0_0 = arith.constant 0 : index
    %0 = vector.load %arg1[%c0, %c0_0] : memref<208x27xf32, #tpu.memory_space<vmem>>, vector<208x27xf32>
    %1 = vector.extract_strided_slice %0 {offsets = [0, 24], sizes = [208, 3], strides = [1, 1]} : vector<208x27xf32> to vector<208x3xf32>
    %2 = arith.mulf %1, %1 : vector<208x3xf32>
    %cst = arith.constant dense<0.000000e+00> : vector<208xf32>
    %3 = vector.multi_reduction <add>, %2, %cst [1] : vector<208x3xf32> to vector<208xf32>
    %4 = vector.shape_cast %3 : vector<208xf32> to vector<208x1xf32>
    %cst_1 = arith.constant 9.99999996E-13 : f32
    %5 = vector.broadcast %cst_1 : f32 to vector<208x1xf32>
    %6 = arith.addf %4, %5 : vector<208x1xf32>
    %7 = math.sqrt %6 : vector<208x1xf32>
    %cst_2 = arith.constant 0.142857149 : f32
    %8 = vector.broadcast %cst_2 : f32 to vector<208x1xf32>
    %9 = arith.mulf %7, %8 : vector<208x1xf32>
    %10 = arith.mulf %9, %9 : vector<208x1xf32>
    %11 = arith.mulf %10, %10 : vector<208x1xf32>
    %12 = arith.mulf %11, %9 : vector<208x1xf32>
    %cst_3 = arith.constant -1.500000e+01 : f32
    %13 = vector.broadcast %cst_3 : f32 to vector<208x1xf32>
    %14 = arith.mulf %9, %13 : vector<208x1xf32>
    %cst_4 = arith.constant 3.500000e+01 : f32
    %15 = vector.broadcast %cst_4 : f32 to vector<208x1xf32>
    %16 = arith.addf %15, %14 : vector<208x1xf32>
    %17 = arith.mulf %9, %16 : vector<208x1xf32>
    %cst_5 = arith.constant -2.100000e+01 : f32
    %18 = vector.broadcast %cst_5 : f32 to vector<208x1xf32>
    %19 = arith.addf %18, %17 : vector<208x1xf32>
    %20 = arith.mulf %12, %19 : vector<208x1xf32>
    %cst_6 = arith.constant 1.000000e+00 : f32
    %21 = vector.broadcast %cst_6 : f32 to vector<208x1xf32>
    %22 = arith.addf %21, %20 : vector<208x1xf32>
    %cst_7 = arith.constant 1.000000e+00 : f32
    %23 = vector.broadcast %cst_7 : f32 to vector<208x1xf32>
    %24 = arith.cmpf olt, %9, %23 : vector<208x1xf32>
    %cst_8 = arith.constant 0.000000e+00 : f32
    %25 = vector.broadcast %cst_8 : f32 to vector<208x1xf32>
    %26 = arith.select %24, %22, %25 : vector<208x1xi1>, vector<208x1xf32>
    %27 = tpu.iota {dimensions = array<i32: 1>} : vector<1x16xi32>
    %28 = arith.sitofp %27 : vector<1x16xi32> to vector<1x16xf32>
    %cst_9 = arith.constant 0.0666666701 : f32
    %29 = vector.broadcast %cst_9 : f32 to vector<1x16xf32>
    %30 = arith.mulf %28, %29 : vector<1x16xf32>
    %31 = vector.broadcast %9 : vector<208x1xf32> to vector<208x16xf32>
    %32 = vector.broadcast %30 : vector<1x16xf32> to vector<208x16xf32>
    %33 = arith.subf %31, %32 : vector<208x16xf32>
    %cst_10 = arith.constant -1.125000e+02 : f32
    %34 = vector.broadcast %cst_10 : f32 to vector<208x16xf32>
    %35 = arith.mulf %34, %33 : vector<208x16xf32>
    %36 = arith.mulf %35, %33 : vector<208x16xf32>
    %37 = math.exp %36 : vector<208x16xf32>
    %38 = vector.broadcast %26 : vector<208x1xf32> to vector<208x16xf32>
    %39 = arith.mulf %38, %37 : vector<208x16xf32>
    %c0_11 = arith.constant 0 : index
    %c0_12 = arith.constant 0 : index
    %40 = vector.load %arg2[%c0_11, %c0_12] : memref<27x192xf32, #tpu.memory_space<vmem>>, vector<27x192xf32>
    %cst_13 = arith.constant dense<0.000000e+00> : vector<208x192xf32>
    %41 = tpu.matmul %0, %40, %cst_13 {dimension_numbers = #tpu.dot_dimension_numbers<[1], [0], [0], [1], [0, 0, 1, 1], [], []>} : vector<208x27xf32>, vector<27x192xf32>, vector<208x192xf32> -> vector<208x192xf32>
    %c0_14 = arith.constant 0 : index
    %c0_15 = arith.constant 0 : index
    %42 = vector.load %arg3[%c0_14, %c0_15] : memref<16x192xf32, #tpu.memory_space<vmem>>, vector<16x192xf32>
    %cst_16 = arith.constant dense<0.000000e+00> : vector<208x192xf32>
    %43 = tpu.matmul %39, %42, %cst_16 {dimension_numbers = #tpu.dot_dimension_numbers<[1], [0], [0], [1], [0, 0, 1, 1], [], []>} : vector<208x16xf32>, vector<16x192xf32>, vector<208x192xf32> -> vector<208x192xf32>
    %44 = arith.addf %41, %43 : vector<208x192xf32>
    %c0_17 = arith.constant 0 : index
    %c0_18 = arith.constant 0 : index
    %45 = vector.load %arg4[%c0_17, %c0_18] : memref<1x192xf32, #tpu.memory_space<vmem>>, vector<1x192xf32>
    %46 = vector.broadcast %45 : vector<1x192xf32> to vector<208x192xf32>
    %47 = arith.addf %44, %46 : vector<208x192xf32>
    %48 = arith.negf %47 : vector<208x192xf32>
    %49 = math.exp %48 : vector<208x192xf32>
    %cst_19 = arith.constant 1.000000e+00 : f32
    %50 = vector.broadcast %cst_19 : f32 to vector<208x192xf32>
    %51 = arith.addf %50, %49 : vector<208x192xf32>
    %52 = arith.divf %50, %51 : vector<208x192xf32>
    %53 = arith.mulf %47, %52 : vector<208x192xf32>
    %c0_20 = arith.constant 0 : index
    %c0_21 = arith.constant 0 : index
    %54 = vector.load %arg5[%c0_20, %c0_21] : memref<192x128xf32, #tpu.memory_space<vmem>>, vector<192x128xf32>
    %cst_22 = arith.constant dense<0.000000e+00> : vector<208x128xf32>
    %55 = tpu.matmul %53, %54, %cst_22 {dimension_numbers = #tpu.dot_dimension_numbers<[1], [0], [0], [1], [0, 0, 1, 1], [], []>} : vector<208x192xf32>, vector<192x128xf32>, vector<208x128xf32> -> vector<208x128xf32>
    %c0_23 = arith.constant 0 : index
    %c0_24 = arith.constant 0 : index
    %56 = vector.load %arg6[%c0_23, %c0_24] : memref<1x128xf32, #tpu.memory_space<vmem>>, vector<1x128xf32>
    %57 = vector.broadcast %56 : vector<1x128xf32> to vector<208x128xf32>
    %58 = arith.addf %55, %57 : vector<208x128xf32>
    %c0_25 = arith.constant 0 : index
    %c0_26 = arith.constant 0 : index
    %59 = vector.load %arg7[%c0_25, %c0_26] : memref<208x128xf32, #tpu.memory_space<vmem>>, vector<208x128xf32>
    tpu.vector_store %arg7[%c0_25, %c0_26], %58 {strides = array<i32>} : memref<208x128xf32, #tpu.memory_space<vmem>>, vector<208x128xf32>,
    return
  }
  func.func @transform_0(%arg0: i32) -> (i32, i32) {
    %c0_i32 = arith.constant 0 : i32
    %c0_i32_0 = arith.constant 0 : i32
    return %arg0, %c0_i32 : i32, i32
  }
  func.func @transform_1(%arg0: i32) -> (i32, i32) {
    %c0_i32 = arith.constant 0 : i32
    %c0_i32_0 = arith.constant 0 : i32
    %c0_i32_1 = arith.constant 0 : i32
    return %c0_i32, %c0_i32_0 : i32, i32
  }
  func.func @transform_2(%arg0: i32) -> (i32, i32) {
    %c0_i32 = arith.constant 0 : i32
    %c0_i32_0 = arith.constant 0 : i32
    %c0_i32_1 = arith.constant 0 : i32
    return %c0_i32, %c0_i32_0 : i32, i32
  }
  func.func @transform_3(%arg0: i32) -> (i32, i32) {
    %c0_i32 = arith.constant 0 : i32
    %c0_i32_0 = arith.constant 0 : i32
    %c0_i32_1 = arith.constant 0 : i32
    return %c0_i32, %c0_i32_0 : i32, i32
  }
  func.func @transform_4(%arg0: i32) -> (i32, i32) {
    %c0_i32 = arith.constant 0 : i32
    %c0_i32_0 = arith.constant 0 : i32
    %c0_i32_1 = arith.constant 0 : i32
    return %c0_i32, %c0_i32_0 : i32, i32
  }
  func.func @transform_5(%arg0: i32) -> (i32, i32) {
    %c0_i32 = arith.constant 0 : i32
    %c0_i32_0 = arith.constant 0 : i32
    %c0_i32_1 = arith.constant 0 : i32
    return %c0_i32, %c0_i32_0 : i32, i32
  }
  func.func @transform_6(%arg0: i32) -> (i32, i32) {
    %c0_i32 = arith.constant 0 : i32
    %c0_i32_0 = arith.constant 0 : i32
    return %arg0, %c0_i32 : i32, i32
  }
}

</mosaic_0001>

<bundles_post_ra>
// kernel: sub.1
= control target key start
LH: loop header
LB: loop body
LE: loop exit
PB: predicated region body
PF: predicated region fallthrough
CT: control target
= control target key end

     0   :  { %s562_s0 = inlined_call_operand.vmem [shape: f32[200,3], index: 0, kind: input, shape index: {}]   ;;  %s563_s1 = inlined_call_operand.vmem [shape: f32[200,3], index: 1, kind: input, shape index: {}]   ;;  %s564_s2 = inlined_call_operand.vmem [shape: f32[200,3], index: 2, kind: output, shape index: {}]  }
   0x1   :  { %v3_v0 = vld [vmem:[%s562_s0] sm:$0xff]  ;;  %v250_v2 = vld [vmem:[%s562_s0 + $0x8] sm:$0xff]  ;;  %v253_v5 = vld [vmem:[%s562_s0 + $0x10] sm:$0xff] }
   0x2   :  { %v4_v1 = vld [vmem:[%s563_s1] sm:$0xff]  ;;  %v251_v4 = vld [vmem:[%s563_s1 + $0x8] sm:$0xff]  ;;  %v254_v6 = vld [vmem:[%s563_s1 + $0x10] sm:$0xff] }
   0x3   :  { %v7_v3 = vsub.f32 %v3_v0, %v4_v1  ;;  %v16_v7 = vsub.f32 %v250_v2, %v251_v4  ;;  %v26_v8 = vsub.f32 %v253_v5, %v254_v6  ;;  %v256_v9 = vld [vmem:[%s562_s0 + $0x18] sm:$0xff]  ;;  %v259_v11 = vld [vmem:[%s562_s0 + $0x20] sm:$0xff]  ;;  %v262_v14 = vld [vmem:[%s562_s0 + $0x28] sm:$0xff] }
   0x4   :  { %v257_v10 = vld [vmem:[%s563_s1 + $0x18] sm:$0xff]  ;;  %v260_v13 = vld [vmem:[%s563_s1 + $0x20] sm:$0xff]  ;;  %v263_v15 = vld [vmem:[%s563_s1 + $0x28] sm:$0xff] }
   0x5   :  { %9 = vst [vmem:[%s564_s2] sm:$0xff] %v7_v3  ;;  %v36_v12 = vsub.f32 %v256_v9, %v257_v10  ;;  %v46_v16 = vsub.f32 %v259_v11, %v260_v13  ;;  %v56_v17 = vsub.f32 %v262_v14, %v263_v15  ;;  %v265_v18 = vld [vmem:[%s562_s0 + $0x30] sm:$0xff]  ;;  %v268_v20 = vld [vmem:[%s562_s0 + $0x38] sm:$0xff]  ;;  %v271_v23 = vld [vmem:[%s562_s0 + $0x40] sm:$0xff] }
   0x6   :  { %252 = vst [vmem:[%s564_s2 + $0x8] sm:$0xff] %v16_v7  ;;  %v266_v19 = vld [vmem:[%s563_s1 + $0x30] sm:$0xff]  ;;  %v269_v22 = vld [vmem:[%s563_s1 + $0x38] sm:$0xff]  ;;  %v272_v24 = vld [vmem:[%s563_s1 + $0x40] sm:$0xff] }
   0x7   :  { %255 = vst [vmem:[%s564_s2 + $0x10] sm:$0xff] %v26_v8  ;;  %v66_v21 = vsub.f32 %v265_v18, %v266_v19  ;;  %v76_v25 = vsub.f32 %v268_v20, %v269_v22  ;;  %v86_v26 = vsub.f32 %v271_v23, %v272_v24  ;;  %v274_v27 = vld [vmem:[%s562_s0 + $0x48] sm:$0xff]  ;;  %v277_v29 = vld [vmem:[%s562_s0 + $0x50] sm:$0xff]  ;;  %v280_v32 = vld [vmem:[%s562_s0 + $0x58] sm:$0xff] }
   0x8   :  { %258 = vst [vmem:[%s564_s2 + $0x18] sm:$0xff] %v36_v12  ;;  %v275_v28 = vld [vmem:[%s563_s1 + $0x48] sm:$0xff]  ;;  %v278_v31 = vld [vmem:[%s563_s1 + $0x50] sm:$0xff]  ;;  %v281_v33 = vld [vmem:[%s563_s1 + $0x58] sm:$0xff] }
   0x9   :  { %261 = vst [vmem:[%s564_s2 + $0x20] sm:$0xff] %v46_v16  ;;  %v96_v30 = vsub.f32 %v274_v27, %v275_v28  ;;  %v106_v34 = vsub.f32 %v277_v29, %v278_v31  ;;  %v116_v35 = vsub.f32 %v280_v32, %v281_v33  ;;  %v283_v36 = vld [vmem:[%s562_s0 + $0x60] sm:$0xff]  ;;  %v286_v38 = vld [vmem:[%s562_s0 + $0x68] sm:$0xff]  ;;  %v289_v41 = vld [vmem:[%s562_s0 + $0x70] sm:$0xff] }
   0xa   :  { %264 = vst [vmem:[%s564_s2 + $0x28] sm:$0xff] %v56_v17  ;;  %v284_v37 = vld [vmem:[%s563_s1 + $0x60] sm:$0xff]  ;;  %v287_v40 = vld [vmem:[%s563_s1 + $0x68] sm:$0xff]  ;;  %v290_v42 = vld [vmem:[%s563_s1 + $0x70] sm:$0xff] }
   0xb   :  { %267 = vst [vmem:[%s564_s2 + $0x30] sm:$0xff] %v66_v21  ;;  %v126_v39 = vsub.f32 %v283_v36, %v284_v37  ;;  %v136_v43 = vsub.f32 %v286_v38, %v287_v40  ;;  %v146_v44 = vsub.f32 %v289_v41, %v290_v42  ;;  %v292_v45 = vld [vmem:[%s562_s0 + $0x78] sm:$0xff]  ;;  %v295_v47 = vld [vmem:[%s562_s0 + $0x80] sm:$0xff]  ;;  %v298_v50 = vld [vmem:[%s562_s0 + $0x88] sm:$0xff] }
   0xc   :  { %270 = vst [vmem:[%s564_s2 + $0x38] sm:$0xff] %v76_v25  ;;  %v293_v46 = vld [vmem:[%s563_s1 + $0x78] sm:$0xff]  ;;  %v296_v49 = vld [vmem:[%s563_s1 + $0x80] sm:$0xff]  ;;  %v299_v51 = vld [vmem:[%s563_s1 + $0x88] sm:$0xff] }
   0xd   :  { %273 = vst [vmem:[%s564_s2 + $0x40] sm:$0xff] %v86_v26  ;;  %v156_v48 = vsub.f32 %v292_v45, %v293_v46  ;;  %v166_v52 = vsub.f32 %v295_v47, %v296_v49  ;;  %v176_v53 = vsub.f32 %v298_v50, %v299_v51  ;;  %v301_v54 = vld [vmem:[%s562_s0 + $0x90] sm:$0xff]  ;;  %v304_v56 = vld [vmem:[%s562_s0 + $0x98] sm:$0xff]  ;;  %v307_v59 = vld [vmem:[%s562_s0 + $0xa0] sm:$0xff] }
   0xe   :  { %276 = vst [vmem:[%s564_s2 + $0x48] sm:$0xff] %v96_v30  ;;  %v302_v55 = vld [vmem:[%s563_s1 + $0x90] sm:$0xff]  ;;  %v305_v58 = vld [vmem:[%s563_s1 + $0x98] sm:$0xff]  ;;  %v308_v60 = vld [vmem:[%s563_s1 + $0xa0] sm:$0xff] }
   0xf   :  { %279 = vst [vmem:[%s564_s2 + $0x50] sm:$0xff] %v106_v34  ;;  %v186_v57 = vsub.f32 %v301_v54, %v302_v55  ;;  %v196_v61 = vsub.f32 %v304_v56, %v305_v58  ;;  %v206_v62 = vsub.f32 %v307_v59, %v308_v60  ;;  %v310_v63 = vld [vmem:[%s562_s0 + $0xa8] sm:$0xff]  ;;  %v313_v1 = vld [vmem:[%s562_s0 + $0xb0] sm:$0xff]  ;;  %v316_v4 = vld [vmem:[%s562_s0 + $0xb8] sm:$0xff] }
  0x10   :  { %282 = vst [vmem:[%s564_s2 + $0x58] sm:$0xff] %v116_v35  ;;  %v311_v0 = vld [vmem:[%s563_s1 + $0xa8] sm:$0xff]  ;;  %v314_v3 = vld [vmem:[%s563_s1 + $0xb0] sm:$0xff]  ;;  %v317_v5 = vld [vmem:[%s563_s1 + $0xb8] sm:$0xff] }
  0x11   :  { %285 = vst [vmem:[%s564_s2 + $0x60] sm:$0xff] %v126_v39  ;;  %v216_v2 = vsub.f32 %v310_v63, %v311_v0  ;;  %v226_v6 = vsub.f32 %v313_v1, %v314_v3  ;;  %v236_v7 = vsub.f32 %v316_v4, %v317_v5  ;;  %v319_v8 = vld [vmem:[%s562_s0 + $0xc0] sm:$0xff] }
  0x12   :  { %288 = vst [vmem:[%s564_s2 + $0x68] sm:$0xff] %v136_v43  ;;  %v320_v9 = vld [vmem:[%s563_s1 + $0xc0] sm:$0xff] }
  0x13   :  { %291 = vst [vmem:[%s564_s2 + $0x70] sm:$0xff] %v146_v44  ;;  %v246_v10 = vsub.f32 %v319_v8, %v320_v9 }
  0x14   :  { %294 = vst [vmem:[%s564_s2 + $0x78] sm:$0xff] %v156_v48 }
  0x15   :  { %297 = vst [vmem:[%s564_s2 + $0x80] sm:$0xff] %v166_v52 }
  0x16   :  { %300 = vst [vmem:[%s564_s2 + $0x88] sm:$0xff] %v176_v53 }
  0x17   :  { %303 = vst [vmem:[%s564_s2 + $0x90] sm:$0xff] %v186_v57 }
  0x18   :  { %306 = vst [vmem:[%s564_s2 + $0x98] sm:$0xff] %v196_v61 }
  0x19   :  { %309 = vst [vmem:[%s564_s2 + $0xa0] sm:$0xff] %v206_v62 }
  0x1a   :  { %312 = vst [vmem:[%s564_s2 + $0xa8] sm:$0xff] %v216_v2 }
  0x1b   :  { %315 = vst [vmem:[%s564_s2 + $0xb0] sm:$0xff] %v226_v6 }
  0x1c   :  { %318 = vst [vmem:[%s564_s2 + $0xb8] sm:$0xff] %v236_v7 }
  0x1d   :  { %321 = vst [vmem:[%s564_s2 + $0xc0] sm:$0xff] %v246_v10 }

// kernel: equivariant_ffn_forward.1
= control target key start
LH: loop header
LB: loop body
LE: loop exit
PB: predicated region body
PF: predicated region fallthrough
CT: control target
= control target key end

     0   :  { %s3710_s27 = smov 104   ;;  %vm179_vm0 = vcmask 23552   ;;  %vm1080_vm9 = vcmask 130048   ;;  %s6233_s0 = inlined_call_operand.vmem [shape: f32[200,27], index: 0, kind: input, shape index: {}]   ;;  %s6234_s1 = inlined_call_operand.vmem [shape: f32[27,192], index: 1, kind: input, shape index: {}]   ;;  %s6235_s2 = inlined_call_operand.vmem [shape: f32[16,192], index: 2, kind: input, shape index: {}]   ;;  %s6236_s3 = inlined_call_operand.vmem [shape: f32[1,192], index: 3, kind: input, shape index: {}]   ;;  %s6237_s4 = inlined_call_operand.vmem [shape: f32[192,128], index: 4, kind: input, shape index: {}]   ;;  %s6238_s5 = inlined_call_operand.vmem [shape: f32[1,128], index: 5, kind: input, shape index: {}]   ;;  %s6239_s6 = inlined_call_operand.vmem [shape: f32[200,128], index: 6, kind: output, shape index: {}]  }
   0x1   :  { %v38_v0 = vld [vmem:[%s6233_s0 + $0x78] sm:$0xff]  ;;  %v36_v1 = vld [vmem:[%s6233_s0 + $0x68] sm:$0xff]  ;;  %v39_v6 = vld [vmem:[%s6233_s0 + $0x80] sm:$0xff] }
   0x2   :  { %v64_v2 = vmul.f32 %v38_v0, %v38_v0  ;;  %v62_v3 = vmul.f32 %v36_v1, %v36_v1  ;;  %v40_v4 = vld [vmem:[%s6233_s0 + $0x88] sm:$0xff]  ;;  %v37_v7 = vld [vmem:[%s6233_s0 + $0x70] sm:$0xff]  ;;  %v65_v9 = vmul.f32 %v39_v6, %v39_v6  ;;  %v42_v12 = vld [vmem:[%s6233_s0 + $0x98] sm:$0xff] }
   0x3   :  { %v66_v5 = vmul.f32 %v40_v4, %v40_v4  ;;  %v41_v8 = vld [vmem:[%s6233_s0 + $0x90] sm:$0xff]  ;;  %v63_v10 = vmul.f32 %v37_v7, %v37_v7  ;;  %v44_v14 = vld [vmem:[%s6233_s0 + $0xa8] sm:$0xff]  ;;  %v68_v15 = vmul.f32 %v42_v12, %v42_v12  ;;  %v43_v18 = vld [vmem:[%s6233_s0 + $0xa0] sm:$0xff] }
   0x4   :  { %131 = vrot.lane.b32.xlu1 %v64_v2, %s3710_s27  ;;  %127 = vrot.lane.b32.xlu0 %v62_v3, %s3710_s27  ;;  %v67_v11 = vmul.f32 %v41_v8, %v41_v8  ;;  %v45_v13 = vld [vmem:[%s6233_s0 + $0xb0] sm:$0xff]  ;;  %v70_v17 = vmul.f32 %v44_v14, %v44_v14  ;;  %v47_v19 = vld [vmem:[%s6233_s0 + $0xc0] sm:$0xff]  ;;  %v69_v21 = vmul.f32 %v43_v18, %v43_v18 }
   0x5   :  { %135 = vrot.lane.b32.xlu2 %v66_v5, %s3710_s27  ;;  %v71_v16 = vmul.f32 %v45_v13, %v45_v13  ;;  %v46_v20 = vld [vmem:[%s6233_s0 + $0xb8] sm:$0xff]  ;;  %v73_v22 = vmul.f32 %v47_v19, %v47_v19  ;;  %v23_v42 = vld [vmem:[%s6233_s0] sm:$0xff]  ;;  %v48_v43 = vld [vmem:[%s6233_s0 + $0xc8] sm:$0xff]  ;;  %v908_v19 = vlaneseq }
   0x6   :  { %v72_v23 = vmul.f32 %v46_v20, %v46_v20  ;;  %v49_v44 = vmul.f32 %v23_v42, %v23_v42  ;;  %v74_v45 = vmul.f32 %v48_v43, %v48_v43  ;;  %v24_v46 = vld [vmem:[%s6233_s0 + $0x8] sm:$0xff]  ;;  %v27_v54 = vld [vmem:[%s6233_s0 + $0x20] sm:$0xff]  ;;  %v25_v56 = vld [vmem:[%s6233_s0 + $0x10] sm:$0xff] }
   0x7   :  { %v50_v47 = vmul.f32 %v24_v46, %v24_v46  ;;  %v53_v55 = vmul.f32 %v27_v54, %v27_v54  ;;  %v51_v57 = vmul.f32 %v25_v56, %v25_v56  ;;  %v28_v58 = vld [vmem:[%s6233_s0 + $0x28] sm:$0xff]  ;;  %v26_v59 = vld [vmem:[%s6233_s0 + $0x18] sm:$0xff]  ;;  %v1078_v8 = vld [vmem:[%s6235_s2 + $0x10] sm:$0xff] }
   0x8   :  { %v54_v60 = vmul.f32 %v28_v58, %v28_v58  ;;  %v52_v61 = vmul.f32 %v26_v59, %v26_v59  ;;  %3367 = vmatpush.msra.mxu2 %v1078_v8  ;;  %v1076_v14 = vld [vmem:[%s6235_s2] sm:$0xff]  ;;  %1173 = vmatpush.msra.mxu0 %v1078_v8 }
   0xa   :  { %3368 = vmatpush.msra.mxu2 %v1076_v14  ;;  %1174 = vmatpush.msra.mxu0 %v1076_v14 }
   0xc   :  { %133 = vrot.lane.b32.xlu1 %v65_v9, %s3710_s27  ;;  %129 = vrot.lane.b32.xlu0 %v63_v10, %s3710_s27  ;;  %v1079_v9 = vld [vmem:[%s6235_s2 + $0x18] sm:$0xff] }
   0xd   :  { %137 = vrot.lane.b32.xlu2 %v67_v11, %s3710_s27  ;;  %3369 = vmatpush.msra.mxu3 %v1079_v9 }
   0xe   :  { %1268 = vmatpush.msra.mxu1 %v1079_v9 }
  0x14   :  { %139 = vrot.lane.b32.xlu1 %v68_v15, %s3710_s27  ;;  %145 = vrot.lane.b32.xlu0 %v71_v16, %s3710_s27  ;;  %v1077_v15 = vld [vmem:[%s6235_s2 + $0x8] sm:$0xff] }
  0x15   :  { %143 = vrot.lane.b32.xlu2 %v70_v17, %s3710_s27  ;;  %3370 = vmatpush.msra.mxu3 %v1077_v15 }
  0x16   :  { %1269 = vmatpush.msra.mxu1 %v1077_v15 }
  0x1c   :  { %141 = vrot.lane.b32.xlu1 %v69_v21, %s3710_s27  ;;  %149 = vrot.lane.b32.xlu0 %v73_v22, %s3710_s27 }
  0x1d   :  { %147 = vrot.lane.b32.xlu2 %v72_v23, %s3710_s27 }
  0x5f   :  { %v136_v28 = vpop.permute.xlu2 %135 }
  0x60   :  { %v231_v29 = vsel %vm179_vm0, %v136_v28, 0.0  ;;  %v909_v28 = vand.u32 127, %v908_v19 }
  0x67   :  { %v138_v34 = vpop.permute.xlu2 %137 }
  0x68   :  { %v234_v35 = vsel %vm179_vm0, %v138_v34, 0.0 }
  0x6f   :  { %v144_v48 = vpop.permute.xlu2 %143 }
  0x70   :  { %v243_v51 = vsel %vm179_vm0, %v144_v48, 0.0 }
  0x76   :  { %v132_v24 = vpop.permute.xlu1 %131  ;;  %v128_v25 = vpop.permute.xlu0 %127 }
  0x77   :  { %v225_v26 = vsel %vm179_vm0, %v132_v24, 0.0  ;;  %v219_v27 = vsel %vm179_vm0, %v128_v25, 0.0  ;;  %v148_v49 = vpop.permute.xlu2 %147 }
  0x78   :  { %226 = vadd.xlane.f32.xlu1 %v225_v26  ;;  %220 = vadd.xlane.f32.xlu0 %v219_v27  ;;  %v249_v50 = vsel %vm179_vm0, %v148_v49, 0.0 }
  0x7e   :  { %v134_v30 = vpop.permute.xlu1 %133  ;;  %v130_v31 = vpop.permute.xlu0 %129 }
  0x7f   :  { %v222_v32 = vsel %vm179_vm0, %v130_v31, 0.0  ;;  %v228_v33 = vsel %vm179_vm0, %v134_v30, 0.0 }
  0x80   :  { %232 = vadd.xlane.f32.xlu1 %v231_v29  ;;  %223 = vadd.xlane.f32.xlu2 %v222_v32 }
  0x81   :  { %229 = vadd.xlane.f32.xlu0 %v228_v33 }
  0x86   :  { %v140_v36 = vpop.permute.xlu1 %139  ;;  %v146_v40 = vpop.permute.xlu0 %145 }
  0x87   :  { %v237_v37 = vsel %vm179_vm0, %v140_v36, 0.0  ;;  %v246_v41 = vsel %vm179_vm0, %v146_v40, 0.0  ;;  %v29_v40 = vld [vmem:[%s6233_s0 + $0x30] sm:$0xff] }
  0x88   :  { %235 = vadd.xlane.f32.xlu1 %v234_v35  ;;  %238 = vadd.xlane.f32.xlu2 %v237_v37 }
  0x8e   :  { %v142_v38 = vpop.permute.xlu1 %141  ;;  %v150_v52 = vpop.permute.xlu0 %149 }
  0x8f   :  { %v240_v39 = vsel %vm179_vm0, %v142_v38, 0.0  ;;  %v252_v53 = vsel %vm179_vm0, %v150_v52, 0.0 }
  0x90   :  { %241 = vadd.xlane.f32.xlu0 %v240_v39  ;;  %v910_v39 = vcvt.s32.f32 %v909_v28 }
  0x98   :  { %247 = vadd.xlane.f32.xlu0 %v246_v41 }
  0xa0   :  { %101 = vrot.lane.b32.xlu2 %v49_v44, %s3710_s27 }
  0xa1   :  { %151 = vrot.lane.b32.xlu1 %v74_v45, %s3710_s27 }
  0xac   :  { %103 = vrot.lane.b32.xlu0 %v50_v47, %s3710_s27  ;;  %v55_v47 = vmul.f32 %v29_v40, %v29_v40 }
  0xc9   :  { %250 = vadd.xlane.f32.xlu2 %v249_v50 }
  0xcb   :  { %244 = vadd.xlane.f32.xlu1 %v243_v51 }
  0xd6   :  { %253 = vadd.xlane.f32.xlu0 %v252_v53 }
  0xe1   :  { %109 = vrot.lane.b32.xlu2 %v53_v55, %s3710_s27  ;;  %v3892_v55 = vmul.f32 0.06666667, %v910_v39 }
  0xe4   :  { %105 = vrot.lane.b32.xlu1 %v51_v57, %s3710_s27 }
  0xea   :  { %111 = vrot.lane.b32.xlu0 %v54_v60, %s3710_s27 }
  0xeb   :  { %v227_v62 = vpop.xlane.xlu1 %226  ;;  %v221_v63 = vpop.xlane.xlu0 %220 }
  0xec   :  { %v3833_v0 = vadd.f32 1e-12, %v227_v62  ;;  %v3835_v1 = vadd.f32 1e-12, %v221_v63  ;;  %107 = vrot.lane.b32.xlu1 %v52_v61, %s3710_s27 }
  0xee   :  { %3373 = vrsqrt.f32 %v3833_v0  ;;  %vm447_vm1 = vcmp.eq.f32.partialorder %v3835_v1, inf  ;;  %v450_v33 = vand.u32 2147483648, %v3835_v1  ;;  %vm449_vm2 = vcmp.eq.f32.partialorder %v3835_v1, 0.0 }
  0xef   :  { %3375 = vrsqrt.f32 %v3835_v1  ;;  %vm471_vm4 = vcmp.eq.f32.partialorder %v3833_v0, inf  ;;  %vm473_vm6 = vcmp.eq.f32.partialorder %v3833_v0, 0.0 }
  0xf2   :  { %113 = vrot.lane.b32.xlu0 %v55_v47, %s3710_s27 }
  0xf3   :  { %v233_v2 = vpop.xlane.xlu1 %232  ;;  %v224_v3 = vpop.xlane.xlu2 %223 }
  0xf4   :  { %v3374_v4 = vpop.eup %3373  ;;  %v3840_v5 = vadd.f32 1e-12, %v233_v2  ;;  %v3842_v6 = vadd.f32 1e-12, %v224_v3  ;;  %v230_v7 = vpop.xlane.xlu0 %229 }
  0xf5   :  { %v3376_v10 = vpop.eup %3375  ;;  %v465_v11 = vmul.f32 %v3374_v4, %v3833_v0  ;;  %v3851_v12 = vadd.f32 1e-12, %v230_v7 }
  0xf6   :  { %v441_v13 = vmul.f32 %v3376_v10, %v3835_v1  ;;  %3377 = vrsqrt.f32 %v3840_v5  ;;  %vm459_vm3 = vcmp.eq.f32.partialorder %v3842_v6, inf  ;;  %v462_v2 = vand.u32 2147483648, %v3842_v6 }
  0xf7   :  { %v466_v16 = vmul.f32 %v3374_v4, %v465_v11  ;;  %3379 = vrsqrt.f32 %v3842_v6  ;;  %vm461_vm5 = vcmp.eq.f32.partialorder %v3842_v6, 0.0  ;;  %vm483_vm7 = vcmp.eq.f32.partialorder %v3851_v12, inf }
  0xf8   :  { %v442_v17 = vmul.f32 %v3376_v10, %v441_v13  ;;  %3381 = vrsqrt.f32 %v3851_v12  ;;  %vm485_vm8 = vcmp.eq.f32.partialorder %v3851_v12, 0.0  ;;  %vm495_vm11 = vcmp.eq.f32.partialorder %v3840_v5, inf }
  0xf9   :  { %v467_v18 = vmul.f32 0.5, %v466_v16  ;;  %vm497_vm12 = vcmp.eq.f32.partialorder %v3840_v5, 0.0 }
  0xfa   :  { %v443_v20 = vmul.f32 0.5, %v442_v17 }
  0xfb   :  { %v236_v21 = vpop.xlane.xlu1 %235  ;;  %v239_v25 = vpop.xlane.xlu2 %238  ;;  %v468_v27 = vsub.f32 1.5, %v467_v18 }
  0xfc   :  { %v3863_v22 = vpop.eup %3377  ;;  %v444_v23 = vsub.f32 1.5, %v443_v20  ;;  %v3865_v24 = vadd.f32 1e-12, %v236_v21  ;;  %v3874_v35 = vadd.f32 1e-12, %v239_v25  ;;  %v498_v20 = vand.u32 2147483648, %v3840_v5 }
  0xfd   :  { %v3380_v26 = vpop.eup %3379  ;;  %v489_v31 = vmul.f32 %v3863_v22, %v3840_v5  ;;  %v469_v41 = vmul.f32 %v3374_v4, %v468_v27 }
  0xfe   :  { %v3382_v29 = vpop.eup %3381  ;;  %v445_v30 = vmul.f32 %v3376_v10, %v444_v23  ;;  %v453_v32 = vmul.f32 %v3380_v26, %v3842_v6  ;;  %3383 = vrsqrt.f32 %v3865_v24  ;;  %v474_v10 = vand.u32 2147483648, %v3833_v0 }
  0xff   :  { %v477_v34 = vmul.f32 %v3382_v29, %v3851_v12  ;;  %v490_v43 = vmul.f32 %v3863_v22, %v489_v31  ;;  %3385 = vrsqrt.f32 %v3874_v35  ;;  %v470_v56 = vmul.f32 %v469_v41, %v3833_v0 }
 0x100   :  { %v446_v36 = vmul.f32 %v445_v30, %v3835_v1  ;;  %v454_v37 = vmul.f32 %v3380_v26, %v453_v32  ;;  %vm507_vm13 = vcmp.eq.f32.partialorder %v3865_v24, inf  ;;  %vm509_vm14 = vcmp.eq.f32.partialorder %v3865_v24, 0.0 }
 0x101   :  { %v478_v38 = vmul.f32 %v3382_v29, %v477_v34  ;;  %v491_v57 = vmul.f32 0.5, %v490_v43  ;;  %v472_v9 = vsel %vm471_vm4, %v3833_v0, %v470_v56 }
 0x102   :  { %v448_v42 = vsel %vm447_vm1, %v3835_v1, %v446_v36  ;;  %v455_v44 = vmul.f32 0.5, %v454_v37  ;;  %v475_v25 = vsel %vm473_vm6, %v474_v10, %v472_v9  ;;  %vm519_vm1 = vcmp.eq.f32.partialorder %v3874_v35, inf }
 0x103   :  { %v479_v45 = vmul.f32 0.5, %v478_v38  ;;  %v451_v46 = vsel %vm449_vm2, %v450_v33, %v448_v42  ;;  %v102_v50 = vpop.permute.xlu2 %101  ;;  %v242_v52 = vpop.xlane.xlu0 %241  ;;  %v492_v14 = vsub.f32 1.5, %v491_v57  ;;  %v3933_v37 = vmul.f32 0.14285715, %v475_v25 }
 0x104   :  { %v3884_v48 = vpop.eup %3383  ;;  %v456_v49 = vsub.f32 1.5, %v455_v44  ;;  %v3890_v54 = vmul.f32 0.14285715, %v451_v46  ;;  %v180_v59 = vsel %vm179_vm0, %v102_v50, 0.0  ;;  %v3897_v61 = vadd.f32 1e-12, %v242_v52 }
 0x105   :  { %v501_v51 = vmul.f32 %v3884_v48, %v3865_v24  ;;  %v480_v58 = vsub.f32 1.5, %v479_v45  ;;  %v3902_v1 = vpop.eup %3385  ;;  %v715_v52 = vmul.f32 -15.0, %v3933_v37  ;;  %v637_v57 = vmul.f32 %v3933_v37, %v3933_v37 }
 0x106   :  { %v457_v53 = vmul.f32 %v3380_v26, %v456_v49  ;;  %v635_v62 = vmul.f32 %v3890_v54, %v3890_v54  ;;  %v713_v63 = vmul.f32 -15.0, %v3890_v54  ;;  %v925_v13 = vsub.f32 %v3890_v54, %v3892_v55 }
 0x107   :  { %v502_v3 = vmul.f32 %v3884_v48, %v501_v51  ;;  %v481_v11 = vmul.f32 %v3382_v29, %v480_v58  ;;  %v513_v15 = vmul.f32 %v3902_v1, %v3874_v35  ;;  %3387 = vrsqrt.f32 %v3897_v61 }
 0x108   :  { %v458_v60 = vmul.f32 %v457_v53, %v3842_v6  ;;  %v661_v7 = vmul.f32 %v635_v62, %v635_v62  ;;  %v739_v8 = vadd.f32 35.0, %v713_v63  ;;  %v951_v18 = vmul.f32 -112.5, %v925_v13 }
 0x109   :  { %v482_v21 = vmul.f32 %v481_v11, %v3851_v12  ;;  %v486_v26 = vand.u32 2147483648, %v3851_v12  ;;  %v493_v29 = vmul.f32 %v3863_v22, %v492_v14  ;;  %v514_v0 = vmul.f32 %v3902_v1, %v513_v15 }
 0x10a   :  { %v460_v4 = vsel %vm459_vm3, %v3842_v6, %v458_v60  ;;  %181 = vadd.xlane.f32.xlu2 %v180_v59  ;;  %v765_v16 = vmul.f32 %v739_v8, %v3890_v54  ;;  %v503_v6 = vmul.f32 0.5, %v502_v3  ;;  %v687_v17 = vmul.f32 %v661_v7, %v3890_v54 }
 0x10b   :  { %v463_v19 = vsel %vm461_vm5, %v462_v2, %v460_v4  ;;  %v977_v27 = vmul.f32 %v951_v18, %v925_v13  ;;  %v484_v38 = vsel %vm483_vm7, %v3851_v12, %v482_v21  ;;  %vm869_vm10 = vcmp.lt.f32.partialorder %v3890_v54, 1.0  ;;  %v3946_v49 = vpop.xlane.xlu0 %247 }
 0x10c   :  { %v791_v23 = vadd.f32 -21.0, %v765_v16  ;;  %v3924_v28 = vmul.f32 0.14285715, %v463_v19  ;;  %v504_v30 = vsub.f32 1.5, %v503_v6  ;;  %v515_v45 = vmul.f32 0.5, %v514_v0 }
 0x10d   :  { %v3928_v32 = vpop.eup %3387  ;;  %v1016_v33 = vmul.f32 1.442695, %v977_v27  ;;  %v487_v53 = vsel %vm485_vm8, %v486_v26, %v484_v38  ;;  %v494_v56 = vmul.f32 %v493_v29, %v3840_v5  ;;  %v741_v60 = vadd.f32 35.0, %v715_v52 }
 0x10e   :  { %v817_v31 = vmul.f32 %v791_v23, %v687_v17  ;;  %v636_v34 = vmul.f32 %v3924_v28, %v3924_v28  ;;  %v714_v36 = vmul.f32 -15.0, %v3924_v28  ;;  %v926_v40 = vsub.f32 %v3924_v28, %v3892_v55 }
 0x10f   :  { %3389 = vpow2.f32 %v1016_v33  ;;  %v505_v44 = vmul.f32 %v3884_v48, %v504_v30  ;;  %v525_v46 = vmul.f32 %v3928_v32, %v3897_v61  ;;  %v927_v62 = vsub.f32 %v3933_v37, %v3892_v55 }
 0x110   :  { %v843_v39 = vadd.f32 1.0, %v817_v31  ;;  %v662_v42 = vmul.f32 %v636_v34, %v636_v34  ;;  %v740_v43 = vadd.f32 35.0, %v714_v36  ;;  %v952_v47 = vmul.f32 -112.5, %v926_v40 }
 0x111   :  { %v506_v12 = vmul.f32 %v505_v44, %v3865_v24  ;;  %v516_v63 = vsub.f32 1.5, %v515_v45  ;;  %v3964_v3 = vmul.f32 0.14285715, %v487_v53  ;;  %v526_v7 = vmul.f32 %v3928_v32, %v525_v46 }
 0x112   :  { %v688_v50 = vmul.f32 %v662_v42, %v3924_v28  ;;  %v766_v51 = vmul.f32 %v740_v43, %v3924_v28  ;;  %v978_v48 = vmul.f32 %v952_v47, %v926_v40  ;;  %v895_v58 = vsel %vm869_vm10, %v843_v39, 0.0 }
 0x113   :  { %v152_v22 = vpop.permute.xlu1 %151  ;;  %v767_v54 = vmul.f32 %v741_v60, %v3933_v37  ;;  %v953_v9 = vmul.f32 -112.5, %v927_v62  ;;  %vm870_vm15 = vcmp.lt.f32.partialorder %v3924_v28, 1.0  ;;  %v663_v11 = vmul.f32 %v637_v57, %v637_v57 }
 0x114   :  { %v255_v41 = vsel %vm179_vm0, %v152_v22, 0.0  ;;  %v792_v59 = vadd.f32 -21.0, %v766_v51  ;;  %v1018_v2 = vmul.f32 1.442695, %v978_v48  ;;  %v638_v15 = vmul.f32 %v3964_v3, %v3964_v3 }
 0x115   :  { %v3390_v4 = vpop.eup %3389  ;;  %v979_v14 = vmul.f32 %v953_v9, %v927_v62  ;;  %v716_v16 = vmul.f32 -15.0, %v3964_v3  ;;  %v496_v6 = vsel %vm495_vm11, %v3840_v5, %v494_v56  ;;  %v517_v17 = vmul.f32 %v3902_v1, %v516_v63  ;;  %v30_v1 = vld [vmem:[%s6233_s0 + $0x38] sm:$0xff] }
 0x116   :  { %256 = vadd.xlane.f32.xlu1 %v255_v41  ;;  %v818_v8 = vmul.f32 %v792_v59, %v688_v50  ;;  %v1055_v10 = vmul.f32 %v3390_v4, %v895_v58  ;;  %3391 = vpow2.f32 %v1018_v2  ;;  %v793_v18 = vadd.f32 -21.0, %v767_v54 }
 0x117   :  { %v928_v19 = vsub.f32 %v3964_v3, %v3892_v55  ;;  %v508_v21 = vsel %vm507_vm13, %v3865_v24, %v506_v12  ;;  %v510_v23 = vand.u32 2147483648, %v3865_v24  ;;  %v1020_v26 = vmul.f32 1.442695, %v979_v14 }
 0x118   :  { %v844_v13 = vadd.f32 1.0, %v818_v8  ;;  %3196 = vmatmul.msk.f32.vlgmr.msra.gmra.mxu2 %vm1080_vm9, %v1055_v10  ;;  %3222 = vmatmul.msk.f32.vlgmr.msra.gmra.mxu3 %vm1080_vm9, %v1055_v10  ;;  %v742_v27 = vadd.f32 35.0, %v716_v16  ;;  %v689_v0 = vmul.f32 %v663_v11, %v3933_v37  ;;  %v527_v33 = vmul.f32 0.5, %v526_v7 }
 0x119   :  { %v954_v31 = vmul.f32 -112.5, %v928_v19  ;;  %v664_v34 = vmul.f32 %v638_v15, %v638_v15  ;;  %v499_v38 = vsel %vm497_vm12, %v498_v20, %v496_v6  ;;  %v518_v39 = vmul.f32 %v517_v17, %v3874_v35 }
 0x11a   :  { %v896_v29 = vsel %vm870_vm15, %v844_v13, 0.0  ;;  %v768_v36 = vmul.f32 %v742_v27, %v3964_v3  ;;  %v819_v28 = vmul.f32 %v793_v18, %v689_v0  ;;  %v3997_v40 = vmul.f32 0.14285715, %v499_v38 }
 0x11b   :  { %v56_v41 = vmul.f32 %v30_v1, %v30_v1  ;;  %3393 = vpow2.f32 %v1020_v26  ;;  %v980_v43 = vmul.f32 %v954_v31, %v928_v19  ;;  %v511_v44 = vsel %vm509_vm14, %v510_v23, %v508_v21 }
 0x11c   :  { %v3392_v22 = vpop.eup %3391  ;;  %vm521_vm2 = vcmp.eq.f32.partialorder %v3874_v35, 0.0  ;;  %v717_v5 = vmul.f32 -15.0, %v3997_v40  ;;  %v528_v20 = vsub.f32 1.5, %v527_v33  ;;  %v690_v45 = vmul.f32 %v664_v34, %v3964_v3 }
 0x11d   :  { %v1056_v42 = vmul.f32 %v3392_v22, %v896_v29  ;;  %115 = vrot.lane.b32.xlu0 %v56_v41, %s3710_s27  ;;  %v794_v46 = vadd.f32 -21.0, %v768_v36  ;;  %v929_v47 = vsub.f32 %v3997_v40, %v3892_v55  ;;  %v522_v50 = vand.u32 2147483648, %v3874_v35 }
 0x11e   :  { %v104_v25 = vpop.permute.xlu0 %103  ;;  %v4010_v24 = vadd.f32 1e-12, %v3946_v49  ;;  %v845_v51 = vadd.f32 1.0, %v819_v28  ;;  %v4014_v52 = vmul.f32 0.14285715, %v511_v44  ;;  %v520_v53 = vsel %vm519_vm1, %v3874_v35, %v518_v39 }
 0x11f   :  { %v183_v30 = vsel %vm179_vm0, %v104_v25, 0.0  ;;  %v1022_v56 = vmul.f32 1.442695, %v980_v43  ;;  %v743_v48 = vadd.f32 35.0, %v717_v5  ;;  %v955_v57 = vmul.f32 -112.5, %v929_v47 }
 0x120   :  { %184 = vadd.xlane.f32.xlu1 %v183_v30  ;;  %3197 = vmatmul.msk.f32.gmra.mxu2 %vm1080_vm9, %v1056_v42  ;;  %v529_v59 = vmul.f32 %v3928_v32, %v528_v20  ;;  %vm871_vm3 = vcmp.lt.f32.partialorder %v3933_v37, 1.0  ;;  %v820_v60 = vmul.f32 %v794_v46, %v690_v45  ;;  %v639_v49 = vmul.f32 %v3997_v40, %v3997_v40  ;;  %v31_v30 = vld [vmem:[%s6233_s0 + $0x40] sm:$0xff] }
 0x121   :  { %3223 = vmatmul.msk.f32.gmra.mxu3 %vm1080_vm9, %v1056_v42  ;;  %v3394_v58 = vpop.eup %3393  ;;  %3395 = vrsqrt.f32 %v4010_v24  ;;  %v897_v62 = vsel %vm871_vm3, %v845_v51, 0.0  ;;  %v718_v12 = vmul.f32 -15.0, %v4014_v52  ;;  %v523_v63 = vsel %vm521_vm2, %v522_v50, %v520_v53  ;;  %v32_v42 = vld [vmem:[%s6233_s0 + $0x48] sm:$0xff] }
 0x122   :  { %3397 = vpow2.f32 %v1022_v56  ;;  %v769_v2 = vmul.f32 %v743_v48, %v3997_v40  ;;  %v981_v4 = vmul.f32 %v955_v57, %v929_v47  ;;  %v930_v32 = vsub.f32 %v4014_v52, %v3892_v55 }
 0x123   :  { %v1057_v37 = vmul.f32 %v3394_v58, %v897_v62  ;;  %v530_v7 = vmul.f32 %v529_v59, %v3897_v61  ;;  %v846_v8 = vadd.f32 1.0, %v820_v60  ;;  %v665_v54 = vmul.f32 %v639_v49, %v639_v49 }
 0x124   :  { %vm531_vm4 = vcmp.eq.f32.partialorder %v3897_v61, inf  ;;  %vm872_vm5 = vcmp.lt.f32.partialorder %v3964_v3, 1.0  ;;  %v744_v35 = vadd.f32 35.0, %v718_v12  ;;  %v4033_v9 = vmul.f32 0.14285715, %v523_v63 }
 0x125   :  { %v795_v10 = vadd.f32 -21.0, %v769_v2  ;;  %v1024_v11 = vmul.f32 1.442695, %v981_v4  ;;  %v956_v13 = vmul.f32 -112.5, %v930_v32  ;;  %vm533_vm6 = vcmp.eq.f32.partialorder %v3897_v61, 0.0  ;;  %v33_v4 = vld [vmem:[%s6233_s0 + $0x50] sm:$0xff] }
 0x126   :  { %v534_v15 = vand.u32 2147483648, %v3897_v61  ;;  %v640_v16 = vmul.f32 %v4014_v52, %v4014_v52  ;;  %v532_v17 = vsel %vm531_vm4, %v3897_v61, %v530_v7  ;;  %v898_v18 = vsel %vm872_vm5, %v846_v8, 0.0 }
 0x127   :  { %v4035_v14 = vpop.eup %3395  ;;  %v691_v3 = vmul.f32 %v665_v54, %v3997_v40  ;;  %v719_v19 = vmul.f32 -15.0, %v4033_v9  ;;  %v770_v21 = vmul.f32 %v744_v35, %v4014_v52  ;;  %v931_v23 = vsub.f32 %v4033_v9, %v3892_v55 }
 0x128   :  { %3198 = vmatmul.msk.f32.gmra.mxu2 %vm1080_vm9, %v1057_v37  ;;  %v3398_v6 = vpop.eup %3397  ;;  %3399 = vpow2.f32 %v1024_v11  ;;  %v982_v26 = vmul.f32 %v956_v13, %v930_v32  ;;  %v549_v27 = vmul.f32 %v4035_v14, %v4010_v24  ;;  %v666_v29 = vmul.f32 %v640_v16, %v640_v16 }
 0x129   :  { %3224 = vmatmul.msk.f32.gmra.mxu3 %vm1080_vm9, %v1057_v37  ;;  %v821_v25 = vmul.f32 %v795_v10, %v691_v3  ;;  %v1058_v1 = vmul.f32 %v3398_v6, %v898_v18  ;;  %v535_v0 = vsel %vm533_vm6, %v534_v15, %v532_v17  ;;  %v57_v31 = vmul.f32 %v31_v30, %v31_v30 }
 0x12a   :  { %v641_v33 = vmul.f32 %v4033_v9, %v4033_v9  ;;  %v745_v34 = vadd.f32 35.0, %v719_v19  ;;  %v796_v36 = vadd.f32 -21.0, %v770_v21  ;;  %v957_v38 = vmul.f32 -112.5, %v931_v23 }
 0x12b   :  { %v847_v22 = vadd.f32 1.0, %v821_v25  ;;  %v1026_v39 = vmul.f32 1.442695, %v982_v26  ;;  %117 = vrot.lane.b32.xlu0 %v57_v31, %s3710_s27  ;;  %v4059_v28 = vmul.f32 0.14285715, %v535_v0  ;;  %v550_v61 = vmul.f32 %v4035_v14, %v549_v27 }
 0x12c   :  { %v692_v41 = vmul.f32 %v666_v29, %v4014_v52  ;;  %v667_v44 = vmul.f32 %v641_v33, %v641_v33  ;;  %v771_v5 = vmul.f32 %v745_v34, %v4033_v9  ;;  %vm873_vm7 = vcmp.lt.f32.partialorder %v3997_v40, 1.0 }
 0x12d   :  { %v720_v20 = vmul.f32 -15.0, %v4059_v28  ;;  %v983_v46 = vmul.f32 %v957_v38, %v931_v23  ;;  %v899_v47 = vsel %vm873_vm7, %v847_v22, 0.0  ;;  %3401 = vpow2.f32 %v1026_v39 }
 0x12e   :  { %v3400_v43 = vpop.eup %3399  ;;  %v822_v45 = vmul.f32 %v796_v36, %v692_v41  ;;  %v58_v50 = vmul.f32 %v32_v42, %v32_v42  ;;  %v932_v51 = vsub.f32 %v4059_v28, %v3892_v55  ;;  %v551_v53 = vmul.f32 0.5, %v550_v61 }
 0x12f   :  { %v1059_v56 = vmul.f32 %v3400_v43, %v899_v47  ;;  %v693_v57 = vmul.f32 %v667_v44, %v4033_v9  ;;  %v797_v58 = vadd.f32 -21.0, %v771_v5  ;;  %v642_v59 = vmul.f32 %v4059_v28, %v4059_v28 }
 0x130   :  { %3199 = vmatmul.msk.f32.gmra.mxu2 %vm1080_vm9, %v1058_v1  ;;  %v746_v60 = vadd.f32 35.0, %v720_v20  ;;  %v1028_v49 = vmul.f32 1.442695, %v983_v46  ;;  %v848_v12 = vadd.f32 1.0, %v822_v45  ;;  %v958_v63 = vmul.f32 -112.5, %v932_v51 }
 0x131   :  { %3225 = vmatmul.msk.f32.gmra.mxu3 %vm1080_vm9, %v1058_v1  ;;  %v552_v2 = vsub.f32 1.5, %v551_v53  ;;  %v823_v7 = vmul.f32 %v797_v58, %v693_v57  ;;  %v668_v8 = vmul.f32 %v642_v59, %v642_v59  ;;  %vm874_vm8 = vcmp.lt.f32.partialorder %v4014_v52, 1.0 }
 0x132   :  { %v772_v54 = vmul.f32 %v746_v60, %v4059_v28  ;;  %v900_v35 = vsel %vm874_vm8, %v848_v12, 0.0  ;;  %v984_v10 = vmul.f32 %v958_v63, %v932_v51  ;;  %v59_v11 = vmul.f32 %v33_v4, %v33_v4 }
 0x133   :  { %119 = vrot.lane.b32.xlu0 %v58_v50, %s3710_s27  ;;  %v3402_v32 = vpop.eup %3401  ;;  %v553_v15 = vmul.f32 %v4035_v14, %v552_v2  ;;  %v849_v16 = vadd.f32 1.0, %v823_v7  ;;  %v694_v6 = vmul.f32 %v668_v8, %v4059_v28  ;;  %vm875_vm10 = vcmp.lt.f32.partialorder %v4033_v9, 1.0 }
 0x134   :  { %v1060_v13 = vmul.f32 %v3402_v32, %v900_v35  ;;  %v798_v17 = vadd.f32 -21.0, %v772_v54  ;;  %v1030_v3 = vmul.f32 1.442695, %v984_v10  ;;  %vm555_vm11 = vcmp.eq.f32.partialorder %v4010_v24, inf }
 0x135   :  { %v554_v14 = vmul.f32 %v553_v15, %v4010_v24  ;;  %v901_v25 = vsel %vm875_vm10, %v849_v16, 0.0  ;;  %vm557_vm12 = vcmp.eq.f32.partialorder %v4010_v24, 0.0  ;;  %v558_v9 = vand.u32 2147483648, %v4010_v24 }
 0x136   :  { %v824_v26 = vmul.f32 %v798_v17, %v694_v6  ;;  %vm876_vm13 = vcmp.lt.f32.partialorder %v4059_v28, 1.0 }
 0x137   :  { %v556_v33 = vsel %vm555_vm11, %v4010_v24, %v554_v14 }
 0x138   :  { %3200 = vmatmul.msk.f32.gmra.mxu2 %vm1080_vm9, %v1059_v56  ;;  %v850_v36 = vadd.f32 1.0, %v824_v26  ;;  %v559_v61 = vsel %vm557_vm12, %v558_v9, %v556_v33  ;;  %vm1428_vm12 = vcmask 1042432  }
 0x139   :  { %3226 = vmatmul.msk.f32.gmra.mxu3 %vm1080_vm9, %v1059_v56  ;;  %v4108_v5 = vmul.f32 0.14285715, %v559_v61 }
 0x13a   :  { %v902_v43 = vsel %vm876_vm13, %v850_v36, 0.0 }
 0x13b   :  { %121 = vrot.lane.b32.xlu0 %v59_v11, %s3710_s27  ;;  %v722_v50 = vmul.f32 -15.0, %v4108_v5  ;;  %v934_v58 = vsub.f32 %v4108_v5, %v3892_v55  ;;  %v644_v12 = vmul.f32 %v4108_v5, %v4108_v5  ;;  %vm878_vm6 = vcmp.lt.f32.partialorder %v4108_v5, 1.0 }
 0x13c   :  { %v251_v48 = vpop.xlane.xlu2 %250 }
 0x13d   :  { %v4076_v40 = vadd.f32 1e-12, %v251_v48  ;;  %v748_v63 = vadd.f32 35.0, %v722_v50 }
 0x13e   :  { %v245_v62 = vpop.xlane.xlu1 %244 }
 0x13f   :  { %3403 = vrsqrt.f32 %v4076_v40  ;;  %v4083_v37 = vadd.f32 1e-12, %v245_v62  ;;  %vm567_vm14 = vcmp.eq.f32.partialorder %v4076_v40, inf  ;;  %v570_v51 = vand.u32 2147483648, %v4076_v40 }
 0x140   :  { %3405 = vpow2.f32 %v1028_v49  ;;  %3201 = vmatmul.msk.f32.gmra.mxu2 %vm1080_vm9, %v1060_v13  ;;  %vm569_vm2 = vcmp.eq.f32.partialorder %v4076_v40, 0.0  ;;  %v774_v15 = vmul.f32 %v748_v63, %v4108_v5 }
 0x141   :  { %3407 = vrsqrt.f32 %v4083_v37  ;;  %3227 = vmatmul.msk.f32.gmra.mxu3 %vm1080_vm9, %v1060_v13  ;;  %vm543_vm15 = vcmp.eq.f32.partialorder %v4083_v37, inf  ;;  %v546_v47 = vand.u32 2147483648, %v4083_v37  ;;  %vm545_vm1 = vcmp.eq.f32.partialorder %v4083_v37, 0.0 }
 0x142   :  { %3409 = vpow2.f32 %v1030_v3  ;;  %v670_v13 = vmul.f32 %v644_v12, %v644_v12  ;;  %v800_v33 = vadd.f32 -21.0, %v774_v15 }
 0x145   :  { %v3404_v18 = vpop.eup %3403 }
 0x146   :  { %v561_v52 = vmul.f32 %v3404_v18, %v4076_v40  ;;  %v3406_v19 = vpop.eup %3405 }
 0x147   :  { %v3408_v21 = vpop.eup %3407  ;;  %v1061_v31 = vmul.f32 %v3406_v19, %v901_v25 }
 0x148   :  { %v562_v23 = vmul.f32 %v3404_v18, %v561_v52  ;;  %v537_v27 = vmul.f32 %v3408_v21, %v4083_v37  ;;  %v3410_v41 = vpop.eup %3409 }
 0x149   :  { %v254_v1 = vpop.xlane.xlu0 %253  ;;  %3202 = vmatmul.msk.f32.gmra.mxu2 %vm1080_vm9, %v1061_v31  ;;  %3228 = vmatmul.msk.f32.gmra.mxu3 %vm1080_vm9, %v1061_v31  ;;  %v1062_v46 = vmul.f32 %v3410_v41, %v902_v43  ;;  %v696_v31 = vmul.f32 %v670_v13, %v4108_v5  ;;  %v4157_v5 = vld [vmem:[%s6233_s0 + $0x60] sm:$0xff] }
 0x14a   :  { %v563_v29 = vmul.f32 0.5, %v562_v23  ;;  %v4098_v30 = vadd.f32 1e-12, %v254_v1  ;;  %v538_v0 = vmul.f32 %v3408_v21, %v537_v27 }
 0x14b   :  { %v826_v61 = vmul.f32 %v800_v33, %v696_v31 }
 0x14c   :  { %v564_v34 = vsub.f32 1.5, %v563_v29  ;;  %3411 = vrsqrt.f32 %v4098_v30  ;;  %v539_v38 = vmul.f32 0.5, %v538_v0  ;;  %vm579_vm3 = vcmp.eq.f32.partialorder %v4098_v30, inf  ;;  %v110_v0 = vpop.permute.xlu2 %109 }
 0x14d   :  { %v582_v6 = vand.u32 2147483648, %v4098_v30  ;;  %vm581_vm4 = vcmp.eq.f32.partialorder %v4098_v30, 0.0 }
 0x14e   :  { %v565_v22 = vmul.f32 %v3404_v18, %v564_v34  ;;  %v540_v39 = vsub.f32 1.5, %v539_v38 }
 0x150   :  { %v566_v42 = vmul.f32 %v565_v22, %v4076_v40  ;;  %v541_v44 = vmul.f32 %v3408_v21, %v540_v39  ;;  %v192_v39 = vsel %vm179_vm0, %v110_v0, 0.0 }
 0x151   :  { %3203 = vmatmul.msk.f32.gmra.mxu2 %vm1080_vm9, %v1062_v46  ;;  %3229 = vmatmul.msk.f32.gmra.mxu3 %vm1080_vm9, %v1062_v46 }
 0x152   :  { %v3412_v24 = vpop.eup %3411  ;;  %v542_v20 = vmul.f32 %v541_v44, %v4083_v37  ;;  %v568_v28 = vsel %vm567_vm14, %v4076_v40, %v566_v42 }
 0x153   :  { %v573_v45 = vmul.f32 %v3412_v24, %v4098_v30  ;;  %v571_v62 = vsel %vm569_vm2, %v570_v51, %v568_v28  ;;  %v852_v28 = vadd.f32 1.0, %v826_v61 }
 0x154   :  { %v544_v53 = vsel %vm543_vm15, %v4083_v37, %v542_v20  ;;  %v960_v37 = vmul.f32 -112.5, %v934_v58  ;;  %v4129_v7 = vmul.f32 0.14285715, %v571_v62 }
 0x155   :  { %v574_v56 = vmul.f32 %v3412_v24, %v573_v45  ;;  %v547_v57 = vsel %vm545_vm1, %v546_v47, %v544_v53 }
 0x156   :  { %v106_v48 = vpop.permute.xlu1 %105  ;;  %v617_v49 = vmul.f32 0.14285715, %v547_v57  ;;  %v986_v19 = vmul.f32 %v960_v37, %v934_v58  ;;  %v723_v21 = vmul.f32 -15.0, %v4129_v7  ;;  %v935_v1 = vsub.f32 %v4129_v7, %v3892_v55 }
 0x157   :  { %v575_v59 = vmul.f32 0.5, %v574_v56  ;;  %v186_v60 = vsel %vm179_vm0, %v106_v48, 0.0  ;;  %v645_v41 = vmul.f32 %v4129_v7, %v4129_v7  ;;  %v904_v57 = vsel %vm878_vm6, %v852_v28, 0.0  ;;  %v1073_v28 = vld [vmem:[%s6234_s1 + $0x28] sm:$0xff] }
 0x158   :  { %187 = vadd.xlane.f32.xlu1 %v186_v60  ;;  %v643_v4 = vmul.f32 %v617_v49, %v617_v49  ;;  %v721_v32 = vmul.f32 -15.0, %v617_v49  ;;  %v933_v40 = vsub.f32 %v617_v49, %v3892_v55  ;;  %v1034_v34 = vmul.f32 1.442695, %v986_v19 }
 0x159   :  { %v576_v2 = vsub.f32 1.5, %v575_v59  ;;  %v749_v36 = vadd.f32 35.0, %v723_v21  ;;  %vm877_vm5 = vcmp.lt.f32.partialorder %v617_v49, 1.0  ;;  %v671_v47 = vmul.f32 %v645_v41, %v645_v41 }
 0x15a   :  { %v669_v54 = vmul.f32 %v643_v4, %v643_v4  ;;  %v747_v35 = vadd.f32 35.0, %v721_v32  ;;  %v959_v11 = vmul.f32 -112.5, %v933_v40  ;;  %v61_v4 = vmul.f32 %v4157_v5, %v4157_v5 }
 0x15b   :  { %v577_v8 = vmul.f32 %v3412_v24, %v576_v2  ;;  %v775_v42 = vmul.f32 %v749_v36, %v4129_v7  ;;  %v697_v58 = vmul.f32 %v671_v47, %v4129_v7  ;;  %vm879_vm7 = vcmp.lt.f32.partialorder %v4129_v7, 1.0 }
 0x15c   :  { %v112_v10 = vpop.permute.xlu0 %111  ;;  %v773_v18 = vmul.f32 %v747_v35, %v617_v49  ;;  %v985_v3 = vmul.f32 %v959_v11, %v933_v40  ;;  %v695_v25 = vmul.f32 %v669_v54, %v617_v49  ;;  %v4166_v11 = vld [vmem:[%s6233_s0 + $0x58] sm:$0xff] }
 0x15d   :  { %v578_v16 = vmul.f32 %v577_v8, %v4098_v30  ;;  %v195_v17 = vsel %vm179_vm0, %v112_v10, 0.0  ;;  %v801_v50 = vadd.f32 -21.0, %v775_v42 }
 0x15e   :  { %v108_v52 = vpop.permute.xlu1 %107  ;;  %196 = vadd.xlane.f32.xlu2 %v195_v17  ;;  %v799_v26 = vadd.f32 -21.0, %v773_v18  ;;  %v1032_v27 = vmul.f32 1.442695, %v985_v3 }
 0x15f   :  { %v580_v14 = vsel %vm579_vm3, %v4098_v30, %v578_v16  ;;  %v189_v23 = vsel %vm179_vm0, %v108_v52, 0.0  ;;  %v961_v30 = vmul.f32 -112.5, %v935_v1  ;;  %v827_v60 = vmul.f32 %v801_v50, %v697_v58 }
 0x160   :  { %190 = vadd.xlane.f32.xlu1 %v189_v23  ;;  %v825_v29 = vmul.f32 %v799_v26, %v695_v25  ;;  %v583_v9 = vsel %vm581_vm4, %v582_v6, %v580_v14  ;;  %3413 = vpow2.f32 %v1032_v27  ;;  %v60_v16 = vmul.f32 %v4166_v11, %v4166_v11 }
 0x161   :  { %v620_v22 = vmul.f32 0.14285715, %v583_v9  ;;  %3415 = vpow2.f32 %v1034_v34  ;;  %v987_v24 = vmul.f32 %v961_v30, %v935_v1  ;;  %v853_v2 = vadd.f32 1.0, %v827_v60 }
 0x162   :  { %v851_v38 = vadd.f32 1.0, %v825_v29 }
 0x163   :  { %v724_v20 = vmul.f32 -15.0, %v620_v22  ;;  %v936_v45 = vsub.f32 %v620_v22, %v3892_v55  ;;  %v1036_v51 = vmul.f32 1.442695, %v987_v24  ;;  %v646_v59 = vmul.f32 %v620_v22, %v620_v22 }
 0x164   :  { %v903_v44 = vsel %vm877_vm5, %v851_v38, 0.0  ;;  %v905_v54 = vsel %vm879_vm7, %v853_v2, 0.0  ;;  %vm880_vm8 = vcmp.lt.f32.partialorder %v620_v22, 1.0  ;;  %v114_v17 = vpop.permute.xlu0 %113  ;;  %vm1349_vm5 = vcmask 220160  }
 0x165   :  { %v750_v53 = vadd.f32 35.0, %v724_v20  ;;  %v962_v56 = vmul.f32 -112.5, %v936_v45  ;;  %3417 = vpow2.f32 %v1036_v51  ;;  %v672_v63 = vmul.f32 %v646_v59, %v646_v59 }
 0x166   :  { %v3414_v43 = vpop.eup %3413  ;;  %v198_v3 = vsel %vm179_vm0, %v114_v17, 0.0 }
 0x167   :  { %v1063_v46 = vmul.f32 %v3414_v43, %v903_v44  ;;  %v3416_v48 = vpop.eup %3415  ;;  %v776_v49 = vmul.f32 %v750_v53, %v620_v22  ;;  %v988_v62 = vmul.f32 %v962_v56, %v936_v45  ;;  %v698_v8 = vmul.f32 %v672_v63, %v620_v22  ;;  %199 = vadd.xlane.f32.xlu0 %v198_v3  ;;  %v1074_v43 = vld [vmem:[%s6234_s1 + $0x30] sm:$0x7]  ;;  %v1075_v44 = vld [vmem:[%s6234_s1 + $0x38] sm:$0x7] }
 0x168   :  { %193 = vadd.xlane.f32.xlu1 %v192_v39  ;;  %v1064_v12 = vmul.f32 %v3416_v48, %v904_v57  ;;  %3235 = vmatpush.msk.msrb.mxu2 %vm1428_vm12, %v1074_v43 }
 0x169   :  { %3204 = vmatmul.msk.f32.gmra.mxu2 %vm1080_vm9, %v1063_v46  ;;  %3230 = vmatmul.msk.f32.gmra.mxu3 %vm1080_vm9, %v1063_v46  ;;  %v802_v32 = vadd.f32 -21.0, %v776_v49  ;;  %v1038_v40 = vmul.f32 1.442695, %v988_v62  ;;  %v1072_v46 = vld [vmem:[%s6234_s1 + $0x20] sm:$0xff] }
 0x16a   :  { %3262 = vmatpush.msk.msrb.mxu3 %vm1428_vm12, %v1075_v44  ;;  %1448 = vmatpush.msrb.mxu2 %v1072_v46 }
 0x16b   :  { %v3418_v37 = vpop.eup %3417  ;;  %v828_v35 = vmul.f32 %v802_v32, %v698_v8  ;;  %3419 = vpow2.f32 %v1038_v40  ;;  %v1070_v32 = vld [vmem:[%s6234_s1 + $0x10] sm:$0xff]  ;;  %v1071_v40 = vld [vmem:[%s6234_s1 + $0x18] sm:$0xff] }
 0x16c   :  { %v1065_v10 = vmul.f32 %v3418_v37, %v905_v54  ;;  %1543 = vmatpush.msrb.mxu3 %v1073_v28  ;;  %v1068_v37 = vld [vmem:[%s6234_s1] sm:$0xff]  ;;  %1449 = vmatpush.msrb.mxu2 %v1070_v32 }
 0x16d   :  { %v854_v13 = vadd.f32 1.0, %v828_v35  ;;  %v1069_v35 = vld [vmem:[%s6234_s1 + $0x8] sm:$0xff] }
 0x16e   :  { %1544 = vmatpush.msrb.mxu3 %v1071_v40  ;;  %1450 = vmatpush.msrb.mxu2 %v1068_v37 }
 0x16f   :  { %v906_v18 = vsel %vm880_vm8, %v854_v13, 0.0 }
 0x170   :  { %1545 = vmatpush.msrb.mxu3 %v1069_v35 }
 0x171   :  { %3205 = vmatmul.msk.f32.gmra.mxu2 %vm1080_vm9, %v1064_v12  ;;  %3231 = vmatmul.msk.f32.gmra.mxu3 %vm1080_vm9, %v1064_v12  ;;  %v3420_v6 = vpop.eup %3419 }
 0x172   :  { %v1066_v52 = vmul.f32 %v3420_v6, %v906_v18 }
 0x176   :  { %125 = vrot.lane.b32.xlu2 %v61_v4, %s3710_s27 }
 0x179   :  { %3206 = vmatmul.msk.f32.gmra.mxu2 %vm1080_vm9, %v1065_v10  ;;  %3232 = vmatmul.msk.f32.gmra.mxu3 %vm1080_vm9, %v1065_v10 }
 0x17d   :  { %v182_v15 = vpop.xlane.xlu2 %181 }
 0x17e   :  { %v258_v7 = vadd.f32 1e-12, %v182_v15 }
 0x180   :  { %3421 = vrsqrt.f32 %v258_v7  ;;  %vm291_vm10 = vcmp.eq.f32.partialorder %v258_v7, inf  ;;  %v294_v29 = vand.u32 2147483648, %v258_v7  ;;  %vm293_vm11 = vcmp.eq.f32.partialorder %v258_v7, 0.0 }
 0x181   :  { %123 = vrot.lane.b32.xlu1 %v60_v16, %s3710_s27  ;;  %3207 = vmatmul.msk.f32.gmra.mxu2 %vm1080_vm9, %v1066_v52 }
 0x182   :  { %3233 = vmatmul.msk.f32.gmra.mxu3 %vm1080_vm9, %v1066_v52 }
 0x186   :  { %v3422_v19 = vpop.eup %3421 }
 0x187   :  { %v285_v21 = vmul.f32 %v3422_v19, %v258_v7 }
 0x189   :  { %v286_v14 = vmul.f32 %v3422_v19, %v285_v21  ;;  %v257_v23 = vpop.xlane.xlu1 %256 }
 0x18a   :  { %v283_v25 = vadd.f32 1e-12, %v257_v23 }
 0x18b   :  { %v287_v26 = vmul.f32 0.5, %v286_v14 }
 0x18c   :  { %3423 = vrsqrt.f32 %v283_v25  ;;  %vm591_vm13 = vcmp.eq.f32.partialorder %v283_v25, inf  ;;  %v594_v60 = vand.u32 2147483648, %v283_v25  ;;  %vm593_vm14 = vcmp.eq.f32.partialorder %v283_v25, 0.0 }
 0x18d   :  { %v288_v27 = vsub.f32 1.5, %v287_v26 }
 0x18f   :  { %v289_v1 = vmul.f32 %v3422_v19, %v288_v27  ;;  %v116_v2 = vpop.permute.xlu0 %115 }
 0x190   :  { %v201_v26 = vsel %vm179_vm0, %v116_v2, 0.0 }
 0x191   :  { %v290_v9 = vmul.f32 %v289_v1, %v258_v7 }
 0x192   :  { %v3424_v0 = vpop.eup %3423 }
 0x193   :  { %v292_v31 = vsel %vm291_vm10, %v258_v7, %v290_v9  ;;  %v585_v33 = vmul.f32 %v3424_v0, %v283_v25  ;;  %v185_v34 = vpop.xlane.xlu1 %184 }
 0x194   :  { %v4176_v36 = vadd.f32 1e-12, %v185_v34  ;;  %v295_v38 = vsel %vm293_vm11, %v294_v29, %v292_v31 }
 0x195   :  { %v586_v30 = vmul.f32 %v3424_v0, %v585_v33  ;;  %v596_v22 = vmul.f32 0.14285715, %v295_v38 }
 0x196   :  { %3425 = vrsqrt.f32 %v4176_v36  ;;  %vm303_vm1 = vcmp.eq.f32.partialorder %v4176_v36, inf  ;;  %v306_v3 = vand.u32 2147483648, %v4176_v36  ;;  %vm305_vm2 = vcmp.eq.f32.partialorder %v4176_v36, 0.0 }
 0x197   :  { %v587_v39 = vmul.f32 0.5, %v586_v30  ;;  %v622_v61 = vmul.f32 %v596_v22, %v596_v22  ;;  %v700_v41 = vmul.f32 -15.0, %v596_v22  ;;  %v912_v42 = vsub.f32 %v596_v22, %v3892_v55 }
 0x198   :  { %vm856_vm15 = vcmp.lt.f32.partialorder %v596_v22, 1.0 }
 0x199   :  { %v588_v24 = vsub.f32 1.5, %v587_v39  ;;  %v648_v20 = vmul.f32 %v622_v61, %v622_v61  ;;  %v726_v45 = vadd.f32 35.0, %v700_v41  ;;  %v938_v47 = vmul.f32 -112.5, %v912_v42 }
 0x19b   :  { %v589_v50 = vmul.f32 %v3424_v0, %v588_v24  ;;  %v752_v51 = vmul.f32 %v726_v45, %v596_v22  ;;  %v964_v56 = vmul.f32 %v938_v47, %v912_v42  ;;  %v674_v58 = vmul.f32 %v648_v20, %v596_v22 }
 0x19c   :  { %v3426_v53 = vpop.eup %3425 }
 0x19d   :  { %v590_v48 = vmul.f32 %v589_v50, %v283_v25  ;;  %v297_v57 = vmul.f32 %v3426_v53, %v4176_v36  ;;  %v778_v59 = vadd.f32 -21.0, %v752_v51  ;;  %v990_v49 = vmul.f32 1.442695, %v964_v56  ;;  %v118_v29 = vpop.permute.xlu0 %117 }
 0x19e   :  { %v204_v31 = vsel %vm179_vm0, %v118_v29, 0.0 }
 0x19f   :  { %v592_v62 = vsel %vm591_vm13, %v283_v25, %v590_v48  ;;  %v298_v12 = vmul.f32 %v3426_v53, %v297_v57  ;;  %v804_v63 = vmul.f32 %v778_v59, %v674_v58  ;;  %3427 = vpow2.f32 %v990_v49  ;;  %205 = vadd.xlane.f32.xlu2 %v204_v31  ;;  %v3685_v49 = vld [vmem:[%s6233_s0] sm:$0xff] }
 0x1a0   :  { %v595_v4 = vsel %vm593_vm14, %v594_v60, %v592_v62 }
 0x1a1   :  { %v299_v8 = vmul.f32 0.5, %v298_v12  ;;  %v621_v54 = vmul.f32 0.14285715, %v595_v4  ;;  %v830_v10 = vadd.f32 1.0, %v804_v63  ;;  %v3686_v12 = vld [vmem:[%s6233_s0 + $0x8] sm:$0xff]  ;;  %v3687_v4 = vld [vmem:[%s6233_s0 + $0x10] sm:$0xff] }
 0x1a3   :  { %v300_v13 = vsub.f32 1.5, %v299_v8  ;;  %v647_v15 = vmul.f32 %v621_v54, %v621_v54  ;;  %v725_v16 = vmul.f32 -15.0, %v621_v54  ;;  %v937_v6 = vsub.f32 %v621_v54, %v3892_v55 }
 0x1a4   :  { %v882_v19 = vsel %vm856_vm15, %v830_v10, 0.0  ;;  %vm881_vm3 = vcmp.lt.f32.partialorder %v621_v54, 1.0  ;;  %v3688_v10 = vld [vmem:[%s6233_s0 + $0x18] sm:$0xff] }
 0x1a5   :  { %v301_v7 = vmul.f32 %v3426_v53, %v300_v13  ;;  %v673_v17 = vmul.f32 %v647_v15, %v647_v15  ;;  %v751_v18 = vadd.f32 35.0, %v725_v16  ;;  %v3428_v52 = vpop.eup %3427  ;;  %v963_v21 = vmul.f32 -112.5, %v937_v6  ;;  %v120_v44 = vpop.permute.xlu0 %119 }
 0x1a6   :  { %v1042_v23 = vmul.f32 %v3428_v52, %v882_v19  ;;  %v207_v28 = vsel %vm179_vm0, %v120_v44, 0.0 }
 0x1a7   :  { %v302_v14 = vmul.f32 %v301_v7, %v4176_v36  ;;  %v777_v25 = vmul.f32 %v751_v18, %v621_v54  ;;  %v989_v27 = vmul.f32 %v963_v21, %v937_v6  ;;  %v699_v9 = vmul.f32 %v673_v17, %v621_v54  ;;  %208 = vadd.xlane.f32.xlu0 %v207_v28 }
 0x1a8   :  { %3183 = vmatmul.msk.f32.vlgmr.msra.gmra.mxu0 %vm1080_vm9, %v1042_v23  ;;  %3209 = vmatmul.msk.f32.vlgmr.msra.gmra.mxu1 %vm1080_vm9, %v1042_v23 }
 0x1a9   :  { %v304_v1 = vsel %vm303_vm1, %v4176_v36, %v302_v14  ;;  %v803_v0 = vadd.f32 -21.0, %v777_v25  ;;  %v1040_v33 = vmul.f32 1.442695, %v989_v27  ;;  %v3689_v25 = vld [vmem:[%s6233_s0 + $0x20] sm:$0xff] }
 0x1aa   :  { %v307_v34 = vsel %vm305_vm2, %v306_v3, %v304_v1 }
 0x1ab   :  { %202 = vadd.xlane.f32.xlu1 %v201_v26  ;;  %v829_v38 = vmul.f32 %v803_v0, %v699_v9  ;;  %v597_v30 = vmul.f32 0.14285715, %v307_v34  ;;  %3429 = vpow2.f32 %v1040_v33  ;;  %v4259_v9 = vpop.f32.mrf.mxu3 }
 0x1ad   :  { %v623_v22 = vmul.f32 %v597_v30, %v597_v30  ;;  %v701_v39 = vmul.f32 -15.0, %v597_v30  ;;  %v855_v61 = vadd.f32 1.0, %v829_v38  ;;  %v913_v36 = vsub.f32 %v597_v30, %v3892_v55  ;;  %v122_v57 = vpop.permute.xlu0 %121  ;;  %v4261_v38 = vpop.f32.mrf.mxu2 }
 0x1ae   :  { %vm857_vm4 = vcmp.lt.f32.partialorder %v597_v30, 1.0  ;;  %v210_v59 = vsel %vm179_vm0, %v122_v57, 0.0 }
 0x1af   :  { %v649_v41 = vmul.f32 %v623_v22, %v623_v22  ;;  %v727_v42 = vadd.f32 35.0, %v701_v39  ;;  %v939_v43 = vmul.f32 -112.5, %v913_v36  ;;  %v907_v46 = vsel %vm881_vm3, %v855_v61, 0.0  ;;  %211 = vadd.xlane.f32.xlu0 %v210_v59 }
 0x1b1   :  { %v675_v24 = vmul.f32 %v649_v41, %v597_v30  ;;  %v753_v20 = vmul.f32 %v727_v42, %v597_v30  ;;  %v3430_v45 = vpop.eup %3429  ;;  %v965_v47 = vmul.f32 %v939_v43, %v913_v36  ;;  %v3690_v43 = vld [vmem:[%s6233_s0 + $0x28] sm:$0xff] }
 0x1b2   :  { %v1067_v50 = vmul.f32 %v3430_v45, %v907_v46 }
 0x1b3   :  { %v779_v51 = vadd.f32 -21.0, %v753_v20  ;;  %v992_v53 = vmul.f32 1.442695, %v965_v47 }
 0x1b4   :  { %3208 = vmatmul.msk.f32.gmra.mxu2 %vm1080_vm9, %v1067_v50  ;;  %3234 = vmatmul.msk.f32.gmra.mxu3 %vm1080_vm9, %v1067_v50 }
 0x1b5   :  { %v805_v56 = vmul.f32 %v779_v51, %v675_v24  ;;  %3431 = vpow2.f32 %v992_v53 }
 0x1b7   :  { %v831_v48 = vadd.f32 1.0, %v805_v56 }
 0x1b9   :  { %v883_v58 = vsel %vm857_vm4, %v831_v48, 0.0 }
 0x1bb   :  { %v3432_v60 = vpop.eup %3431 }
 0x1bc   :  { %3236 = vmatmul.msk.f32.vlgmr.msrb.gmra.mxu2 %vm1349_vm5, %v3685_v49  ;;  %3263 = vmatmul.msk.f32.vlgmr.msrb.gmra.mxu3 %vm1349_vm5, %v3685_v49  ;;  %v1043_v62 = vmul.f32 %v3432_v60, %v883_v58  ;;  %v4289_v49 = vpop.f32.mrf.mxu3 }
 0x1be   :  { %3184 = vmatmul.msk.f32.gmra.mxu0 %vm1080_vm9, %v1043_v62  ;;  %3210 = vmatmul.msk.f32.gmra.mxu1 %vm1080_vm9, %v1043_v62 }
 0x1c4   :  { %3237 = vmatmul.msk.f32.gmra.mxu2 %vm1349_vm5, %v3686_v12  ;;  %3264 = vmatmul.msk.f32.gmra.mxu3 %vm1349_vm5, %v3686_v12 }
 0x1cb   :  { %v188_v63 = vpop.xlane.xlu1 %187 }
 0x1cc   :  { %v260_v2 = vadd.f32 1e-12, %v188_v63  ;;  %3238 = vmatmul.msk.f32.gmra.mxu2 %vm1349_vm5, %v3687_v4  ;;  %3265 = vmatmul.msk.f32.gmra.mxu3 %vm1349_vm5, %v3687_v4 }
 0x1ce   :  { %3433 = vrsqrt.f32 %v260_v2  ;;  %vm315_vm6 = vcmp.eq.f32.partialorder %v260_v2, inf  ;;  %v318_v29 = vand.u32 2147483648, %v260_v2  ;;  %vm317_vm7 = vcmp.eq.f32.partialorder %v260_v2, 0.0 }
 0x1d1   :  { %v197_v32 = vpop.xlane.xlu2 %196 }
 0x1d2   :  { %v4237_v40 = vadd.f32 1e-12, %v197_v32 }
 0x1d3   :  { %v191_v37 = vpop.xlane.xlu1 %190 }
 0x1d4   :  { %v3434_v8 = vpop.eup %3433  ;;  %v4239_v54 = vadd.f32 1e-12, %v191_v37  ;;  %3435 = vrsqrt.f32 %v4237_v40  ;;  %3239 = vmatmul.msk.f32.gmra.mxu2 %vm1349_vm5, %v3688_v10  ;;  %3266 = vmatmul.msk.f32.gmra.mxu3 %vm1349_vm5, %v3688_v10  ;;  %vm351_vm8 = vcmp.eq.f32.partialorder %v4237_v40, inf  ;;  %vm353_vm10 = vcmp.eq.f32.partialorder %v4237_v40, 0.0  ;;  %v4296_v37 = vpop.f32.mrf.mxu2 }
 0x1d5   :  { %v309_v35 = vmul.f32 %v3434_v8, %v260_v2  ;;  %v354_v24 = vand.u32 2147483648, %v4237_v40 }
 0x1d6   :  { %3437 = vrsqrt.f32 %v4239_v54  ;;  %vm327_vm11 = vcmp.eq.f32.partialorder %v4239_v54, inf  ;;  %vm329_vm12 = vcmp.eq.f32.partialorder %v4239_v54, 0.0  ;;  %v330_v50 = vand.u32 2147483648, %v4239_v54 }
 0x1d7   :  { %v310_v13 = vmul.f32 %v3434_v8, %v309_v35 }
 0x1d9   :  { %v311_v15 = vmul.f32 0.5, %v310_v13  ;;  %v126_v16 = vpop.permute.xlu2 %125 }
 0x1da   :  { %v3436_v6 = vpop.eup %3435  ;;  %v216_v7 = vsel %vm179_vm0, %v126_v16, 0.0 }
 0x1db   :  { %v312_v17 = vsub.f32 1.5, %v311_v15  ;;  %v345_v18 = vmul.f32 %v3436_v6, %v4237_v40  ;;  %v194_v52 = vpop.xlane.xlu1 %193  ;;  %217 = vadd.xlane.f32.xlu1 %v216_v7 }
 0x1dc   :  { %v3438_v3 = vpop.eup %3437  ;;  %v4250_v19 = vadd.f32 1e-12, %v194_v52  ;;  %3240 = vmatmul.msk.f32.gmra.mxu2 %vm1349_vm5, %v3689_v25  ;;  %3267 = vmatmul.msk.f32.gmra.mxu3 %vm1349_vm5, %v3689_v25 }
 0x1dd   :  { %v313_v21 = vmul.f32 %v3434_v8, %v312_v17  ;;  %v321_v14 = vmul.f32 %v3438_v3, %v4239_v54  ;;  %v346_v23 = vmul.f32 %v3436_v6, %v345_v18 }
 0x1de   :  { %3439 = vrsqrt.f32 %v4250_v19  ;;  %vm339_vm13 = vcmp.eq.f32.partialorder %v4250_v19, inf  ;;  %v342_v7 = vand.u32 2147483648, %v4250_v19  ;;  %vm341_vm14 = vcmp.eq.f32.partialorder %v4250_v19, 0.0 }
 0x1df   :  { %v314_v26 = vmul.f32 %v313_v21, %v260_v2  ;;  %v322_v27 = vmul.f32 %v3438_v3, %v321_v14  ;;  %v347_v1 = vmul.f32 0.5, %v346_v23 }
 0x1e1   :  { %v316_v0 = vsel %vm315_vm6, %v260_v2, %v314_v26  ;;  %v323_v31 = vmul.f32 0.5, %v322_v27  ;;  %v348_v33 = vsub.f32 1.5, %v347_v1 }
 0x1e2   :  { %v319_v34 = vsel %vm317_vm7, %v318_v29, %v316_v0 }
 0x1e3   :  { %v324_v30 = vsub.f32 1.5, %v323_v31  ;;  %v349_v22 = vmul.f32 %v3436_v6, %v348_v33  ;;  %v4263_v39 = vmul.f32 0.14285715, %v319_v34 }
 0x1e4   :  { %v3440_v61 = vpop.eup %3439  ;;  %3241 = vmatmul.msk.f32.gmra.mxu2 %vm1349_vm5, %v3690_v43  ;;  %3268 = vmatmul.msk.f32.gmra.mxu3 %vm1349_vm5, %v3690_v43 }
 0x1e5   :  { %v325_v36 = vmul.f32 %v3438_v3, %v324_v30  ;;  %v350_v41 = vmul.f32 %v349_v22, %v4237_v40  ;;  %v333_v42 = vmul.f32 %v3440_v61, %v4250_v19  ;;  %v702_v44 = vmul.f32 -15.0, %v4263_v39  ;;  %v4324_v30 = vpop.f32.mrf.mxu3  ;;  %v3692_v22 = vld [vmem:[%s6233_s0 + $0x38] sm:$0xff] }
 0x1e6   :  { %v624_v20 = vmul.f32 %v4263_v39, %v4263_v39  ;;  %v914_v45 = vsub.f32 %v4263_v39, %v3892_v55  ;;  %vm858_vm15 = vcmp.lt.f32.partialorder %v4263_v39, 1.0 }
 0x1e7   :  { %v326_v46 = vmul.f32 %v325_v36, %v4239_v54  ;;  %v334_v28 = vmul.f32 %v3440_v61, %v333_v42  ;;  %v728_v47 = vadd.f32 35.0, %v702_v44  ;;  %v352_v48 = vsel %vm351_vm8, %v4237_v40, %v350_v41  ;;  %v200_v36 = vpop.xlane.xlu0 %199 }
 0x1e8   :  { %v650_v51 = vmul.f32 %v624_v20, %v624_v20  ;;  %v940_v53 = vmul.f32 -112.5, %v914_v45  ;;  %v355_v32 = vsel %vm353_vm10, %v354_v24, %v352_v48  ;;  %v4334_v43 = vadd.f32 1e-12, %v200_v36  ;;  %v4340_v20 = vpop.f32.mrf.mxu2 }
 0x1e9   :  { %v328_v56 = vsel %vm327_vm11, %v4239_v54, %v326_v46  ;;  %v335_v57 = vmul.f32 0.5, %v334_v28  ;;  %v754_v58 = vmul.f32 %v728_v47, %v4263_v39  ;;  %v3691_v54 = vld [vmem:[%s6233_s0 + $0x30] sm:$0xff]  ;;  %v4311_v52 = vmul.f32 0.14285715, %v355_v32 }
 0x1ea   :  { %v966_v59 = vmul.f32 %v940_v53, %v914_v45  ;;  %v331_v60 = vsel %vm329_vm12, %v330_v50, %v328_v56  ;;  %v676_v12 = vmul.f32 %v650_v51, %v4263_v39  ;;  %vm363_vm3 = vcmp.eq.f32.partialorder %v4334_v43, inf }
 0x1eb   :  { %v336_v62 = vsub.f32 1.5, %v335_v57  ;;  %v780_v63 = vadd.f32 -21.0, %v754_v58  ;;  %v4292_v2 = vmul.f32 0.14285715, %v331_v60  ;;  %v705_v29 = vmul.f32 -15.0, %v4311_v52 }
 0x1ec   :  { %v994_v4 = vmul.f32 1.442695, %v966_v59  ;;  %3242 = vmatmul.msk.f32.gmra.mxu2 %vm1349_vm5, %v3691_v54  ;;  %3269 = vmatmul.msk.f32.gmra.mxu3 %vm1349_vm5, %v3691_v54  ;;  %v627_v24 = vmul.f32 %v4311_v52, %v4311_v52  ;;  %vm861_vm2 = vcmp.lt.f32.partialorder %v4311_v52, 1.0  ;;  %vm365_vm4 = vcmp.eq.f32.partialorder %v4334_v43, 0.0 }
 0x1ed   :  { %v337_v8 = vmul.f32 %v3440_v61, %v336_v62  ;;  %v806_v35 = vmul.f32 %v780_v63, %v676_v12  ;;  %v625_v10 = vmul.f32 %v4292_v2, %v4292_v2  ;;  %v703_v13 = vmul.f32 -15.0, %v4292_v2  ;;  %v3693_v12 = vld [vmem:[%s6233_s0 + $0x40] sm:$0xff]  ;;  %v4354_v54 = vpop.f32.mrf.mxu3 }
 0x1ee   :  { %3441 = vpow2.f32 %v994_v4  ;;  %v915_v40 = vsub.f32 %v4292_v2, %v3892_v55  ;;  %v731_v28 = vadd.f32 35.0, %v705_v29  ;;  %v653_v56 = vmul.f32 %v627_v24, %v627_v24 }
 0x1ef   :  { %v338_v15 = vmul.f32 %v337_v8, %v4250_v19  ;;  %v651_v16 = vmul.f32 %v625_v10, %v625_v10  ;;  %v729_v6 = vadd.f32 35.0, %v703_v13  ;;  %v832_v17 = vadd.f32 1.0, %v806_v35 }
 0x1f0   :  { %v941_v18 = vmul.f32 -112.5, %v915_v40  ;;  %v757_v59 = vmul.f32 %v731_v28, %v4311_v52  ;;  %v679_v10 = vmul.f32 %v653_v56, %v4311_v52 }
 0x1f1   :  { %v340_v3 = vsel %vm339_vm13, %v4250_v19, %v338_v15  ;;  %v755_v21 = vmul.f32 %v729_v6, %v4292_v2  ;;  %v677_v26 = vmul.f32 %v651_v16, %v4292_v2  ;;  %v884_v33 = vsel %vm858_vm15, %v832_v17, 0.0 }
 0x1f2   :  { %v967_v14 = vmul.f32 %v941_v18, %v915_v40  ;;  %v343_v23 = vsel %vm341_vm14, %v342_v7, %v340_v3  ;;  %v917_v19 = vsub.f32 %v4311_v52, %v3892_v55  ;;  %v783_v13 = vadd.f32 -21.0, %v757_v59  ;;  %v4360_v40 = vpop.f32.mrf.mxu2 }
 0x1f3   :  { %v124_v25 = vpop.permute.xlu1 %123  ;;  %v781_v27 = vadd.f32 -21.0, %v755_v21  ;;  %v4318_v1 = vmul.f32 0.14285715, %v343_v23  ;;  %v3694_v21 = vld [vmem:[%s6233_s0 + $0x48] sm:$0xff]  ;;  %v366_v52 = vand.u32 2147483648, %v4334_v43 }
 0x1f4   :  { %v3442_v0 = vpop.eup %3441  ;;  %v213_v31 = vsel %vm179_vm0, %v124_v25, 0.0  ;;  %v996_v34 = vmul.f32 1.442695, %v967_v14  ;;  %3243 = vmatmul.msk.f32.gmra.mxu2 %vm1349_vm5, %v3692_v22  ;;  %3270 = vmatmul.msk.f32.gmra.mxu3 %vm1349_vm5, %v3692_v22  ;;  %v943_v53 = vmul.f32 -112.5, %v917_v19  ;;  %vm859_vm0 = vcmp.lt.f32.partialorder %v4292_v2, 1.0 }
 0x1f5   :  { %v1044_v39 = vmul.f32 %v3442_v0, %v884_v33  ;;  %v807_v61 = vmul.f32 %v781_v27, %v677_v26  ;;  %v626_v41 = vmul.f32 %v4318_v1, %v4318_v1  ;;  %v704_v42 = vmul.f32 -15.0, %v4318_v1  ;;  %214 = vadd.xlane.f32.xlu0 %v213_v31  ;;  %v4371_v27 = vpop.f32.mrf.mxu3  ;;  %v3695_v33 = vld [vmem:[%s6233_s0 + $0x50] sm:$0xff] }
 0x1f6   :  { %3443 = vpow2.f32 %v996_v34  ;;  %v916_v44 = vsub.f32 %v4318_v1, %v3892_v55  ;;  %v969_v32 = vmul.f32 %v943_v53, %v917_v19  ;;  %v809_v17 = vmul.f32 %v783_v13, %v679_v10 }
 0x1f7   :  { %3185 = vmatmul.msk.f32.gmra.mxu0 %vm1080_vm9, %v1044_v39  ;;  %3211 = vmatmul.msk.f32.gmra.mxu1 %vm1080_vm9, %v1044_v39  ;;  %v652_v45 = vmul.f32 %v626_v41, %v626_v41  ;;  %v730_v46 = vadd.f32 35.0, %v704_v42  ;;  %v833_v47 = vadd.f32 1.0, %v807_v61  ;;  %3445 = vrsqrt.f32 %v4334_v43 }
 0x1f8   :  { %v942_v51 = vmul.f32 -112.5, %v916_v44  ;;  %v1000_v6 = vmul.f32 1.442695, %v969_v32  ;;  %vm860_vm1 = vcmp.lt.f32.partialorder %v4318_v1, 1.0  ;;  %v835_v26 = vadd.f32 1.0, %v809_v17 }
 0x1f9   :  { %v756_v50 = vmul.f32 %v730_v46, %v4318_v1  ;;  %v678_v48 = vmul.f32 %v652_v45, %v4318_v1  ;;  %v885_v62 = vsel %vm859_vm0, %v833_v47, 0.0 }
 0x1fa   :  { %v968_v58 = vmul.f32 %v942_v51, %v916_v44  ;;  %v4373_v29 = vpop.f32.mrf.mxu2  ;;  %v887_v31 = vsel %vm861_vm2, %v835_v26, 0.0 }
 0x1fb   :  { %v782_v57 = vadd.f32 -21.0, %v756_v50 }
 0x1fc   :  { %v3444_v60 = vpop.eup %3443  ;;  %3244 = vmatmul.msk.f32.gmra.mxu2 %vm1349_vm5, %v3693_v12  ;;  %3271 = vmatmul.msk.f32.gmra.mxu3 %vm1349_vm5, %v3693_v12  ;;  %v998_v2 = vmul.f32 1.442695, %v968_v58  ;;  %v3696_v12 = vld [vmem:[%s6233_s0 + $0x68] sm:$0xff] }
 0x1fd   :  { %v1045_v63 = vmul.f32 %v3444_v60, %v885_v62  ;;  %v808_v4 = vmul.f32 %v782_v57, %v678_v48  ;;  %v3446_v8 = vpop.eup %3445  ;;  %v4387_v39 = vpop.f32.mrf.mxu3 }
 0x1fe   :  { %v357_v35 = vmul.f32 %v3446_v8, %v4334_v43  ;;  %3447 = vpow2.f32 %v998_v2 }
 0x1ff   :  { %3186 = vmatmul.msk.f32.gmra.mxu0 %vm1080_vm9, %v1045_v63  ;;  %3212 = vmatmul.msk.f32.gmra.mxu1 %vm1080_vm9, %v1045_v63  ;;  %v834_v16 = vadd.f32 1.0, %v808_v4  ;;  %3449 = vpow2.f32 %v1000_v6 }
 0x200   :  { %v358_v15 = vmul.f32 %v3446_v8, %v357_v35 }
 0x201   :  { %v886_v14 = vsel %vm860_vm1, %v834_v16, 0.0 }
 0x202   :  { %v359_v7 = vmul.f32 0.5, %v358_v15  ;;  %v4389_v36 = vpop.f32.mrf.mxu2 }
 0x204   :  { %v3448_v18 = vpop.eup %3447  ;;  %v360_v3 = vsub.f32 1.5, %v359_v7  ;;  %3245 = vmatmul.msk.f32.gmra.mxu2 %vm1349_vm5, %v3694_v21  ;;  %3272 = vmatmul.msk.f32.gmra.mxu3 %vm1349_vm5, %v3694_v21 }
 0x205   :  { %v1046_v23 = vmul.f32 %v3448_v18, %v886_v14  ;;  %v3450_v1 = vpop.eup %3449  ;;  %v4396_v50 = vpop.f32.mrf.mxu3  ;;  %v3697_v18 = vld [vmem:[%s6233_s0 + $0x70] sm:$0xff] }
 0x206   :  { %v361_v25 = vmul.f32 %v3446_v8, %v360_v3  ;;  %v1047_v34 = vmul.f32 %v3450_v1, %v887_v31 }
 0x207   :  { %3187 = vmatmul.msk.f32.gmra.mxu0 %vm1080_vm9, %v1046_v23  ;;  %3213 = vmatmul.msk.f32.gmra.mxu1 %vm1080_vm9, %v1046_v23 }
 0x208   :  { %v362_v0 = vmul.f32 %v361_v25, %v4334_v43 }
 0x20a   :  { %v364_v19 = vsel %vm363_vm3, %v4334_v43, %v362_v0  ;;  %v4402_v48 = vpop.f32.mrf.mxu2 }
 0x20b   :  { %v367_v22 = vsel %vm365_vm4, %v366_v52, %v364_v19 }
 0x20c   :  { %3246 = vmatmul.msk.f32.gmra.mxu2 %vm1349_vm5, %v3695_v33  ;;  %3273 = vmatmul.msk.f32.gmra.mxu3 %vm1349_vm5, %v3695_v33  ;;  %v602_v61 = vmul.f32 0.14285715, %v367_v22 }
 0x20d   :  { %v4409_v2 = vpop.f32.mrf.mxu3 }
 0x20e   :  { %v918_v41 = vsub.f32 %v602_v61, %v3892_v55  ;;  %v706_v42 = vmul.f32 -15.0, %v602_v61  ;;  %v628_v44 = vmul.f32 %v602_v61, %v602_v61  ;;  %vm862_vm6 = vcmp.lt.f32.partialorder %v602_v61, 1.0  ;;  %6253 = vst [vmem:[#allocation3_spill] sm:$0xff] %v4409_v2 }
 0x20f   :  { %3188 = vmatmul.msk.f32.gmra.mxu0 %vm1080_vm9, %v1047_v34  ;;  %3214 = vmatmul.msk.f32.gmra.mxu1 %vm1080_vm9, %v1047_v34 }
 0x210   :  { %v944_v43 = vmul.f32 -112.5, %v918_v41  ;;  %v732_v24 = vadd.f32 35.0, %v706_v42  ;;  %v654_v46 = vmul.f32 %v628_v44, %v628_v44  ;;  %v3698_v44 = vld [vmem:[%s6233_s0 + $0x78] sm:$0xff] }
 0x212   :  { %v970_v45 = vmul.f32 %v944_v43, %v918_v41  ;;  %v758_v28 = vmul.f32 %v732_v24, %v602_v61  ;;  %v680_v51 = vmul.f32 %v654_v46, %v602_v61  ;;  %v206_v56 = vpop.xlane.xlu2 %205  ;;  %v4415_v13 = vpop.f32.mrf.mxu2 }
 0x213   :  { %v266_v58 = vadd.f32 1e-12, %v206_v56  ;;  %6254 = vst [vmem:[#allocation4_spill] sm:$0xff] %v4415_v13 }
 0x214   :  { %3247 = vmatmul.msk.f32.gmra.mxu2 %vm1349_vm5, %v4166_v11  ;;  %3274 = vmatmul.msk.f32.gmra.mxu3 %vm1349_vm5, %v4166_v11  ;;  %v1002_v47 = vmul.f32 1.442695, %v970_v45  ;;  %v784_v11 = vadd.f32 -21.0, %v758_v28 }
 0x215   :  { %v4423_v21 = vpop.f32.mrf.mxu3  ;;  %vm387_vm10 = vcmp.eq.f32.partialorder %v266_v58, inf  ;;  %v390_v19 = vand.u32 2147483648, %v266_v58  ;;  %vm389_vm11 = vcmp.eq.f32.partialorder %v266_v58, 0.0 }
 0x216   :  { %3451 = vpow2.f32 %v1002_v47  ;;  %v810_v59 = vmul.f32 %v784_v11, %v680_v51  ;;  %6255 = vst [vmem:[#allocation5_spill] sm:$0xff] %v4423_v21 }
 0x218   :  { %v836_v62 = vadd.f32 1.0, %v810_v59 }
 0x21a   :  { %v209_v32 = vpop.xlane.xlu0 %208  ;;  %v4427_v0 = vpop.f32.mrf.mxu2 }
 0x21b   :  { %v4411_v10 = vadd.f32 1e-12, %v209_v32  ;;  %6256 = vst [vmem:[#allocation6_spill] sm:$0xff] %v4427_v0 }
 0x21c   :  { %3248 = vmatmul.msk.f32.gmra.mxu2 %vm1349_vm5, %v4157_v5  ;;  %3275 = vmatmul.msk.f32.gmra.mxu3 %vm1349_vm5, %v4157_v5  ;;  %v3452_v60 = vpop.eup %3451  ;;  %v888_v5 = vsel %vm862_vm6, %v836_v62, 0.0 }
 0x21d   :  { %v1048_v63 = vmul.f32 %v3452_v60, %v888_v5  ;;  %vm399_vm12 = vcmp.eq.f32.partialorder %v4411_v10, inf  ;;  %vm401_vm13 = vcmp.eq.f32.partialorder %v4411_v10, 0.0 }
 0x21e   :  { %v203_v53 = vpop.xlane.xlu1 %202 }
 0x21f   :  { %v265_v57 = vadd.f32 1e-12, %v203_v53  ;;  %3189 = vmatmul.msk.f32.gmra.mxu0 %vm1080_vm9, %v1048_v63  ;;  %3215 = vmatmul.msk.f32.gmra.mxu1 %vm1080_vm9, %v1048_v63 }
 0x221   :  { %3453 = vrsqrt.f32 %v265_v57  ;;  %vm375_vm7 = vcmp.eq.f32.partialorder %v265_v57, inf  ;;  %vm377_vm8 = vcmp.eq.f32.partialorder %v265_v57, 0.0  ;;  %v378_v31 = vand.u32 2147483648, %v265_v57 }
 0x222   :  { %3455 = vrsqrt.f32 %v266_v58  ;;  %v212_v23 = vpop.xlane.xlu0 %211  ;;  %v4449_v32 = vpop.f32.mrf.mxu2 }
 0x223   :  { %3457 = vrsqrt.f32 %v4411_v10  ;;  %v4425_v1 = vadd.f32 1e-12, %v212_v23  ;;  %6258 = vst [vmem:[#allocation8_spill] sm:$0xff] %v4449_v32 }
 0x224   :  { %3249 = vmatmul.msk.f32.gmra.mxu2 %vm1349_vm5, %v3696_v12  ;;  %3276 = vmatmul.msk.f32.gmra.mxu3 %vm1349_vm5, %v3696_v12 }
 0x225   :  { %3459 = vrsqrt.f32 %v4425_v1  ;;  %vm411_vm14 = vcmp.eq.f32.partialorder %v4425_v1, inf  ;;  %vm413_vm0 = vcmp.eq.f32.partialorder %v4425_v1, 0.0 }
 0x227   :  { %v3454_v4 = vpop.eup %3453 }
 0x228   :  { %v3456_v8 = vpop.eup %3455  ;;  %v369_v35 = vmul.f32 %v3454_v4, %v265_v57 }
 0x229   :  { %v381_v15 = vmul.f32 %v3456_v8, %v266_v58  ;;  %v3458_v25 = vpop.eup %3457 }
 0x22a   :  { %v370_v16 = vmul.f32 %v3454_v4, %v369_v35  ;;  %v393_v52 = vmul.f32 %v3458_v25, %v4411_v10 }
 0x22b   :  { %v382_v6 = vmul.f32 %v3456_v8, %v381_v15  ;;  %v3460_v51 = vpop.eup %3459 }
 0x22c   :  { %v371_v7 = vmul.f32 0.5, %v370_v16  ;;  %3250 = vmatmul.msk.f32.gmra.mxu2 %vm1349_vm5, %v3697_v18  ;;  %3277 = vmatmul.msk.f32.gmra.mxu3 %vm1349_vm5, %v3697_v18  ;;  %v394_v61 = vmul.f32 %v3458_v25, %v393_v52  ;;  %v405_v60 = vmul.f32 %v3460_v51, %v4425_v1 }
 0x22d   :  { %v383_v17 = vmul.f32 0.5, %v382_v6 }
 0x22e   :  { %v372_v3 = vsub.f32 1.5, %v371_v7  ;;  %v395_v43 = vmul.f32 0.5, %v394_v61  ;;  %v406_v35 = vmul.f32 %v3460_v51, %v405_v60  ;;  %v3700_v60 = vld [vmem:[%s6233_s0 + $0x88] sm:$0xff] }
 0x22f   :  { %v384_v14 = vsub.f32 1.5, %v383_v17 }
 0x230   :  { %v373_v26 = vmul.f32 %v3454_v4, %v372_v3  ;;  %v396_v28 = vsub.f32 1.5, %v395_v43  ;;  %v407_v3 = vmul.f32 0.5, %v406_v35 }
 0x231   :  { %v385_v33 = vmul.f32 %v3456_v8, %v384_v14  ;;  %v3699_v14 = vld [vmem:[%s6233_s0 + $0x80] sm:$0xff] }
 0x232   :  { %v374_v34 = vmul.f32 %v373_v26, %v265_v57  ;;  %v397_v59 = vmul.f32 %v3458_v25, %v396_v28 }
 0x233   :  { %v386_v22 = vmul.f32 %v385_v33, %v266_v58 }
 0x234   :  { %v376_v41 = vsel %vm375_vm7, %v265_v57, %v374_v34  ;;  %3251 = vmatmul.msk.f32.gmra.mxu2 %vm1349_vm5, %v3698_v44  ;;  %3278 = vmatmul.msk.f32.gmra.mxu3 %vm1349_vm5, %v3698_v44  ;;  %v402_v57 = vand.u32 2147483648, %v4411_v10  ;;  %v398_v8 = vmul.f32 %v397_v59, %v4411_v10  ;;  %v408_v34 = vsub.f32 1.5, %v407_v3  ;;  %v4479_v59 = vpop.f32.mrf.mxu2 }
 0x235   :  { %v388_v42 = vsel %vm387_vm10, %v266_v58, %v386_v22  ;;  %v379_v24 = vsel %vm377_vm8, %v378_v31, %v376_v41  ;;  %v4442_v58 = vpop.f32.mrf.mxu3  ;;  %6260 = vst [vmem:[#allocation10_spill] sm:$0xff] %v4479_v59 }
 0x236   :  { %v603_v45 = vmul.f32 0.14285715, %v379_v24  ;;  %v391_v46 = vsel %vm389_vm11, %v390_v19, %v388_v42  ;;  %6257 = vst [vmem:[#allocation7_spill] sm:$0xff] %v4442_v58  ;;  %v400_v18 = vsel %vm399_vm12, %v4411_v10, %v398_v8  ;;  %v409_v43 = vmul.f32 %v3460_v51, %v408_v34 }
 0x237   :  { %v4438_v47 = vmul.f32 0.14285715, %v391_v46  ;;  %v403_v52 = vsel %vm401_vm13, %v402_v57, %v400_v18 }
 0x238   :  { %v629_v11 = vmul.f32 %v603_v45, %v603_v45  ;;  %v707_v53 = vmul.f32 -15.0, %v603_v45  ;;  %v919_v56 = vsub.f32 %v603_v45, %v3892_v55  ;;  %v4466_v61 = vmul.f32 0.14285715, %v403_v52 }
 0x239   :  { %v708_v62 = vmul.f32 -15.0, %v4438_v47  ;;  %v920_v4 = vsub.f32 %v4438_v47, %v3892_v55  ;;  %v630_v15 = vmul.f32 %v4438_v47, %v4438_v47  ;;  %vm863_vm15 = vcmp.lt.f32.partialorder %v603_v45, 1.0 }
 0x23a   :  { %v655_v12 = vmul.f32 %v629_v11, %v629_v11  ;;  %v733_v5 = vadd.f32 35.0, %v707_v53  ;;  %v945_v63 = vmul.f32 -112.5, %v919_v56  ;;  %v709_v28 = vmul.f32 -15.0, %v4466_v61 }
 0x23b   :  { %v734_v16 = vadd.f32 35.0, %v708_v62  ;;  %v656_v23 = vmul.f32 %v630_v15, %v630_v15  ;;  %v946_v33 = vmul.f32 -112.5, %v920_v4  ;;  %v921_v10 = vsub.f32 %v4466_v61, %v3892_v55 }
 0x23c   :  { %v681_v6 = vmul.f32 %v655_v12, %v603_v45  ;;  %v759_v7 = vmul.f32 %v733_v5, %v603_v45  ;;  %v971_v17 = vmul.f32 %v945_v63, %v919_v56  ;;  %3252 = vmatmul.msk.f32.gmra.mxu2 %vm1349_vm5, %v3699_v14  ;;  %3279 = vmatmul.msk.f32.gmra.mxu3 %vm1349_vm5, %v3699_v14  ;;  %v414_v56 = vand.u32 2147483648, %v4425_v1 }
 0x23d   :  { %v760_v25 = vmul.f32 %v734_v16, %v4438_v47  ;;  %v682_v19 = vmul.f32 %v656_v23, %v4438_v47  ;;  %v972_v42 = vmul.f32 %v946_v33, %v920_v4  ;;  %v4472_v11 = vpop.f32.mrf.mxu3  ;;  %v410_v53 = vmul.f32 %v409_v43, %v4425_v1 }
 0x23e   :  { %v785_v26 = vadd.f32 -21.0, %v759_v7  ;;  %v1004_v31 = vmul.f32 1.442695, %v971_v17  ;;  %6259 = vst [vmem:[#allocation9_spill] sm:$0xff] %v4472_v11  ;;  %v631_v45 = vmul.f32 %v4466_v61, %v4466_v61  ;;  %v735_v63 = vadd.f32 35.0, %v709_v28 }
 0x23f   :  { %v786_v22 = vadd.f32 -21.0, %v760_v25  ;;  %v1006_v46 = vmul.f32 1.442695, %v972_v42  ;;  %v412_v57 = vsel %vm411_vm14, %v4425_v1, %v410_v53  ;;  %v947_v4 = vmul.f32 -112.5, %v921_v10 }
 0x240   :  { %v811_v41 = vmul.f32 %v785_v26, %v681_v6  ;;  %3461 = vpow2.f32 %v1004_v31  ;;  %v657_v5 = vmul.f32 %v631_v45, %v631_v45  ;;  %vm864_vm1 = vcmp.lt.f32.partialorder %v4438_v47, 1.0  ;;  %v3701_v31 = vld [vmem:[%s6233_s0 + $0x90] sm:$0xff] }
 0x241   :  { %v812_v44 = vmul.f32 %v786_v22, %v682_v19  ;;  %3463 = vpow2.f32 %v1006_v46  ;;  %v415_v35 = vsel %vm413_vm0, %v414_v56, %v412_v57  ;;  %v761_v16 = vmul.f32 %v735_v63, %v4466_v61  ;;  %v3703_v63 = vld [vmem:[%s6233_s0 + $0xa0] sm:$0xff] }
 0x242   :  { %v837_v24 = vadd.f32 1.0, %v811_v41  ;;  %v683_v15 = vmul.f32 %v657_v5, %v4466_v61  ;;  %v973_v6 = vmul.f32 %v947_v4, %v921_v10  ;;  %v606_v7 = vmul.f32 0.14285715, %v415_v35  ;;  %v4502_v41 = vpop.f32.mrf.mxu2 }
 0x243   :  { %v838_v12 = vadd.f32 1.0, %v812_v44  ;;  %v787_v3 = vadd.f32 -21.0, %v761_v16  ;;  %6262 = vst [vmem:[#allocation12_spill] sm:$0xff] %v4502_v41  ;;  %vm865_vm2 = vcmp.lt.f32.partialorder %v4466_v61, 1.0  ;;  %v3702_v61 = vld [vmem:[%s6233_s0 + $0x98] sm:$0xff] }
 0x244   :  { %v889_v51 = vsel %vm863_vm15, %v837_v24, 0.0  ;;  %3253 = vmatmul.msk.f32.gmra.mxu2 %vm1349_vm5, %v3700_v60  ;;  %3280 = vmatmul.msk.f32.gmra.mxu3 %vm1349_vm5, %v3700_v60  ;;  %v1008_v14 = vmul.f32 1.442695, %v973_v6  ;;  %v632_v23 = vmul.f32 %v606_v7, %v606_v7  ;;  %v710_v25 = vmul.f32 -15.0, %v606_v7  ;;  %v1271_v6 = vpop.f32.mrf.mxu1 }
 0x245   :  { %v890_v18 = vsel %vm864_vm1, %v838_v12, 0.0  ;;  %v813_v47 = vmul.f32 %v787_v3, %v683_v15  ;;  %v922_v1 = vsub.f32 %v606_v7, %v3892_v55  ;;  %v4495_v26 = vpop.f32.mrf.mxu3  ;;  %vm866_vm3 = vcmp.lt.f32.partialorder %v606_v7, 1.0  ;;  %v1625_v3 = vld [vmem:[%s6236_s3] sm:$0x3] }
 0x246   :  { %v3462_v62 = vpop.eup %3461  ;;  %3465 = vpow2.f32 %v1008_v14  ;;  %6261 = vst [vmem:[#allocation11_spill] sm:$0xff] %v4495_v26  ;;  %v658_v52 = vmul.f32 %v632_v23, %v632_v23  ;;  %v736_v34 = vadd.f32 35.0, %v710_v25  ;;  %v3704_v14 = vld [vmem:[%s6233_s0 + $0xa8] sm:$0xff]  ;;  %v2737_v23 = vld [vmem:[%s6237_s4 + $0x70] sm:$0xff] }
 0x247   :  { %v1049_v8 = vmul.f32 %v3462_v62, %v889_v51  ;;  %v3464_v17 = vpop.eup %3463  ;;  %v839_v19 = vadd.f32 1.0, %v813_v47  ;;  %v948_v22 = vmul.f32 -112.5, %v922_v1 }
 0x248   :  { %v1050_v33 = vmul.f32 %v3464_v17, %v890_v18  ;;  %v762_v42 = vmul.f32 %v736_v34, %v606_v7  ;;  %v684_v44 = vmul.f32 %v658_v52, %v606_v7  ;;  %v1176_v7 = vpop.f32.mrf.mxu0  ;;  %v2738_v17 = vld [vmem:[%s6237_s4 + $0x78] sm:$0xff] }
 0x249   :  { %3190 = vmatmul.msk.f32.gmra.mxu0 %vm1080_vm9, %v1049_v8  ;;  %3216 = vmatmul.msk.f32.gmra.mxu1 %vm1080_vm9, %v1049_v8  ;;  %v974_v43 = vmul.f32 %v948_v22, %v922_v1  ;;  %v891_v28 = vsel %vm865_vm2, %v839_v19, 0.0  ;;  %v2746_v18 = vld [vmem:[%s6237_s4 + $0xb8] sm:$0xff]  ;;  %v4546_v1 = vperm.slane %v1625_v3, 0 }
 0x24a   :  { %v788_v10 = vadd.f32 -21.0, %v762_v42  ;;  %v4516_v60 = vpop.f32.mrf.mxu2  ;;  %2830 = vmatpush.msrb.mxu0 %v2738_v17  ;;  %2933 = vmatpush.msrb.mxu1 %v2746_v18 }
 0x24b   :  { %v1010_v53 = vmul.f32 1.442695, %v974_v43  ;;  %6264 = vst [vmem:[#allocation14_spill] sm:$0xff] %v4516_v60 }
 0x24c   :  { %3254 = vmatmul.msk.f32.gmra.mxu2 %vm1349_vm5, %v3701_v31  ;;  %3281 = vmatmul.msk.f32.gmra.mxu3 %vm1349_vm5, %v3701_v31  ;;  %v3466_v24 = vpop.eup %3465  ;;  %v814_v57 = vmul.f32 %v788_v10, %v684_v44  ;;  %6265 = vst [vmem:[#allocation15_spill] sm:$0xff] %v4546_v1  ;;  %v1274_v42 = vpop.f32.mrf.mxu1  ;;  %v2745_v10 = vld [vmem:[%s6237_s4 + $0xb0] sm:$0xff] }
 0x24d   :  { %v4507_v56 = vpop.f32.mrf.mxu3  ;;  %v1051_v45 = vmul.f32 %v3466_v24, %v891_v28  ;;  %3467 = vpow2.f32 %v1010_v53  ;;  %2831 = vmatpush.msrb.mxu0 %v2737_v23  ;;  %v2736_v28 = vld [vmem:[%s6237_s4 + $0x68] sm:$0xff]  ;;  %2934 = vmatpush.msrb.mxu1 %v2745_v10  ;;  %v2735_v23 = vld [vmem:[%s6237_s4 + $0x60] sm:$0xff] }
 0x24e   :  { %v218_v46 = vpop.xlane.xlu1 %217  ;;  %6263 = vst [vmem:[#allocation13_spill] sm:$0xff] %v4507_v56  ;;  %v840_v62 = vadd.f32 1.0, %v814_v57  ;;  %v2727_v56 = vld [vmem:[%s6237_s4 + $0x20] sm:$0xff] }
 0x24f   :  { %v4509_v51 = vadd.f32 1e-12, %v218_v46  ;;  %2832 = vmatpush.msrb.mxu0 %v2736_v28 }
 0x250   :  { %v892_v12 = vsel %vm866_vm3, %v840_v62, 0.0  ;;  %v1179_v44 = vpop.f32.mrf.mxu0 }
 0x251   :  { %3191 = vmatmul.msk.f32.gmra.mxu0 %vm1080_vm9, %v1050_v33  ;;  %3217 = vmatmul.msk.f32.gmra.mxu1 %vm1080_vm9, %v1050_v33  ;;  %3469 = vrsqrt.f32 %v4509_v51  ;;  %v4548_v33 = vperm.slane %v1625_v3, 1  ;;  %v3706_v3 = vld [vmem:[%s6233_s0 + $0xb8] sm:$0xff]  ;;  %vm435_vm4 = vcmp.eq.f32.partialorder %v4509_v51, inf  ;;  %vm437_vm6 = vcmp.eq.f32.partialorder %v4509_v51, 0.0 }
 0x252   :  { %v1452_v15 = vpop.f32.mrf.mxu2  ;;  %2833 = vmatpush.msrb.mxu0 %v2735_v23  ;;  %v2743_v23 = vld [vmem:[%s6237_s4 + $0xa0] sm:$0xff] }
 0x253   :  { %v3468_v5 = vpop.eup %3467  ;;  %v1453_v47 = vadd.f32 %v1452_v15, %v1176_v7 }
 0x254   :  { %3255 = vmatmul.msk.f32.gmra.mxu2 %vm1349_vm5, %v3702_v61  ;;  %3282 = vmatmul.msk.f32.gmra.mxu3 %vm1349_vm5, %v3702_v61  ;;  %v1052_v4 = vmul.f32 %v3468_v5, %v892_v12  ;;  %v3705_v61 = vld [vmem:[%s6233_s0 + $0xb0] sm:$0xff] }
 0x255   :  { %v1547_v35 = vpop.f32.mrf.mxu3  ;;  %v4553_v24 = vadd.f32 %v4546_v1, %v1453_v47 }
 0x256   :  { %v1548_v31 = vadd.f32 %v1547_v35, %v1271_v6 }
 0x257   :  { %v3470_v8 = vpop.eup %3469  ;;  %v3289_v62 = vmul.f32 -1.442695, %v4553_v24 }
 0x258   :  { %v429_v16 = vmul.f32 %v3470_v8, %v4509_v51  ;;  %v4563_v53 = vadd.f32 %v4548_v33, %v1548_v31  ;;  %v438_v31 = vand.u32 2147483648, %v4509_v51 }
 0x259   :  { %3192 = vmatmul.msk.f32.gmra.mxu0 %vm1080_vm9, %v1051_v45  ;;  %3218 = vmatmul.msk.f32.gmra.mxu1 %vm1080_vm9, %v1051_v45 }
 0x25a   :  { %v430_v25 = vmul.f32 %v3470_v8, %v429_v16  ;;  %v1455_v43 = vpop.f32.mrf.mxu2  ;;  %v3290_v5 = vmul.f32 -1.442695, %v4563_v53 }
 0x25b   :  { %v1456_v45 = vadd.f32 %v1455_v43, %v1179_v44 }
 0x25c   :  { %3256 = vmatmul.msk.f32.gmra.mxu2 %vm1349_vm5, %v3703_v63  ;;  %3283 = vmatmul.msk.f32.gmra.mxu3 %vm1349_vm5, %v3703_v63  ;;  %v431_v19 = vmul.f32 0.5, %v430_v25 }
 0x25d   :  { %v1550_v52 = vpop.f32.mrf.mxu3  ;;  %v4576_v35 = vadd.f32 %v4546_v1, %v1456_v45  ;;  %v3707_v45 = vld [vmem:[%s6233_s0 + $0xc0] sm:$0xff] }
 0x25e   :  { %v1551_v46 = vadd.f32 %v1550_v52, %v1274_v42  ;;  %v432_v57 = vsub.f32 1.5, %v431_v19 }
 0x25f   :  { %v3291_v25 = vmul.f32 -1.442695, %v4576_v35 }
 0x260   :  { %v4572_v12 = vadd.f32 %v4548_v33, %v1551_v46 }
 0x261   :  { %3193 = vmatmul.msk.f32.gmra.mxu0 %vm1080_vm9, %v1052_v4  ;;  %3219 = vmatmul.msk.f32.gmra.mxu1 %vm1080_vm9, %v1052_v4  ;;  %v433_v4 = vmul.f32 %v3470_v8, %v432_v57  ;;  %v2744_v57 = vld [vmem:[%s6237_s4 + $0xa8] sm:$0xff] }
 0x262   :  { %v3292_v6 = vmul.f32 -1.442695, %v4572_v12  ;;  %v1458_v8 = vpop.f32.mrf.mxu2  ;;  %2935 = vmatpush.msrb.mxu1 %v2744_v57 }
 0x264   :  { %3257 = vmatmul.msk.f32.gmra.mxu2 %vm1349_vm5, %v3704_v14  ;;  %3284 = vmatmul.msk.f32.gmra.mxu3 %vm1349_vm5, %v3704_v14  ;;  %v434_v14 = vmul.f32 %v433_v4, %v4509_v51 }
 0x265   :  { %v1553_v15 = vpop.f32.mrf.mxu3  ;;  %2936 = vmatpush.msrb.mxu1 %v2743_v23 }
 0x266   :  { %v436_v19 = vsel %vm435_vm4, %v4509_v51, %v434_v14  ;;  %v2734_v51 = vld [vmem:[%s6237_s4 + $0x58] sm:$0xff] }
 0x267   :  { %2834 = vmatpush.msrb.mxu0 %v2734_v51 }
 0x268   :  { %v215_v34 = vpop.xlane.xlu0 %214 }
 0x269   :  { %v4550_v22 = vadd.f32 1e-12, %v215_v34 }
 0x26b   :  { %3471 = vrsqrt.f32 %v4550_v22  ;;  %vm423_vm7 = vcmp.eq.f32.partialorder %v4550_v22, inf  ;;  %vm425_vm8 = vcmp.eq.f32.partialorder %v4550_v22, 0.0 }
 0x26c   :  { %3258 = vmatmul.msk.f32.gmra.mxu2 %vm1349_vm5, %v3705_v61  ;;  %3285 = vmatmul.msk.f32.gmra.mxu3 %vm1349_vm5, %v3705_v61  ;;  %3473 = vpow2.f32 %v3289_v62  ;;  %v2733_v62 = vld [vmem:[%s6237_s4 + $0x50] sm:$0xff] }
 0x26d   :  { %3475 = vpow2.f32 %v3290_v5  ;;  %v439_v5 = vsel %vm437_vm6, %v438_v31, %v436_v19  ;;  %2835 = vmatpush.msrb.mxu0 %v2733_v62  ;;  %v2731_v31 = vld [vmem:[%s6237_s4 + $0x40] sm:$0xff] }
 0x26e   :  { %3477 = vpow2.f32 %v3292_v6 }
 0x26f   :  { %3479 = vpow2.f32 %v3291_v25  ;;  %v4626_v25 = vmul.f32 0.14285715, %v439_v5 }
 0x271   :  { %v3472_v63 = vpop.eup %3471  ;;  %v712_v19 = vmul.f32 -15.0, %v4626_v25  ;;  %v924_v62 = vsub.f32 %v4626_v25, %v3892_v55  ;;  %vm868_vm12 = vcmp.lt.f32.partialorder %v4626_v25, 1.0 }
 0x272   :  { %v417_v16 = vmul.f32 %v3472_v63, %v4550_v22  ;;  %v3474_v34 = vpop.eup %3473 }
 0x273   :  { %v3476_v42 = vpop.eup %3475  ;;  %v4594_v28 = vadd.f32 1.0, %v3474_v34 }
 0x274   :  { %v1182_v7 = vpop.f32.mrf.mxu0  ;;  %v1277_v17 = vpop.f32.mrf.mxu1  ;;  %v418_v18 = vmul.f32 %v3472_v63, %v417_v16  ;;  %3259 = vmatmul.msk.f32.gmra.mxu2 %vm1349_vm5, %v3706_v3  ;;  %3286 = vmatmul.msk.f32.gmra.mxu3 %vm1349_vm5, %v3706_v3  ;;  %v4611_v4 = vadd.f32 1.0, %v3476_v42  ;;  %v426_v16 = vand.u32 2147483648, %v4550_v22 }
 0x275   :  { %v1554_v44 = vadd.f32 %v1553_v15, %v1277_v17  ;;  %v1459_v61 = vadd.f32 %v1458_v8, %v1182_v7  ;;  %v1556_v15 = vpop.f32.mrf.mxu3  ;;  %v2732_v17 = vld [vmem:[%s6237_s4 + $0x48] sm:$0xff]  ;;  %v1461_v3 = vpop.f32.mrf.mxu2  ;;  %3481 = vrcp.f32 %v4594_v28  ;;  %vm1896_vm10 = vweird.f32 %v4594_v28 }
 0x276   :  { %v419_v47 = vmul.f32 0.5, %v418_v18  ;;  %3483 = vrcp.f32 %v4611_v4  ;;  %2836 = vmatpush.msrb.mxu0 %v2732_v17 }
 0x277   :  { %v4621_v8 = vadd.f32 %v4548_v33, %v1554_v44  ;;  %v4640_v34 = vadd.f32 %v4546_v1, %v1459_v61  ;;  %v2730_v44 = vld [vmem:[%s6237_s4 + $0x38] sm:$0xff] }
 0x278   :  { %v420_v52 = vsub.f32 1.5, %v419_v47  ;;  %2837 = vmatpush.msrb.mxu0 %v2731_v31  ;;  %v2739_v31 = vld [vmem:[%s6237_s4 + $0x80] sm:$0xff] }
 0x27a   :  { %v421_v43 = vmul.f32 %v3472_v63, %v420_v52  ;;  %v3478_v63 = vpop.eup %3477  ;;  %2838 = vmatpush.msrb.mxu0 %v2730_v44 }
 0x27b   :  { %v3480_v18 = vpop.eup %3479  ;;  %v4632_v47 = vadd.f32 1.0, %v3478_v63  ;;  %v3708_v63 = vld [vmem:[%s6233_s0 + $0xc8] sm:$0xff] }
 0x27c   :  { %v1280_v46 = vpop.f32.mrf.mxu1  ;;  %v422_v10 = vmul.f32 %v421_v43, %v4550_v22  ;;  %3260 = vmatmul.msk.f32.gmra.mxu2 %vm1349_vm5, %v3707_v45  ;;  %3287 = vmatmul.msk.f32.gmra.mxu3 %vm1349_vm5, %v3707_v45  ;;  %v1185_v6 = vpop.f32.mrf.mxu0  ;;  %v4653_v61 = vadd.f32 1.0, %v3480_v18  ;;  %v3294_v45 = vmul.f32 -1.442695, %v4621_v8  ;;  %v634_v18 = vmul.f32 %v4626_v25, %v4626_v25 }
 0x27d   :  { %v1557_v51 = vadd.f32 %v1556_v15, %v1280_v46  ;;  %3485 = vrcp.f32 %v4632_v47  ;;  %v1462_v5 = vadd.f32 %v1461_v3, %v1185_v6  ;;  %v2729_v46 = vld [vmem:[%s6237_s4 + $0x30] sm:$0xff]  ;;  %v3293_v15 = vmul.f32 -1.442695, %v4640_v34  ;;  %v1464_v26 = vpop.f32.mrf.mxu2 }
 0x27e   :  { %v424_v7 = vsel %vm423_vm7, %v4550_v22, %v422_v10  ;;  %v2742_v22 = vld [vmem:[%s6237_s4 + $0x98] sm:$0xff]  ;;  %v2741_v10 = vld [vmem:[%s6237_s4 + $0x90] sm:$0xff]  ;;  %v738_v3 = vadd.f32 35.0, %v712_v19  ;;  %3487 = vrcp.f32 %v4653_v61  ;;  %2839 = vmatpush.msrb.mxu0 %v2729_v46  ;;  %vm1941_vm2 = vweird.f32 %v4632_v47 }
 0x27f   :  { %v427_v14 = vsel %vm425_vm8, %v426_v16, %v424_v7  ;;  %2937 = vmatpush.msrb.mxu1 %v2742_v22  ;;  %v2728_v22 = vld [vmem:[%s6237_s4 + $0x28] sm:$0xff]  ;;  %3489 = vpow2.f32 %v3294_v45  ;;  %v4688_v19 = vadd.f32 %v4548_v33, %v1557_v51  ;;  %v4694_v60 = vadd.f32 %v4546_v1, %v1462_v5 }
 0x280   :  { %v4637_v52 = vmul.f32 0.14285715, %v427_v14  ;;  %v4675_v14 = vpop.eup %3481  ;;  %3491 = vpow2.f32 %v3293_v15  ;;  %2840 = vmatpush.msrb.mxu0 %v2728_v22  ;;  %v660_v51 = vmul.f32 %v634_v18, %v634_v18  ;;  %v2726_v15 = vld [vmem:[%s6237_s4 + $0x18] sm:$0xff]  ;;  %v2725_v22 = vld [vmem:[%s6237_s4 + $0x10] sm:$0xff]  ;;  %vm1926_vm7 = vweird.f32 %v4653_v61 }
 0x281   :  { %2938 = vmatpush.msrb.mxu1 %v2741_v10  ;;  %v1892_v5 = vmul.f32 %v4675_v14, %v4594_v28  ;;  %vm1897_vm13 = vweird.f32 %v4675_v14 }
 0x282   :  { %v633_v42 = vmul.f32 %v4637_v52, %v4637_v52  ;;  %v711_v43 = vmul.f32 -15.0, %v4637_v52  ;;  %v923_v57 = vsub.f32 %v4637_v52, %v3892_v55  ;;  %v2740_v55 = vld [vmem:[%s6237_s4 + $0x88] sm:$0xff]  ;;  %2841 = vmatpush.msrb.mxu0 %v2727_v56  ;;  %v686_v11 = vmul.f32 %v660_v51, %v4626_v25  ;;  %vm4769_vm0 = vmor %vm1896_vm10, %vm1897_vm13 }
 0x283   :  { %2939 = vmatpush.msrb.mxu1 %v2740_v55  ;;  %v1917_v51 = vand.u32 2147483648, %v4611_v4  ;;  %vm867_vm11 = vcmp.lt.f32.partialorder %v4637_v52, 1.0 }
 0x284   :  { %3261 = vmatmul.msk.f32.gmra.mxu2 %vm1349_vm5, %v3708_v63  ;;  %3288 = vmatmul.msk.f32.gmra.mxu3 %vm1349_vm5, %v3708_v63  ;;  %v737_v16 = vadd.f32 35.0, %v711_v43  ;;  %v1283_v6 = vpop.f32.mrf.mxu1  ;;  %v659_v7 = vmul.f32 %v633_v42, %v633_v42  ;;  %v949_v17 = vmul.f32 -112.5, %v923_v57  ;;  %v4685_v42 = vpop.eup %3483  ;;  %v950_v63 = vmul.f32 -112.5, %v924_v62 }
 0x285   :  { %v1559_v43 = vpop.f32.mrf.mxu3  ;;  %v1188_v44 = vpop.f32.mrf.mxu0  ;;  %2940 = vmatpush.msrb.mxu1 %v2739_v31  ;;  %v1907_v55 = vmul.f32 %v4685_v42, %v4611_v4  ;;  %v3295_v31 = vmul.f32 -1.442695, %v4694_v60  ;;  %2842 = vmatpush.msrb.mxu0 %v2726_v15  ;;  %vm1911_vm5 = vweird.f32 %v4611_v4  ;;  %vm1912_vm14 = vweird.f32 %v4685_v42 }
 0x286   :  { %v763_v23 = vmul.f32 %v737_v16, %v4637_v52  ;;  %v975_v10 = vmul.f32 %v949_v17, %v923_v57  ;;  %v685_v45 = vmul.f32 %v659_v7, %v4637_v52  ;;  %v764_v57 = vmul.f32 %v738_v3, %v4626_v25  ;;  %v4698_v46 = vpop.eup %3485  ;;  %vm4780_vm1 = vmor %vm1911_vm5, %vm1912_vm14 }
 0x287   :  { %v3296_v7 = vmul.f32 -1.442695, %v4688_v19  ;;  %v1560_v17 = vadd.f32 %v1559_v43, %v1283_v6  ;;  %v976_v18 = vmul.f32 %v950_v63, %v924_v62  ;;  %v4708_v3 = vpop.eup %3487  ;;  %v1908_v58 = vsub.f32 1.0, %v1907_v55  ;;  %v2724_v62 = vld [vmem:[%s6237_s4 + $0x8] sm:$0xff]  ;;  %2843 = vmatpush.msrb.mxu0 %v2725_v22 }
 0x288   :  { %v789_v16 = vadd.f32 -21.0, %v763_v23  ;;  %v1012_v41 = vmul.f32 1.442695, %v975_v10  ;;  %v3490_v10 = vpop.eup %3489  ;;  %v790_v59 = vadd.f32 -21.0, %v764_v57  ;;  %v1915_v6 = vand.u32 2147483647, %v4611_v4 }
 0x289   :  { %v3492_v32 = vpop.eup %3491  ;;  %v1465_v56 = vadd.f32 %v1464_v26, %v1188_v44  ;;  %v1893_v43 = vsub.f32 1.0, %v1892_v5  ;;  %v4720_v63 = vadd.f32 %v4548_v33, %v1560_v17  ;;  %v4723_v57 = vadd.f32 1.0, %v3490_v10  ;;  %v2723_v26 = vld [vmem:[%s6237_s4] sm:$0xff]  ;;  %2844 = vmatpush.msrb.mxu0 %v2724_v62 }
 0x28a   :  { %v815_v23 = vmul.f32 %v789_v16, %v685_v45  ;;  %3493 = vpow2.f32 %v1012_v41  ;;  %v1014_v45 = vmul.f32 1.442695, %v976_v18  ;;  %v1937_v44 = vmul.f32 %v4698_v46, %v4632_v47 }
 0x28b   :  { %3495 = vpow2.f32 %v3296_v7  ;;  %v816_v5 = vmul.f32 %v790_v59, %v686_v11  ;;  %v1922_v7 = vmul.f32 %v4708_v3, %v4653_v61  ;;  %v4734_v17 = vadd.f32 1.0, %v3492_v32  ;;  %v1467_v11 = vpop.f32.mrf.mxu2  ;;  %2845 = vmatpush.msrb.mxu0 %v2723_v26 }
 0x28c   :  { %v1286_v16 = vpop.f32.mrf.mxu1  ;;  %v841_v41 = vadd.f32 1.0, %v815_v23  ;;  %3497 = vpow2.f32 %v3295_v31  ;;  %v1894_v18 = vmul.f32 %v4675_v14, %v1893_v43  ;;  %v4739_v22 = vadd.f32 %v4546_v1, %v1465_v56 }
 0x28d   :  { %v1562_v55 = vpop.f32.mrf.mxu3  ;;  %v1191_v15 = vpop.f32.mrf.mxu0  ;;  %v1909_v10 = vmul.f32 %v4685_v42, %v1908_v58  ;;  %v3298_v59 = vmul.f32 -1.442695, %v4720_v63  ;;  %3499 = vpow2.f32 %v1014_v45  ;;  %v842_v0 = vadd.f32 1.0, %v816_v5 }
 0x28e   :  { %v1563_v23 = vadd.f32 %v1562_v55, %v1286_v16  ;;  %v893_v62 = vsel %vm867_vm11, %v841_v41, 0.0  ;;  %3501 = vrcp.f32 %v4723_v57  ;;  %v1468_v32 = vadd.f32 %v1467_v11, %v1191_v15 }
 0x28f   :  { %v1938_v55 = vsub.f32 1.0, %v1937_v44  ;;  %v1902_v43 = vand.u32 2147483648, %v4594_v28  ;;  %v1923_v56 = vsub.f32 1.0, %v1922_v7  ;;  %3503 = vrcp.f32 %v4734_v17 }
 0x290   :  { %v3494_v31 = vpop.eup %3493  ;;  %v4747_v58 = vadd.f32 %v4548_v33, %v1563_v23  ;;  %v3297_v41 = vmul.f32 -1.442695, %v4739_v22  ;;  %v1910_v45 = vadd.f32 %v4685_v42, %v1909_v10  ;;  %3505 = vpow2.f32 %v3298_v59 }
 0x291   :  { %v1053_v16 = vmul.f32 %v3494_v31, %v893_v62  ;;  %v3496_v52 = vpop.eup %3495  ;;  %v1895_v26 = vadd.f32 %v4675_v14, %v1894_v18  ;;  %v1939_v15 = vmul.f32 %v4698_v46, %v1938_v55  ;;  %v4761_v5 = vadd.f32 %v4546_v1, %v1468_v32 }
 0x292   :  { %v3498_v21 = vpop.eup %3497  ;;  %v4757_v44 = vadd.f32 1.0, %v3496_v52  ;;  %3507 = vpow2.f32 %v3297_v41  ;;  %vm4763_vm15 = vcmp.eq.f32.partialorder %v1915_v6, 8.507059e+37  ;;  %v894_v23 = vsel %vm868_vm12, %v842_v0, 0.0 }
 0x293   :  { %3194 = vmatmul.msk.f32.gmra.mxu0 %vm1080_vm9, %v1053_v16  ;;  %3220 = vmatmul.msk.f32.gmra.mxu1 %vm1080_vm9, %v1053_v16  ;;  %v3500_v25 = vpop.eup %3499  ;;  %v1924_v18 = vmul.f32 %v4708_v3, %v1923_v56  ;;  %v4774_v10 = vadd.f32 1.0, %v3498_v21  ;;  %v1918_v59 = vor.u32 1.1754944e-38, %v1917_v51  ;;  %v3300_v0 = vmul.f32 -1.442695, %v4747_v58 }
 0x294   :  { %v4776_v11 = vpop.eup %3501  ;;  %v1900_v62 = vand.u32 2147483647, %v4594_v28  ;;  %v1903_v32 = vor.u32 1.1754944e-38, %v1902_v43  ;;  %v1914_v21 = vsel %vm4780_vm1, %v4685_v42, %v1910_v45  ;;  %v1899_v4 = vsel %vm4769_vm0, %v4675_v14, %v1895_v26 }
 0x295   :  { %v4786_v16 = vpop.eup %3503  ;;  %vm1942_vm3 = vweird.f32 %v4698_v46  ;;  %3509 = vrcp.f32 %v4757_v44  ;;  %v1054_v51 = vmul.f32 %v3500_v25, %v894_v23  ;;  %v1940_v28 = vadd.f32 %v4698_v46, %v1939_v15 }
 0x296   :  { %v3299_v55 = vmul.f32 -1.442695, %v4761_v5  ;;  %v3506_v52 = vpop.eup %3505  ;;  %v1925_v43 = vadd.f32 %v4708_v3, %v1924_v18  ;;  %vm1927_vm4 = vweird.f32 %v4708_v3  ;;  %v1967_v42 = vmul.f32 %v4776_v11, %v4723_v57  ;;  %vm4816_vm8 = vmor %vm1941_vm2, %vm1942_vm3 }
 0x297   :  { %3511 = vrcp.f32 %v4774_v10  ;;  %v1932_v56 = vand.u32 2147483648, %v4653_v61  ;;  %v1947_v41 = vand.u32 2147483648, %v4632_v47  ;;  %v1952_v45 = vmul.f32 %v4786_v16, %v4734_v17 }
 0x298   :  { %v3508_v14 = vpop.eup %3507  ;;  %3513 = vpow2.f32 %v3300_v0  ;;  %vm1901_vm6 = vcmp.eq.f32.partialorder %v1900_v62, 8.507059e+37  ;;  %v1930_v26 = vand.u32 2147483647, %v4653_v61  ;;  %v1945_v25 = vand.u32 2147483647, %v4632_v47 }
 0x299   :  { %v1919_v23 = vsel %vm4763_vm15, %v1918_v59, %v1914_v21  ;;  %v4823_v31 = vadd.f32 1.0, %v3506_v52  ;;  %v1904_v18 = vsel %vm1901_vm6, %v1903_v32, %v1899_v4  ;;  %3515 = vpow2.f32 %v3299_v55 }
 0x29a   :  { %v1944_v47 = vsel %vm4816_vm8, %v4698_v46, %v1940_v28  ;;  %v1968_v7 = vsub.f32 1.0, %v1967_v42  ;;  %v4837_v59 = vadd.f32 1.0, %v3508_v14  ;;  %v1933_v62 = vor.u32 1.1754944e-38, %v1932_v56  ;;  %v1565_v14 = vpop.f32.mrf.mxu3 }
 0x29b   :  { %3195 = vmatmul.msk.f32.gmra.mxu0 %vm1080_vm9, %v1054_v51  ;;  %3221 = vmatmul.msk.f32.gmra.mxu1 %vm1080_vm9, %v1054_v51  ;;  %vm4827_vm9 = vmor %vm1926_vm7, %vm1927_vm4  ;;  %v4839_v0 = vpop.eup %3509  ;;  %v1948_v32 = vor.u32 1.1754944e-38, %v1947_v41  ;;  %v1953_v21 = vsub.f32 1.0, %v1952_v45  ;;  %v1470_v51 = vpop.f32.mrf.mxu2  ;;  %v2671_v55 = vmul.f32 %v1904_v18, %v4553_v24  ;;  %vm2751_vm5 = vcmask 523264  }
 0x29c   :  { %v1929_v6 = vsel %vm4827_vm9, %v4708_v3, %v1925_v43  ;;  %vm1931_vm10 = vcmp.eq.f32.partialorder %v1930_v26, 8.507059e+37  ;;  %vm1946_vm11 = vcmp.eq.f32.partialorder %v1945_v25, 8.507059e+37  ;;  %v2672_v52 = vmul.f32 %v1919_v23, %v4563_v53  ;;  %v1194_v43 = vpop.f32.mrf.mxu0  ;;  %v1289_v42 = vpop.f32.mrf.mxu1 }
 0x29d   :  { %v4841_v4 = vpop.eup %3511  ;;  %3517 = vrcp.f32 %v4823_v31  ;;  %v1934_v46 = vsel %vm1931_vm10, %v1933_v62, %v1929_v6  ;;  %v1949_v28 = vsel %vm1946_vm11, %v1948_v32, %v1944_v47  ;;  %v1471_v56 = vadd.f32 %v1470_v51, %v1194_v43 }
 0x29e   :  { %v3514_v3 = vpop.eup %3513  ;;  %v1969_v41 = vmul.f32 %v4776_v11, %v1968_v7  ;;  %v1997_v45 = vmul.f32 %v4839_v0, %v4757_v44  ;;  %3519 = vrcp.f32 %v4837_v59  ;;  %v1566_v53 = vadd.f32 %v1565_v14, %v1289_v42 }
 0x29f   :  { %v3516_v24 = vpop.eup %3515  ;;  %v1954_v26 = vmul.f32 %v4786_v16, %v1953_v21  ;;  %v1982_v15 = vmul.f32 %v4841_v4, %v4774_v10  ;;  %v4854_v25 = vadd.f32 1.0, %v3514_v3  ;;  %v4857_v23 = vadd.f32 %v4546_v1, %v1471_v56 }
 0x2a0   :  { %v2673_v18 = vmul.f32 %v1934_v46, %v4576_v35  ;;  %v2674_v61 = vmul.f32 %v1949_v28, %v4572_v12  ;;  %vm1972_vm12 = vweird.f32 %v4776_v11  ;;  %vm1957_vm13 = vweird.f32 %v4786_v16 }
 0x2a1   :  { %v1970_v6 = vadd.f32 %v4776_v11, %v1969_v41  ;;  %v1998_v47 = vsub.f32 1.0, %v1997_v45  ;;  %v4864_v7 = vadd.f32 1.0, %v3516_v24  ;;  %v4869_v32 = vadd.f32 %v4548_v33, %v1566_v53 }
 0x2a2   :  { %v1955_v21 = vadd.f32 %v4786_v16, %v1954_v26  ;;  %v1983_v51 = vsub.f32 1.0, %v1982_v15  ;;  %v3301_v35 = vmul.f32 -1.442695, %v4857_v23  ;;  %3521 = vrcp.f32 %v4854_v25 }
 0x2a3   :  { %2846 = vmatmul.f32.vlgmr.msrb.gmra.mxu0 %v2671_v55  ;;  %3341 = vmatmul.msk.f32.vlgmr.msrb.gmra.mxu1 %vm2751_vm5, %v2672_v52  ;;  %v4866_v62 = vpop.eup %3517  ;;  %v1962_v55 = vand.u32 2147483648, %v4734_v17  ;;  %vm1971_vm14 = vweird.f32 %v4723_v57  ;;  %v1977_v3 = vand.u32 2147483648, %v4723_v57  ;;  %vm1956_vm15 = vweird.f32 %v4734_v17 }
 0x2a4   :  { %v4873_v12 = vpop.eup %3519  ;;  %v1960_v52 = vand.u32 2147483647, %v4734_v17  ;;  %vm4883_vm0 = vmor %vm1971_vm14, %vm1972_vm12  ;;  %v1975_v28 = vand.u32 2147483647, %v4723_v57  ;;  %3523 = vpow2.f32 %v3301_v35  ;;  %v1999_v17 = vmul.f32 %v4839_v0, %v1998_v47 }
 0x2a5   :  { %vm4890_vm1 = vmor %vm1956_vm15, %vm1957_vm13  ;;  %v1974_v42 = vsel %vm4883_vm0, %v4776_v11, %v1970_v6  ;;  %v2027_v14 = vmul.f32 %v4866_v62, %v4823_v31  ;;  %3525 = vrcp.f32 %v4864_v7  ;;  %v3302_v57 = vmul.f32 -1.442695, %v4869_v32 }
 0x2a6   :  { %v1959_v56 = vsel %vm4890_vm1, %v4786_v16, %v1955_v21  ;;  %v1984_v41 = vmul.f32 %v4841_v4, %v1983_v51  ;;  %v2012_v11 = vmul.f32 %v4873_v12, %v4837_v59  ;;  %v1963_v45 = vor.u32 1.1754944e-38, %v1962_v55 }
 0x2a7   :  { %v1978_v24 = vor.u32 1.1754944e-38, %v1977_v3  ;;  %vm1961_vm2 = vcmp.eq.f32.partialorder %v1960_v52, 8.507059e+37  ;;  %vm1976_vm3 = vcmp.eq.f32.partialorder %v1975_v28, 8.507059e+37  ;;  %vm2002_vm4 = vweird.f32 %v4839_v0 }
 0x2a8   :  { %v2007_v53 = vand.u32 2147483648, %v4757_v44  ;;  %v4911_v26 = vpop.eup %3521  ;;  %v1964_v15 = vsel %vm1961_vm2, %v1963_v45, %v1959_v56  ;;  %v2028_v16 = vsub.f32 1.0, %v2027_v14  ;;  %3527 = vpow2.f32 %v3302_v57  ;;  %v1568_v56 = vpop.f32.mrf.mxu3 }
 0x2a9   :  { %v1985_v47 = vadd.f32 %v4841_v4, %v1984_v41  ;;  %vm1987_vm6 = vweird.f32 %v4841_v4  ;;  %v2013_v21 = vsub.f32 1.0, %v2012_v11  ;;  %v1992_v35 = vand.u32 2147483648, %v4774_v10 }
 0x2aa   :  { %v3524_v6 = vpop.eup %3523  ;;  %vm2001_vm7 = vweird.f32 %v4757_v44  ;;  %v2005_v55 = vand.u32 2147483647, %v4757_v44  ;;  %v2675_v52 = vmul.f32 %v1964_v15, %v4640_v34  ;;  %vm1986_vm8 = vweird.f32 %v4774_v10 }
 0x2ab   :  { %2849 = vmatmul.f32.gmra.mxu0 %v2673_v18  ;;  %3342 = vmatmul.msk.f32.gmra.mxu1 %vm2751_vm5, %v2674_v61  ;;  %v1979_v18 = vsel %vm1976_vm3, %v1978_v24, %v1974_v42  ;;  %v2000_v61 = vadd.f32 %v4839_v0, %v1999_v17  ;;  %v4916_v51 = vpop.eup %3525  ;;  %v4921_v3 = vadd.f32 1.0, %v3524_v6  ;;  %v1990_v28 = vand.u32 2147483647, %v4774_v10  ;;  %vm4929_vm9 = vmor %vm2001_vm7, %vm2002_vm4  ;;  %v4944_v10 = vpop.f32.mrf.mxu2 }
 0x2ac   :  { %v2676_v46 = vmul.f32 %v1979_v18, %v4621_v8  ;;  %vm4933_vm10 = vmor %vm1986_vm8, %vm1987_vm6  ;;  %v2029_v8 = vmul.f32 %v4866_v62, %v2028_v16  ;;  %v2057_v44 = vmul.f32 %v4911_v26, %v4854_v25  ;;  %v2008_v14 = vor.u32 1.1754944e-38, %v2007_v53 }
 0x2ad   :  { %v2004_v34 = vsel %vm4929_vm9, %v4839_v0, %v2000_v61  ;;  %3529 = vrcp.f32 %v4921_v3  ;;  %v1989_v17 = vsel %vm4933_vm10, %v4841_v4, %v1985_v47  ;;  %v2014_v57 = vmul.f32 %v4873_v12, %v2013_v21 }
 0x2ae   :  { %v2042_v0 = vmul.f32 %v4916_v51, %v4864_v7  ;;  %v1993_v41 = vor.u32 1.1754944e-38, %v1992_v35  ;;  %vm2006_vm11 = vcmp.eq.f32.partialorder %v2005_v55, 8.507059e+37  ;;  %v3528_v11 = vpop.eup %3527  ;;  %vm1991_vm12 = vcmp.eq.f32.partialorder %v1990_v28, 8.507059e+37 }
 0x2af   :  { %v2009_v45 = vsel %vm2006_vm11, %v2008_v14, %v2004_v34  ;;  %v2030_v15 = vadd.f32 %v4866_v62, %v2029_v8  ;;  %vm2032_vm13 = vweird.f32 %v4866_v62  ;;  %v2058_v18 = vsub.f32 1.0, %v2057_v44 }
 0x2b0   :  { %v1994_v24 = vsel %vm1991_vm12, %v1993_v41, %v1989_v17  ;;  %v2015_v4 = vadd.f32 %v4873_v12, %v2014_v57  ;;  %vm2017_vm14 = vweird.f32 %v4873_v12  ;;  %vm2031_vm15 = vweird.f32 %v4823_v31 }
 0x2b1   :  { %v2043_v53 = vsub.f32 1.0, %v2042_v0  ;;  %v4960_v16 = vadd.f32 1.0, %v3528_v11  ;;  %v2022_v6 = vand.u32 2147483648, %v4837_v59  ;;  %v2035_v47 = vand.u32 2147483647, %v4823_v31  ;;  %vm4971_vm1 = vmor %vm2031_vm15, %vm2032_vm13 }
 0x2b2   :  { %v2037_v21 = vand.u32 2147483648, %v4823_v31  ;;  %v2677_v35 = vmul.f32 %v1994_v24, %v4694_v60  ;;  %v2678_v55 = vmul.f32 %v2009_v45, %v4688_v19  ;;  %vm2016_vm0 = vweird.f32 %v4837_v59 }
 0x2b3   :  { %2852 = vmatmul.f32.gmra.mxu0 %v2675_v52  ;;  %3343 = vmatmul.msk.f32.gmra.mxu1 %vm2751_vm5, %v2676_v46  ;;  %v4958_v61 = vpop.eup %3529  ;;  %v2020_v52 = vand.u32 2147483647, %v4837_v59  ;;  %vm4975_vm2 = vmor %vm2016_vm0, %vm2017_vm14  ;;  %v2034_v60 = vsel %vm4971_vm1, %v4866_v62, %v2030_v15  ;;  %v2059_v19 = vmul.f32 %v4911_v26, %v2058_v18  ;;  %v2044_v59 = vmul.f32 %v4916_v51, %v2043_v53  ;;  %v4991_v8 = vpop.f32.mrf.mxu2 }
 0x2b4   :  { %v2019_v31 = vsel %vm4975_vm2, %v4873_v12, %v2015_v4  ;;  %v2072_v43 = vmul.f32 %v4958_v61, %v4921_v3  ;;  %3531 = vrcp.f32 %v4960_v16  ;;  %v2023_v42 = vor.u32 1.1754944e-38, %v2022_v6  ;;  %v4993_v62 = vpop.f32.mrf.mxu3 }
 0x2b5   :  { %v2038_v34 = vor.u32 1.1754944e-38, %v2037_v21  ;;  %vm2021_vm3 = vcmp.eq.f32.partialorder %v2020_v52, 8.507059e+37  ;;  %vm2036_vm4 = vcmp.eq.f32.partialorder %v2035_v47, 8.507059e+37  ;;  %v2060_v14 = vadd.f32 %v4911_v26, %v2059_v19 }
 0x2b6   :  { %v2024_v44 = vsel %vm2021_vm3, %v2023_v42, %v2019_v31  ;;  %vm2062_vm6 = vweird.f32 %v4911_v26  ;;  %v2045_v12 = vadd.f32 %v4916_v51, %v2044_v59  ;;  %vm2047_vm7 = vweird.f32 %v4916_v51 }
 0x2b7   :  { %v2039_v17 = vsel %vm2036_vm4, %v2038_v34, %v2034_v60  ;;  %v2073_v57 = vsub.f32 1.0, %v2072_v43  ;;  %v2052_v0 = vand.u32 2147483648, %v4864_v7  ;;  %vm2061_vm8 = vweird.f32 %v4854_v25 }
 0x2b8   :  { %v2065_v41 = vand.u32 2147483647, %v4854_v25  ;;  %v2067_v11 = vand.u32 2147483648, %v4854_v25  ;;  %v2679_v45 = vmul.f32 %v2024_v44, %v4739_v22  ;;  %v2680_v24 = vmul.f32 %v2039_v17, %v4720_v63  ;;  %vm5007_vm10 = vmor %vm2061_vm8, %vm2062_vm6 }
 0x2b9   :  { %vm2046_vm9 = vweird.f32 %v4864_v7  ;;  %v2050_v15 = vand.u32 2147483647, %v4864_v7  ;;  %v2064_v22 = vsel %vm5007_vm10, %v4911_v26, %v2060_v14  ;;  %v2074_v7 = vmul.f32 %v4958_v61, %v2073_v57 }
 0x2ba   :  { %v3532_v4 = vpop.eup %3531  ;;  %vm5011_vm11 = vmor %vm2046_vm9, %vm2047_vm7  ;;  %v2053_v47 = vor.u32 1.1754944e-38, %v2052_v0  ;;  %vm2066_vm12 = vcmp.eq.f32.partialorder %v2065_v41, 8.507059e+37  ;;  %v2068_v21 = vor.u32 1.1754944e-38, %v2067_v11  ;;  %vm2076_vm14 = vweird.f32 %v4921_v3 }
 0x2bb   :  { %2855 = vmatmul.f32.gmra.mxu0 %v2677_v35  ;;  %3344 = vmatmul.msk.f32.gmra.mxu1 %vm2751_vm5, %v2678_v55  ;;  %v2049_v25 = vsel %vm5011_vm11, %v4916_v51, %v2045_v12  ;;  %vm2051_vm13 = vcmp.eq.f32.partialorder %v2050_v15, 8.507059e+37  ;;  %vm2077_vm15 = vweird.f32 %v4958_v61  ;;  %v2087_v26 = vmul.f32 %v3532_v4, %v4960_v16  ;;  %v5030_v51 = vpop.f32.mrf.mxu2 }
 0x2bc   :  { %v2069_v55 = vsel %vm2066_vm12, %v2068_v21, %v2064_v22  ;;  %v2082_v52 = vand.u32 2147483648, %v4921_v3  ;;  %v2075_v46 = vadd.f32 %v4958_v61, %v2074_v7  ;;  %v2080_v28 = vand.u32 2147483647, %v4921_v3  ;;  %v1574_v60 = vpop.f32.mrf.mxu3  ;;  %vm2078_vm0 = vmor %vm2076_vm14, %vm2077_vm15 }
 0x2bd   :  { %v2682_v31 = vmul.f32 %v2069_v55, %v4747_v58  ;;  %v2088_v59 = vsub.f32 1.0, %v2087_v26  ;;  %v2097_v3 = vand.u32 2147483648, %v4960_v16  ;;  %vm2091_vm2 = vweird.f32 %v4960_v16 }
 0x2be   :  { %v2083_v42 = vor.u32 1.1754944e-38, %v2082_v52  ;;  %v2079_v34 = vsel %vm2078_vm0, %v4958_v61, %v2075_v46  ;;  %vm2081_vm1 = vcmp.eq.f32.partialorder %v2080_v28, 8.507059e+37  ;;  %vm2092_vm3 = vweird.f32 %v3532_v4 }
 0x2bf   :  { %v2089_v44 = vmul.f32 %v3532_v4, %v2088_v59  ;;  %v2095_v57 = vand.u32 2147483647, %v4960_v16  ;;  %v2098_v0 = vor.u32 1.1754944e-38, %v2097_v3  ;;  %vm2093_vm4 = vmor %vm2091_vm2, %vm2092_vm3 }
 0x2c0   :  { %v2084_v17 = vsel %vm2081_vm1, %v2083_v42, %v2079_v34 }
 0x2c1   :  { %v2090_v58 = vadd.f32 %v3532_v4, %v2089_v44  ;;  %vm2096_vm6 = vcmp.eq.f32.partialorder %v2095_v57, 8.507059e+37 }
 0x2c3   :  { %2858 = vmatmul.f32.gmra.mxu0 %v2679_v45  ;;  %3345 = vmatmul.msk.f32.gmra.mxu1 %vm2751_vm5, %v2680_v24  ;;  %v5040_v14 = vpop.f32.mrf.mxu2  ;;  %v2094_v41 = vsel %vm2093_vm4, %v3532_v4, %v2090_v58 }
 0x2c4   :  { %v1577_v12 = vpop.f32.mrf.mxu3  ;;  %v2099_v45 = vsel %vm2096_vm6, %v2098_v0, %v2094_v41 }
 0x2c5   :  { %v2684_v15 = vmul.f32 %v2099_v45, %v4869_v32 }
 0x2c6   :  { %v1292_v53 = vpop.f32.mrf.mxu1  ;;  %v1197_v16 = vpop.f32.mrf.mxu0 }
 0x2c7   :  { %v1569_v63 = vadd.f32 %v1568_v56, %v1292_v53  ;;  %v2054_v56 = vsel %vm2051_vm13, %v2053_v47, %v2049_v25  ;;  %v1474_v4 = vadd.f32 %v4944_v10, %v1197_v16 }
 0x2c8   :  { %v2681_v19 = vmul.f32 %v2054_v56, %v4761_v5  ;;  %v2683_v5 = vmul.f32 %v2084_v17, %v4857_v23 }
 0x2c9   :  { %v5027_v35 = vadd.f32 %v4548_v33, %v1569_v63  ;;  %v5058_v32 = vadd.f32 %v4546_v1, %v1474_v4 }
 0x2cb   :  { %v3304_v43 = vmul.f32 -1.442695, %v5027_v35  ;;  %2861 = vmatmul.f32.gmra.mxu0 %v2681_v19  ;;  %3346 = vmatmul.msk.f32.gmra.mxu1 %vm2751_vm5, %v2682_v31  ;;  %v5048_v18 = vpop.f32.mrf.mxu2  ;;  %v3303_v21 = vmul.f32 -1.442695, %v5058_v32 }
 0x2cc   :  { %v5050_v53 = vpop.f32.mrf.mxu3 }
 0x2cd   :  { %3533 = vpow2.f32 %v3304_v43 }
 0x2ce   :  { %v1295_v11 = vpop.f32.mrf.mxu1  ;;  %v1200_v44 = vpop.f32.mrf.mxu0 }
 0x2cf   :  { %v1572_v23 = vadd.f32 %v4993_v62, %v1295_v11  ;;  %v1477_v0 = vadd.f32 %v4991_v8, %v1200_v44 }
 0x2d1   :  { %v5053_v6 = vadd.f32 %v4548_v33, %v1572_v23 }
 0x2d3   :  { %2864 = vmatmul.f32.gmra.mxu0 %v2683_v5  ;;  %v3534_v61 = vpop.eup %3533  ;;  %3347 = vmatmul.msk.f32.gmra.mxu1 %vm2751_vm5, %v2684_v15  ;;  %v3306_v63 = vmul.f32 -1.442695, %v5053_v6  ;;  %v5060_v25 = vpop.f32.mrf.mxu2 }
 0x2d4   :  { %v1854_v24 = vadd.f32 1.0, %v3534_v61  ;;  %v5062_v47 = vpop.f32.mrf.mxu3 }
 0x2d6   :  { %3535 = vrcp.f32 %v1854_v24  ;;  %v1298_v7 = vpop.f32.mrf.mxu1  ;;  %vm2121_vm7 = vweird.f32 %v1854_v24  ;;  %v2127_v43 = vand.u32 2147483648, %v1854_v24  ;;  %v2125_v34 = vand.u32 2147483647, %v1854_v24 }
 0x2d7   :  { %3537 = vpow2.f32 %v3306_v63  ;;  %v1575_v56 = vadd.f32 %v1574_v60, %v1298_v7  ;;  %v1203_v7 = vpop.f32.mrf.mxu0 }
 0x2d8   :  { %3539 = vpow2.f32 %v3303_v21  ;;  %v2128_v58 = vor.u32 1.1754944e-38, %v2127_v43  ;;  %vm2126_vm10 = vcmp.eq.f32.partialorder %v2125_v34, 8.507059e+37  ;;  %v1480_v44 = vadd.f32 %v5030_v51, %v1203_v7 }
 0x2d9   :  { %v5066_v52 = vadd.f32 %v4548_v33, %v1575_v56 }
 0x2db   :  { %v1491_v28 = vpop.f32.mrf.mxu2  ;;  %v3308_v59 = vmul.f32 -1.442695, %v5066_v52 }
 0x2dc   :  { %v3536_v22 = vpop.eup %3535  ;;  %v1586_v31 = vpop.f32.mrf.mxu3  ;;  %v1492_v4 = vadd.f32 %v1491_v28, %v4261_v38 }
 0x2dd   :  { %v2117_v62 = vmul.f32 %v3536_v22, %v1854_v24  ;;  %v3538_v55 = vpop.eup %3537  ;;  %vm2122_vm8 = vweird.f32 %v3536_v22  ;;  %v1587_v5 = vadd.f32 %v1586_v31, %v4259_v9 }
 0x2de   :  { %v5068_v46 = vadd.f32 1.0, %v3538_v55  ;;  %v3540_v42 = vpop.eup %3539  ;;  %v1301_v60 = vpop.f32.mrf.mxu1  ;;  %vm2123_vm9 = vmor %vm2121_vm7, %vm2122_vm8  ;;  %v5097_v31 = vadd.f32 %v4546_v1, %v1492_v4 }
 0x2df   :  { %v2118_v26 = vsub.f32 1.0, %v2117_v62  ;;  %v1853_v17 = vadd.f32 1.0, %v3540_v42  ;;  %v1578_v57 = vadd.f32 %v1577_v12, %v1301_v60  ;;  %v5075_v11 = vadd.f32 %v4548_v33, %v1587_v5 }
 0x2e0   :  { %3541 = vrcp.f32 %v5068_v46  ;;  %v5083_v12 = vadd.f32 %v4546_v1, %v1477_v0  ;;  %vm2151_vm13 = vweird.f32 %v5068_v46  ;;  %6292 = vst [vmem:[#allocation16_spill] sm:$0xff] %v5097_v31  ;;  %v2157_v43 = vand.u32 2147483648, %v5068_v46 }
 0x2e1   :  { %v2119_v10 = vmul.f32 %v3536_v22, %v2118_v26  ;;  %3543 = vpow2.f32 %v3308_v59  ;;  %v5079_v15 = vadd.f32 %v4548_v33, %v1578_v57  ;;  %vm2106_vm11 = vweird.f32 %v1853_v17 }
 0x2e2   :  { %3545 = vrcp.f32 %v1853_v17  ;;  %v3305_v56 = vmul.f32 -1.442695, %v5083_v12  ;;  %v2112_v38 = vand.u32 2147483648, %v1853_v17  ;;  %v2158_v5 = vor.u32 1.1754944e-38, %v2157_v43 }
 0x2e3   :  { %v2120_v19 = vadd.f32 %v3536_v22, %v2119_v10  ;;  %v1494_v24 = vpop.f32.mrf.mxu2  ;;  %v3310_v26 = vmul.f32 -1.442695, %v5079_v15  ;;  %v2110_v10 = vand.u32 2147483647, %v1853_v17 }
 0x2e4   :  { %v1589_v9 = vpop.f32.mrf.mxu3  ;;  %3547 = vpow2.f32 %v3305_v56 }
 0x2e5   :  { %v2124_v3 = vsel %vm2123_vm9, %v3536_v22, %v2120_v19  ;;  %v3316_v22 = vmul.f32 -1.442695, %v5075_v11  ;;  %v1590_v62 = vadd.f32 %v1589_v9, %v4289_v49  ;;  %v2155_v49 = vand.u32 2147483647, %v5068_v46 }
 0x2e6   :  { %v2129_v61 = vsel %vm2126_vm10, %v2128_v58, %v2124_v3  ;;  %v3542_v41 = vpop.eup %3541  ;;  %v2113_v3 = vor.u32 1.1754944e-38, %v2112_v38  ;;  %vm2111_vm1 = vcmp.eq.f32.partialorder %v2110_v10, 8.507059e+37 }
 0x2e7   :  { %v2686_v45 = vmul.f32 %v2129_v61, %v5027_v35  ;;  %v3544_v23 = vpop.eup %3543  ;;  %v2147_v8 = vmul.f32 %v3542_v41, %v5068_v46  ;;  %v1495_v35 = vadd.f32 %v1494_v24, %v4296_v37  ;;  %vm2152_vm14 = vweird.f32 %v3542_v41 }
 0x2e8   :  { %v3546_v16 = vpop.eup %3545  ;;  %v5090_v21 = vadd.f32 1.0, %v3544_v23  ;;  %3549 = vpow2.f32 %v3316_v22  ;;  %v5104_v42 = vadd.f32 %v4548_v33, %v1590_v62  ;;  %vm2153_vm0 = vmor %vm2151_vm13, %vm2152_vm14  ;;  %vm2156_vm2 = vcmp.eq.f32.partialorder %v2155_v49, 8.507059e+37 }
 0x2e9   :  { %3348 = vmatmul.msk.f32.gmra.mxu1 %vm2751_vm5, %v2686_v45  ;;  %v2102_v63 = vmul.f32 %v3546_v16, %v1853_v17  ;;  %v2148_v19 = vsub.f32 1.0, %v2147_v8  ;;  %vm2107_vm12 = vweird.f32 %v3546_v16  ;;  %v5100_v59 = vadd.f32 %v4546_v1, %v1495_v35 }
 0x2ea   :  { %3551 = vrcp.f32 %v5090_v21  ;;  %vm2108_vm15 = vmor %vm2106_vm11, %vm2107_vm12  ;;  %v3548_v61 = vpop.eup %3547  ;;  %v3315_v17 = vmul.f32 -1.442695, %v5097_v31  ;;  %v3318_v35 = vmul.f32 -1.442695, %v5104_v42  ;;  %vm2181_vm3 = vweird.f32 %v5090_v21 }
 0x2eb   :  { %v2103_v55 = vsub.f32 1.0, %v2102_v63  ;;  %v2149_v28 = vmul.f32 %v3542_v41, %v2148_v19  ;;  %6293 = vst [vmem:[#allocation17_spill] sm:$0xff] %v5100_v59  ;;  %3553 = vpow2.f32 %v3310_v26  ;;  %v5114_v9 = vadd.f32 1.0, %v3548_v61  ;;  %v1497_v7 = vpop.f32.mrf.mxu2 }
 0x2ec   :  { %v1592_v58 = vpop.f32.mrf.mxu3  ;;  %v3317_v46 = vmul.f32 -1.442695, %v5100_v59  ;;  %v1498_v19 = vadd.f32 %v1497_v7, %v4340_v20  ;;  %v2185_v20 = vand.u32 2147483647, %v5090_v21 }
 0x2ed   :  { %v2104_v37 = vmul.f32 %v3546_v16, %v2103_v55  ;;  %v2150_v60 = vadd.f32 %v3542_v41, %v2149_v28  ;;  %v1593_v4 = vadd.f32 %v1592_v58, %v4324_v30  ;;  %3555 = vrcp.f32 %v5114_v9 }
 0x2ee   :  { %v3550_v8 = vpop.eup %3549  ;;  %3557 = vpow2.f32 %v3315_v17  ;;  %vm2136_vm6 = vweird.f32 %v5114_v9  ;;  %vm2186_vm9 = vcmp.eq.f32.partialorder %v2185_v20, 8.507059e+37 }
 0x2ef   :  { %v2105_v34 = vadd.f32 %v3546_v16, %v2104_v37  ;;  %v2154_v0 = vsel %vm2153_vm0, %v3542_v41, %v2150_v60  ;;  %v5120_v41 = vadd.f32 %v4546_v1, %v1480_v44  ;;  %v5128_v63 = vadd.f32 1.0, %v3550_v8 }
 0x2f0   :  { %v2159_v24 = vsel %vm2156_vm2, %v2158_v5, %v2154_v0  ;;  %v5122_v22 = vpop.eup %3551  ;;  %3559 = vpow2.f32 %v3317_v46  ;;  %v5131_v30 = vadd.f32 %v4548_v33, %v1593_v4 }
 0x2f1   :  { %v2109_v57 = vsel %vm2108_vm15, %v3546_v16, %v2105_v34  ;;  %v2688_v51 = vmul.f32 %v2159_v24, %v5053_v6  ;;  %v1206_v16 = vpop.f32.mrf.mxu0  ;;  %v3307_v62 = vmul.f32 -1.442695, %v5120_v41  ;;  %3561 = vpow2.f32 %v3318_v35 }
 0x2f2   :  { %v2114_v45 = vsel %vm2111_vm1, %v2113_v3, %v2109_v57  ;;  %v1483_v6 = vadd.f32 %v5040_v14, %v1206_v16  ;;  %v2177_v56 = vmul.f32 %v5122_v22, %v5090_v21  ;;  %v3320_v38 = vmul.f32 -1.442695, %v5131_v30 }
 0x2f3   :  { %v2685_v23 = vmul.f32 %v2114_v45, %v5058_v32  ;;  %3349 = vmatmul.msk.f32.gmra.mxu1 %vm2751_vm5, %v2688_v51  ;;  %v3554_v32 = vpop.eup %3553  ;;  %3563 = vpow2.f32 %v3307_v62  ;;  %v2187_v34 = vand.u32 2147483648, %v5090_v21  ;;  %vm2182_vm4 = vweird.f32 %v5122_v22 }
 0x2f4   :  { %v5134_v26 = vadd.f32 1.0, %v3554_v32  ;;  %v3556_v55 = vpop.eup %3555  ;;  %v2178_v10 = vsub.f32 1.0, %v2177_v56  ;;  %v5139_v14 = vadd.f32 %v4546_v1, %v1483_v6  ;;  %3565 = vrcp.f32 %v5128_v63  ;;  %v1595_v37 = vpop.f32.mrf.mxu3  ;;  %vm2183_vm8 = vmor %vm2181_vm3, %vm2182_vm4 }
 0x2f5   :  { %2867 = vmatmul.f32.gmra.mxu0 %v2685_v23  ;;  %v2132_v28 = vmul.f32 %v3556_v55, %v5114_v9  ;;  %v3558_v49 = vpop.eup %3557  ;;  %v1596_v58 = vadd.f32 %v1595_v37, %v4354_v54  ;;  %v2142_v57 = vand.u32 2147483648, %v5114_v9  ;;  %vm2137_vm7 = vweird.f32 %v3556_v55  ;;  %v1500_v6 = vpop.f32.mrf.mxu2 }
 0x2f6   :  { %3567 = vrcp.f32 %v5134_v26  ;;  %v2179_v43 = vmul.f32 %v5122_v22, %v2178_v10  ;;  %v3560_v60 = vpop.eup %3559  ;;  %v3309_v3 = vmul.f32 -1.442695, %v5139_v14  ;;  %v2140_v24 = vand.u32 2147483647, %v5114_v9  ;;  %vm2138_vm10 = vmor %vm2136_vm6, %vm2137_vm7 }
 0x2f7   :  { %v2133_v44 = vsub.f32 1.0, %v2132_v28  ;;  %v3562_v5 = vpop.eup %3561  ;;  %v5157_v17 = vadd.f32 1.0, %v3558_v49  ;;  %v5160_v23 = vadd.f32 %v4546_v1, %v1498_v19  ;;  %v2188_v54 = vor.u32 1.1754944e-38, %v2187_v34 }
 0x2f8   :  { %v2180_v0 = vadd.f32 %v5122_v22, %v2179_v43  ;;  %3569 = vpow2.f32 %v3309_v3  ;;  %v5173_v35 = vadd.f32 1.0, %v3560_v60  ;;  %v5175_v32 = vadd.f32 1.0, %v3562_v5 }
 0x2f9   :  { %v3564_v61 = vpop.eup %3563  ;;  %v2134_v45 = vmul.f32 %v3556_v55, %v2133_v44  ;;  %6294 = vst [vmem:[#allocation18_spill] sm:$0xff] %v5160_v23  ;;  %3571 = vpow2.f32 %v3320_v38  ;;  %v2143_v21 = vor.u32 1.1754944e-38, %v2142_v57  ;;  %v5181_v7 = vadd.f32 %v4548_v33, %v1596_v58 }
 0x2fa   :  { %v5166_v51 = vpop.eup %3565  ;;  %v5168_v46 = vadd.f32 1.0, %v3564_v61  ;;  %v2184_v4 = vsel %vm2183_vm8, %v5122_v22, %v2180_v0  ;;  %6295 = vst [vmem:[#allocation19_spill] sm:$0xff] %v5173_v35  ;;  %vm2141_vm11 = vcmp.eq.f32.partialorder %v2140_v24, 8.507059e+37  ;;  %v1501_v9 = vadd.f32 %v1500_v6, %v4360_v40 }
 0x2fb   :  { %v2135_v8 = vadd.f32 %v3556_v55, %v2134_v45  ;;  %v2189_v62 = vsel %vm2186_vm9, %v2188_v54, %v2184_v4  ;;  %6296 = vst [vmem:[#allocation20_spill] sm:$0xff] %v5181_v7  ;;  %v2297_v38 = vmul.f32 %v5166_v51, %v5128_v63  ;;  %v3319_v49 = vmul.f32 -1.442695, %v5160_v23 }
 0x2fc   :  { %v5171_v16 = vpop.eup %3567  ;;  %3573 = vrcp.f32 %v5168_v46  ;;  %v2690_v10 = vmul.f32 %v2189_v62, %v5066_v52  ;;  %v3322_v52 = vmul.f32 -1.442695, %v5181_v7  ;;  %v1598_v34 = vpop.f32.mrf.mxu3  ;;  %v5203_v20 = vadd.f32 %v4546_v1, %v1501_v9 }
 0x2fd   :  { %v2139_v56 = vsel %vm2138_vm10, %v3556_v55, %v2135_v8  ;;  %3575 = vrcp.f32 %v5157_v17  ;;  %v2207_v28 = vmul.f32 %v5171_v16, %v5134_v26  ;;  %v2298_v60 = vsub.f32 1.0, %v2297_v38 }
 0x2fe   :  { %v2144_v22 = vsel %vm2141_vm11, %v2143_v21, %v2139_v56  ;;  %v3570_v19 = vpop.eup %3569  ;;  %3577 = vrcp.f32 %v5175_v32  ;;  %3350 = vmatmul.msk.f32.gmra.mxu1 %vm2751_vm5, %v2690_v10  ;;  %6297 = vst [vmem:[#allocation21_spill] sm:$0xff] %v5203_v20  ;;  %v2305_v58 = vand.u32 2147483647, %v5128_v63  ;;  %v1599_v0 = vadd.f32 %v1598_v34, %v4371_v27 }
 0x2ff   :  { %v2687_v37 = vmul.f32 %v2144_v22, %v5083_v12  ;;  %v3572_v55 = vpop.eup %3571  ;;  %v5195_v43 = vadd.f32 1.0, %v3570_v19  ;;  %3579 = vrcp.f32 %v5173_v35  ;;  %v2208_v40 = vsub.f32 1.0, %v2207_v28 }
 0x300   :  { %v5200_v44 = vadd.f32 1.0, %v3572_v55  ;;  %v2170_v61 = vand.u32 2147483647, %v5168_v46  ;;  %v2172_v45 = vand.u32 2147483648, %v5168_v46  ;;  %vm2211_vm12 = vweird.f32 %v5134_v26 }
 0x301   :  { %2870 = vmatmul.f32.gmra.mxu0 %v2687_v37  ;;  %3581 = vrcp.f32 %v5195_v43  ;;  %v2209_v3 = vmul.f32 %v5171_v16, %v2208_v40  ;;  %vm2212_vm13 = vweird.f32 %v5171_v16  ;;  %v2299_v6 = vmul.f32 %v5166_v51, %v2298_v60 }
 0x302   :  { %v3574_v12 = vpop.eup %3573  ;;  %3583 = vpow2.f32 %v3319_v49  ;;  %v3321_v27 = vmul.f32 -1.442695, %v5203_v20  ;;  %v2217_v21 = vand.u32 2147483648, %v5134_v26  ;;  %vm2166_vm14 = vweird.f32 %v5168_v46  ;;  %vm5242_vm1 = vmor %vm2211_vm12, %vm2212_vm13 }
 0x303   :  { %v5206_v5 = vpop.eup %3575  ;;  %v2162_v57 = vmul.f32 %v3574_v12, %v5168_v46  ;;  %3585 = vpow2.f32 %v3322_v52  ;;  %v2210_v8 = vadd.f32 %v5171_v16, %v2209_v3  ;;  %vm2167_vm15 = vweird.f32 %v3574_v12 }
 0x304   :  { %v5213_v24 = vpop.eup %3577  ;;  %3587 = vrcp.f32 %v5200_v44  ;;  %v2215_v19 = vand.u32 2147483647, %v5134_v26  ;;  %v5231_v9 = vadd.f32 %v4548_v33, %v1599_v0  ;;  %vm5233_vm0 = vcmp.eq.f32.partialorder %v2170_v61, 8.507059e+37  ;;  %vm2168_vm4 = vmor %vm2166_vm14, %vm2167_vm15  ;;  %v1503_v61 = vpop.f32.mrf.mxu2 }
 0x305   :  { %v2163_v54 = vsub.f32 1.0, %v2162_v57  ;;  %v5218_v4 = vpop.eup %3579  ;;  %v5228_v38 = vmul.f32 %v5213_v24, %v5175_v32  ;;  %vm2302_vm2 = vweird.f32 %v5166_v51  ;;  %v2173_v40 = vor.u32 1.1754944e-38, %v2172_v45 }
 0x306   :  { %6298 = vst [vmem:[#allocation22_spill] sm:$0xff] %v5231_v9  ;;  %vm2196_vm3 = vweird.f32 %v5195_v43  ;;  %v2214_v34 = vsel %vm5242_vm1, %v5171_v16, %v2210_v8  ;;  %v2200_v3 = vand.u32 2147483647, %v5195_v43  ;;  %v2202_v57 = vand.u32 2147483648, %v5195_v43 }
 0x307   :  { %v3582_v22 = vpop.eup %3581  ;;  %v2164_v10 = vmul.f32 %v3574_v12, %v2163_v54  ;;  %v2218_v0 = vor.u32 1.1754944e-38, %v2217_v21  ;;  %vm2216_vm7 = vcmp.eq.f32.partialorder %v2215_v19, 8.507059e+37  ;;  %v2300_v55 = vadd.f32 %v5166_v51, %v2299_v6 }
 0x308   :  { %v2192_v28 = vmul.f32 %v3582_v22, %v5195_v43  ;;  %v5246_v49 = vpop.eup %3583  ;;  %vm2197_vm6 = vweird.f32 %v3582_v22  ;;  %3589 = vpow2.f32 %v3321_v27  ;;  %v2328_v19 = vsub.f32 1.0, %v5228_v38 }
 0x309   :  { %v2165_v52 = vadd.f32 %v3574_v12, %v2164_v10  ;;  %v3586_v60 = vpop.eup %3585  ;;  %v2219_v46 = vsel %vm2216_vm7, %v2218_v0, %v2214_v34  ;;  %vm2198_vm8 = vmor %vm2196_vm3, %vm2197_vm6  ;;  %vm2201_vm9 = vcmp.eq.f32.partialorder %v2200_v3, 8.507059e+37  ;;  %vm2301_vm10 = vweird.f32 %v5128_v63  ;;  %v1601_v3 = vpop.f32.mrf.mxu3 }
 0x30a   :  { %v2193_v26 = vsub.f32 1.0, %v2192_v28  ;;  %v5258_v10 = vpop.eup %3587  ;;  %vm5305_vm11 = vmor %vm2301_vm10, %vm2302_vm2  ;;  %vm5311_vm12 = vcmp.eq.f32.partialorder %v2305_v58, 8.507059e+37  ;;  %vm2331_vm13 = vweird.f32 %v5175_v32  ;;  %vm2332_vm15 = vweird.f32 %v5213_v24 }
 0x30b   :  { %v2169_v54 = vsel %vm2168_vm4, %v3574_v12, %v2165_v52  ;;  %v2692_v12 = vmul.f32 %v2219_v46, %v5079_v15  ;;  %v2357_v27 = vmul.f32 %v5258_v10, %v5200_v44  ;;  %v2329_v46 = vmul.f32 %v5213_v24, %v2328_v19 }
 0x30c   :  { %v2174_v16 = vsel %vm5233_vm0, %v2173_v40, %v2169_v54  ;;  %v2194_v8 = vmul.f32 %v3582_v22, %v2193_v26  ;;  %vm5356_vm0 = vmor %vm2331_vm13, %vm2332_vm15  ;;  %vm2361_vm1 = vweird.f32 %v5200_v44  ;;  %vm2362_vm2 = vweird.f32 %v5258_v10 }
 0x30d   :  { %v2689_v21 = vmul.f32 %v2174_v16, %v5120_v41  ;;  %3351 = vmatmul.msk.f32.gmra.mxu1 %vm2751_vm5, %v2692_v12  ;;  %v5301_v16 = vld [vmem:[%s6238_s5] ss:$0 sm:$0xff]  ;;  %v2358_v12 = vsub.f32 1.0, %v2357_v27  ;;  %vm5411_vm3 = vmor %vm2361_vm1, %vm2362_vm2  ;;  %v6321_v31 = vand.u32 2147483647, %v5200_v44 }
 0x30f   :  { %2873 = vmatmul.f32.gmra.mxu0 %v2689_v21  ;;  %v2304_v21 = vsel %vm5305_vm11, %v5166_v51, %v2300_v55  ;;  %v5330_v51 = vadd.f32 1.0, %v5246_v49  ;;  %v2367_v49 = vand.u32 2147483648, %v5200_v44  ;;  %vm5472_vm11 = vcmp.eq.f32.partialorder %v6321_v31, 8.507059e+37 }
 0x310   :  { %v1209_v62 = vpop.f32.mrf.mxu0  ;;  %v1304_v56 = vpop.f32.mrf.mxu1 }
 0x311   :  { %v1486_v45 = vadd.f32 %v5048_v18, %v1209_v62  ;;  %v1581_v28 = vadd.f32 %v5050_v53, %v1304_v56  ;;  %v3324_v18 = vmul.f32 -1.442695, %v5231_v9  ;;  %v2195_v62 = vadd.f32 %v3582_v22, %v2194_v8  ;;  %v1604_v20 = vpop.f32.mrf.mxu3 }
 0x312   :  { %v2203_v53 = vor.u32 1.1754944e-38, %v2202_v57 }
 0x313   :  { %v5269_v52 = vadd.f32 %v4546_v1, %v1486_v45  ;;  %v5276_v15 = vadd.f32 %v4548_v33, %v1581_v28  ;;  %v2199_v56 = vsel %vm2198_vm8, %v3582_v22, %v2195_v62  ;;  %v5293_v22 = vpop.eup %3589  ;;  %v1504_v28 = vadd.f32 %v1503_v61, %v4373_v29 }
 0x314   :  { %v2204_v34 = vsel %vm2201_vm9, %v2203_v53, %v2199_v56  ;;  %v5320_v62 = vadd.f32 1.0, %v3586_v60  ;;  %v2337_v61 = vand.u32 2147483648, %v5175_v32 }
 0x315   :  { %v3311_v38 = vmul.f32 -1.442695, %v5269_v52  ;;  %v3312_v43 = vmul.f32 -1.442695, %v5276_v15  ;;  %v2691_v0 = vmul.f32 %v2204_v34, %v5139_v14  ;;  %v5338_v53 = vadd.f32 %v4546_v1, %v1504_v28 }
 0x316   :  { %v5383_v28 = vor.u32 1.1754944e-38, %v2367_v49 }
 0x317   :  { %3591 = vpow2.f32 %v3311_v38  ;;  %2876 = vmatmul.f32.gmra.mxu0 %v2691_v0  ;;  %6309 = vst [vmem:[#allocation23_spill] sm:$0xff] %v5338_v53 }
 0x318   :  { %v1212_v37 = vpop.f32.mrf.mxu0  ;;  %v1307_v40 = vpop.f32.mrf.mxu1  ;;  %3593 = vpow2.f32 %v3312_v43 }
 0x319   :  { %v1489_v41 = vadd.f32 %v5060_v25, %v1212_v37  ;;  %v1584_v6 = vadd.f32 %v5062_v47, %v1307_v40  ;;  %v2307_v25 = vand.u32 2147483648, %v5128_v63  ;;  %v2335_v47 = vand.u32 2147483647, %v5175_v32  ;;  %v1506_v37 = vpop.f32.mrf.mxu2 }
 0x31a   :  { %3595 = vpow2.f32 %v3324_v18  ;;  %v1602_v63 = vadd.f32 %v1601_v3, %v4387_v39  ;;  %v2330_v39 = vadd.f32 %v5213_v24, %v2329_v46  ;;  %v1507_v27 = vadd.f32 %v1506_v37, %v4389_v36 }
 0x31b   :  { %v5285_v26 = vadd.f32 %v4546_v1, %v1489_v41  ;;  %v5288_v57 = vadd.f32 %v4548_v33, %v1584_v6  ;;  %v2308_v40 = vor.u32 1.1754944e-38, %v2307_v25  ;;  %vm5324_vm14 = vcmp.eq.f32.partialorder %v2335_v47, 8.507059e+37 }
 0x31c   :  { %v2359_v6 = vmul.f32 %v5258_v10, %v2358_v12  ;;  %v5345_v38 = vadd.f32 %v4548_v33, %v1602_v63  ;;  %v2338_v36 = vor.u32 1.1754944e-38, %v2337_v61  ;;  %v5372_v32 = vadd.f32 %v4546_v1, %v1507_v27 }
 0x31d   :  { %v3313_v54 = vmul.f32 -1.442695, %v5285_v26  ;;  %v3314_v45 = vmul.f32 -1.442695, %v5288_v57  ;;  %v3592_v55 = vpop.eup %3591  ;;  %v2309_v18 = vsel %vm5311_vm12, %v2308_v40, %v2304_v21  ;;  %v5389_v63 = vadd.f32 1.0, %v5293_v22 }
 0x31e   :  { %v3594_v41 = vpop.eup %3593  ;;  %6310 = vst [vmem:[#allocation24_spill] sm:$0xff] %v5345_v38  ;;  %v5347_v34 = vadd.f32 1.0, %v3592_v55  ;;  %v5352_v3 = vmul.f32 %v2309_v18, %v5075_v11  ;;  %v3323_v11 = vmul.f32 -1.442695, %v5338_v53  ;;  %v3326_v21 = vmul.f32 -1.442695, %v5345_v38 }
 0x31f   :  { %3597 = vpow2.f32 %v3313_v54  ;;  %v5349_v43 = vadd.f32 1.0, %v3594_v41  ;;  %6314 = vst [vmem:[#allocation26_spill] sm:$0xff] %v5372_v32  ;;  %v5416_v29 = vmul.f32 -1.442695, %v5372_v32 }
 0x320   :  { %3599 = vpow2.f32 %v3314_v45  ;;  %v2847_v58 = vpop.f32.mrf.mxu0  ;;  %v2942_v19 = vpop.f32.mrf.mxu1  ;;  %6311 = vst [vmem:[#allocation25_spill] sm:$0xff] %v5352_v3  ;;  %v2334_v45 = vsel %vm5356_vm0, %v5213_v24, %v2330_v39  ;;  %v5380_v24 = vadd.f32 %v5258_v10, %v2359_v6  ;;  %vm2226_vm6 = vweird.f32 %v5347_v34 }
 0x321   :  { %v2848_v60 = vadd.f32 %v5301_v16, %v2847_v58  ;;  %3601 = vrcp.f32 %v5320_v62  ;;  %v3596_v56 = vpop.eup %3595  ;;  %v5400_v61 = vsel %vm5324_vm14, %v2338_v36, %v2334_v45  ;;  %v2245_v39 = vand.u32 2147483647, %v5349_v43 }
 0x322   :  { %3603 = vrcp.f32 %v5330_v51  ;;  %v5391_v58 = vadd.f32 1.0, %v3596_v56  ;;  %v2247_v41 = vand.u32 2147483648, %v5349_v43  ;;  %v5433_v36 = vmul.f32 %v5218_v4, %v5173_v35 }
 0x323   :  { %v2943_v25 = vadd.f32 %v2942_v19, %v2848_v60  ;;  %3605 = vrcp.f32 %v5347_v34  ;;  %v5396_v19 = vmul.f32 %v5206_v5, %v5157_v17  ;;  %vm2241_vm4 = vweird.f32 %v5349_v43 }
 0x324   :  { %3607 = vrcp.f32 %v5349_v43  ;;  %v2230_v45 = vand.u32 2147483647, %v5347_v34  ;;  %vm5446_vm7 = vcmp.eq.f32.partialorder %v2245_v39, 8.507059e+37  ;;  %v2232_v60 = vand.u32 2147483648, %v5347_v34 }
 0x325   :  { %v3598_v47 = vpop.eup %3597  ;;  %3125 = vst [vmem:[%s6239_s6] sm:$0xff] %v2943_v25  ;;  %v2313_v35 = vsub.f32 1.0, %v5433_v36 }
 0x326   :  { %v3600_v54 = vpop.eup %3599  ;;  %v5375_v14 = vadd.f32 1.0, %v3598_v47  ;;  %vm5464_vm10 = vcmp.eq.f32.partialorder %v2230_v45, 8.507059e+37  ;;  %v2233_v1 = vor.u32 1.1754944e-38, %v2232_v60 }
 0x327   :  { %v5377_v46 = vadd.f32 1.0, %v3600_v54  ;;  %v5386_v40 = vpop.eup %3601 }
 0x328   :  { %v2850_v12 = vpop.f32.mrf.mxu0  ;;  %v2945_v37 = vpop.f32.mrf.mxu1  ;;  %3609 = vrcp.f32 %v5375_v14  ;;  %v5426_v27 = vmul.f32 %v5386_v40, %v5320_v62  ;;  %v2260_v44 = vand.u32 2147483647, %v5375_v14  ;;  %vm2256_vm0 = vweird.f32 %v5375_v14 }
 0x329   :  { %3611 = vrcp.f32 %v5377_v46  ;;  %v2851_v55 = vadd.f32 %v5301_v16, %v2850_v12  ;;  %v5405_v22 = vpop.eup %3603  ;;  %v2277_v8 = vand.u32 2147483648, %v5377_v46  ;;  %vm2271_vm1 = vweird.f32 %v5377_v46 }
 0x32a   :  { %3613 = vpow2.f32 %v3323_v11  ;;  %v3606_v6 = vpop.eup %3605 }
 0x32b   :  { %3615 = vpow2.f32 %v3326_v21  ;;  %v2946_v56 = vadd.f32 %v2945_v37, %v2851_v55  ;;  %v3608_v25 = vpop.eup %3607  ;;  %v2222_v47 = vmul.f32 %v3606_v6, %v5347_v34  ;;  %v5444_v21 = vpop.f32.mrf.mxu2  ;;  %v2248_v37 = vor.u32 1.1754944e-38, %v2247_v41 }
 0x32c   :  { %3617 = vrcp.f32 %v5391_v58  ;;  %v2237_v54 = vmul.f32 %v3608_v25, %v5349_v43  ;;  %vm2227_vm8 = vweird.f32 %v3606_v6  ;;  %vm2242_vm9 = vweird.f32 %v3608_v25 }
 0x32d   :  { %3127 = vst [vmem:[%s6239_s6 + $0x8] sm:$0xff] %v2946_v56  ;;  %v2223_v55 = vsub.f32 1.0, %v2222_v47  ;;  %v2275_v56 = vand.u32 2147483647, %v5377_v46  ;;  %vm2228_vm12 = vmor %vm2226_vm6, %vm2227_vm8  ;;  %v2278_v12 = vor.u32 1.1754944e-38, %v2277_v8  ;;  %vm2261_vm6 = vcmp.eq.f32.partialorder %v2260_v44, 8.507059e+37 }
 0x32e   :  { %v5442_v11 = vpop.eup %3609  ;;  %v2238_v0 = vsub.f32 1.0, %v2237_v54  ;;  %vm2243_vm14 = vmor %vm2241_vm4, %vm2242_vm9  ;;  %3619 = vrcp.f32 %v5389_v63  ;;  %vm2392_vm8 = vweird.f32 %v5386_v40  ;;  %vm2286_vm9 = vweird.f32 %v5157_v17 }
 0x32f   :  { %v5451_v49 = vpop.eup %3611  ;;  %v2252_v38 = vmul.f32 %v5442_v11, %v5375_v14  ;;  %v2224_v9 = vmul.f32 %v3606_v6, %v2223_v55  ;;  %vm2257_vm13 = vweird.f32 %v5442_v11  ;;  %3621 = vpow2.f32 %v5416_v29 }
 0x330   :  { %v2853_v32 = vpop.f32.mrf.mxu0  ;;  %v2948_v53 = vpop.f32.mrf.mxu1  ;;  %v2267_v41 = vmul.f32 %v5451_v49, %v5377_v46  ;;  %v2239_v7 = vmul.f32 %v3608_v25, %v2238_v0  ;;  %vm2272_vm15 = vweird.f32 %v5451_v49  ;;  %vm5500_vm2 = vmor %vm2256_vm0, %vm2257_vm13  ;;  %v2292_v29 = vand.u32 2147483648, %v5157_v17 }
 0x331   :  { %v5457_v39 = vpop.eup %3613  ;;  %v2854_v47 = vadd.f32 %v5301_v16, %v2853_v32  ;;  %v2253_v59 = vsub.f32 1.0, %v2252_v38  ;;  %v2225_v13 = vadd.f32 %v3606_v6, %v2224_v9  ;;  %v2262_v38 = vand.u32 2147483648, %v5375_v14  ;;  %vm5505_vm4 = vmor %vm2271_vm1, %vm2272_vm15 }
 0x332   :  { %v5462_v54 = vpop.eup %3615  ;;  %v2268_v32 = vsub.f32 1.0, %v2267_v41  ;;  %v2240_v2 = vadd.f32 %v3608_v25, %v2239_v7  ;;  %v1605_v41 = vadd.f32 %v1604_v20, %v4396_v50  ;;  %v2388_v20 = vsub.f32 1.0, %v5426_v27 }
 0x333   :  { %v5468_v3 = vpop.eup %3617  ;;  %v2949_v55 = vadd.f32 %v2948_v53, %v2854_v47  ;;  %v2254_v0 = vmul.f32 %v5442_v11, %v2253_v59  ;;  %v2229_v7 = vsel %vm2228_vm12, %v3606_v6, %v2225_v13  ;;  %v2263_v6 = vor.u32 1.1754944e-38, %v2262_v38  ;;  %v1512_v45 = vpop.f32.mrf.mxu2 }
 0x334   :  { %v2269_v31 = vmul.f32 %v5451_v49, %v2268_v32  ;;  %v2244_v9 = vsel %vm2243_vm14, %v3608_v25, %v2240_v2  ;;  %v2234_v59 = vsel %vm5464_vm10, %v2233_v1, %v2229_v7  ;;  %v2395_v47 = vand.u32 2147483647, %v5320_v62  ;;  %v5561_v36 = vpop.eup %3619 }
 0x335   :  { %3129 = vst [vmem:[%s6239_s6 + $0x10] sm:$0xff] %v2949_v55  ;;  %v2255_v53 = vadd.f32 %v5442_v11, %v2254_v0  ;;  %v2249_v34 = vsel %vm5446_vm7, %v2248_v37, %v2244_v9  ;;  %v2693_v60 = vmul.f32 %v2234_v59, %v5269_v52  ;;  %v6328_v52 = vsub.f32 1.0, %v5396_v19  ;;  %v3622_v44 = vpop.eup %3621  ;;  %v6333_v59 = vld [vmem:[#allocation3_spill] sm:$0xff] }
 0x336   :  { %v2270_v43 = vadd.f32 %v5451_v49, %v2269_v31  ;;  %v2694_v13 = vmul.f32 %v2249_v34, %v5276_v15  ;;  %vm2276_vm7 = vcmp.eq.f32.partialorder %v2275_v56, 8.507059e+37  ;;  %v6329_v55 = vsel %vm5411_vm3, %v5258_v10, %v5380_v24 }
 0x337   :  { %v2259_v46 = vsel %vm5500_vm2, %v5442_v11, %v2255_v53  ;;  %v2284_v25 = vmul.f32 %v5206_v5, %v6328_v52  ;;  %2879 = vmatmul.f32.gmra.mxu0 %v2693_v60  ;;  %v5524_v11 = vmul.f32 %v5400_v61, %v5104_v42  ;;  %v2369_v50 = vsel %vm5472_vm11, %v5383_v28, %v6329_v55  ;;  %v6334_v60 = vld [vmem:[#allocation15_spill] sm:$0xff] }
 0x338   :  { %v2856_v23 = vpop.f32.mrf.mxu0  ;;  %v2951_v14 = vpop.f32.mrf.mxu1  ;;  %v2274_v15 = vsel %vm5505_vm4, %v5451_v49, %v2270_v43  ;;  %3352 = vmatmul.msk.f32.gmra.mxu1 %vm2751_vm5, %v2694_v13  ;;  %v2264_v19 = vsel %vm2261_vm6, %v2263_v6, %v2259_v46  ;;  %v6330_v56 = vand.u32 2147483648, %v5320_v62  ;;  %vm2287_vm3 = vweird.f32 %v5206_v5 }
 0x339   :  { %v2857_v37 = vadd.f32 %v5301_v16, %v2856_v23  ;;  %v1607_v49 = vpop.f32.mrf.mxu3  ;;  %v2279_v8 = vsel %vm2276_vm7, %v2278_v12, %v2274_v15  ;;  %v2695_v61 = vmul.f32 %v2264_v19, %v5285_v26  ;;  %v2285_v10 = vadd.f32 %v5206_v5, %v2284_v25  ;;  %vm5574_vm10 = vmor %vm2286_vm9, %vm2287_vm3 }
 0x33a   :  { %v5538_v42 = vor.u32 1.1754944e-38, %v6330_v56  ;;  %v5549_v24 = vadd.f32 1.0, %v5457_v39  ;;  %v5552_v28 = vadd.f32 %v4548_v33, %v1605_v41  ;;  %v2696_v18 = vmul.f32 %v2279_v8, %v5288_v57  ;;  %v6339_v8 = vld [vmem:[#allocation16_spill] sm:$0xff] }
 0x33b   :  { %v2952_v32 = vadd.f32 %v2951_v14, %v2857_v37  ;;  %v1510_v26 = vadd.f32 %v5444_v21, %v4402_v48  ;;  %v2290_v27 = vand.u32 2147483647, %v5157_v17  ;;  %v5564_v39 = vmul.f32 %v2369_v50, %v5131_v30  ;;  %v6335_v14 = vld [vmem:[#allocation4_spill] sm:$0xff] }
 0x33c   :  { %v2389_v0 = vmul.f32 %v5386_v40, %v2388_v20  ;;  %v2417_v57 = vmul.f32 %v5468_v3, %v5391_v58  ;;  %v5570_v38 = vadd.f32 1.0, %v5462_v54  ;;  %vm2391_vm11 = vweird.f32 %v5320_v62 }
 0x33d   :  { %3131 = vst [vmem:[%s6239_s6 + $0x18] sm:$0xff] %v2952_v32  ;;  %v2289_v17 = vsel %vm5574_vm10, %v5206_v5, %v2285_v10  ;;  %v2314_v21 = vmul.f32 %v5218_v4, %v2313_v35  ;;  %v2342_v54 = vmul.f32 %v5405_v22, %v5330_v51  ;;  %3623 = vrcp.f32 %v5549_v24  ;;  %v1515_v5 = vpop.f32.mrf.mxu2  ;;  %vm5643_vm2 = vmor %vm2391_vm11, %vm2392_vm8 }
 0x33e   :  { %v3328_v9 = vmul.f32 -1.442695, %v5552_v28  ;;  %v1608_v53 = vadd.f32 %v1607_v49, %v6333_v59  ;;  %v2293_v34 = vor.u32 1.1754944e-38, %v2292_v29  ;;  %v2425_v43 = vand.u32 2147483647, %v5391_v58 }
 0x33f   :  { %2882 = vmatmul.f32.gmra.mxu0 %v2695_v61  ;;  %v5592_v2 = vadd.f32 %v6334_v60, %v1510_v26  ;;  %vm2291_vm12 = vcmp.eq.f32.partialorder %v2290_v27, 8.507059e+37  ;;  %v5595_v1 = vadd.f32 %v5386_v40, %v2389_v0  ;;  %v2418_v23 = vsub.f32 1.0, %v2417_v57 }
 0x340   :  { %v2859_v31 = vpop.f32.mrf.mxu0  ;;  %v2954_v7 = vpop.f32.mrf.mxu1  ;;  %3353 = vmatmul.msk.f32.gmra.mxu1 %vm2751_vm5, %v2696_v18  ;;  %v1513_v46 = vadd.f32 %v1512_v45, %v6335_v14  ;;  %v2294_v6 = vsel %vm2291_vm12, %v2293_v34, %v2289_v17  ;;  %3625 = vrcp.f32 %v5570_v38  ;;  %v2315_v25 = vadd.f32 %v5218_v4, %v2314_v21  ;;  %v6336_v45 = vld [vmem:[#allocation19_spill] sm:$0xff] }
 0x341   :  { %v2860_v30 = vadd.f32 %v5301_v16, %v2859_v31  ;;  %v1610_v52 = vpop.f32.mrf.mxu3  ;;  %vm2317_vm13 = vweird.f32 %v5218_v4  ;;  %v2343_v15 = vsub.f32 1.0, %v2342_v54  ;;  %v5604_v12 = vadd.f32 1.0, %v3622_v44  ;;  %v6344_v31 = vld [vmem:[#allocation5_spill] sm:$0xff] }
 0x342   :  { %3627 = vpow2.f32 %v3328_v9  ;;  %v5607_v37 = vadd.f32 %v4548_v33, %v1608_v53  ;;  %v2322_v41 = vand.u32 2147483648, %v6336_v45  ;;  %vm5610_vm14 = vcmp.eq.f32.partialorder %v2395_v47, 8.507059e+37  ;;  %v6348_v53 = vld [vmem:[#allocation6_spill] sm:$0xff] }
 0x343   :  { %v2955_v13 = vadd.f32 %v2954_v7, %v2860_v30  ;;  %v3327_v49 = vmul.f32 -1.442695, %v5592_v2  ;;  %v2697_v32 = vmul.f32 %v2294_v6, %v6339_v8  ;;  %vm2316_vm15 = vweird.f32 %v6336_v45  ;;  %v5618_v50 = vpop.eup %3623 }
 0x344   :  { %v2320_v55 = vand.u32 2147483647, %v6336_v45  ;;  %v2419_v20 = vmul.f32 %v5468_v3, %v2418_v23  ;;  %vm2421_vm0 = vweird.f32 %v5391_v58  ;;  %v2427_v56 = vand.u32 2147483648, %v5391_v58  ;;  %vm5628_vm1 = vmor %vm2316_vm15, %vm2317_vm13 }
 0x345   :  { %3133 = vst [vmem:[%s6239_s6 + $0x20] sm:$0xff] %v2955_v13  ;;  %v5624_v47 = vadd.f32 %v6334_v60, %v1513_v46  ;;  %v2319_v29 = vsel %vm5628_vm1, %v5218_v4, %v2315_v25  ;;  %v2344_v26 = vmul.f32 %v5405_v22, %v2343_v15  ;;  %v2372_v27 = vmul.f32 %v5561_v36, %v5389_v63  ;;  %v6345_v4 = vld [vmem:[#allocation25_spill] sm:$0xff]  ;;  %v1518_v13 = vpop.f32.mrf.mxu2 }
 0x346   :  { %3629 = vrcp.f32 %v5604_v12  ;;  %v3330_v57 = vmul.f32 -1.442695, %v5607_v37  ;;  %v1611_v7 = vadd.f32 %v1610_v52, %v6344_v31  ;;  %v2323_v48 = vor.u32 1.1754944e-38, %v2322_v41  ;;  %v5652_v30 = vpop.eup %3625  ;;  %v6351_v52 = vld [vmem:[#allocation17_spill] sm:$0xff]  ;;  %v6354_v31 = vld [vmem:[#allocation7_spill] sm:$0xff] }
 0x347   :  { %2885 = vmatmul.f32.gmra.mxu0 %v2697_v32  ;;  %v2394_v62 = vsel %vm5643_vm2, %v5386_v40, %v5595_v1  ;;  %vm5658_vm4 = vcmp.eq.f32.partialorder %v2425_v43, 8.507059e+37  ;;  %3631 = vpow2.f32 %v3327_v49  ;;  %vm2321_vm6 = vcmp.eq.f32.partialorder %v2320_v55, 8.507059e+37 }
 0x348   :  { %v2862_v61 = vpop.f32.mrf.mxu0  ;;  %v2957_v10 = vpop.f32.mrf.mxu1  ;;  %3354 = vmatmul.msk.f32.gmra.mxu1 %vm2751_vm5, %v6345_v4  ;;  %v2420_v44 = vadd.f32 %v5468_v3, %v2419_v20  ;;  %vm2422_vm7 = vweird.f32 %v5468_v3  ;;  %v3329_v9 = vmul.f32 -1.442695, %v5624_v47  ;;  %v2324_v59 = vsel %vm2321_vm6, %v2323_v48, %v2319_v29 }
 0x349   :  { %v2863_v18 = vadd.f32 %v5301_v16, %v2862_v61  ;;  %v3628_v54 = vpop.eup %3627  ;;  %v1516_v34 = vadd.f32 %v1515_v5, %v6348_v53  ;;  %v2345_v40 = vadd.f32 %v5405_v22, %v2344_v26  ;;  %vm2347_vm3 = vweird.f32 %v5405_v22  ;;  %vm5679_vm8 = vmor %vm2421_vm0, %vm2422_vm7  ;;  %v1613_v6 = vpop.f32.mrf.mxu3 }
 0x34a   :  { %v2373_v43 = vsub.f32 1.0, %v2372_v27  ;;  %v2447_v1 = vmul.f32 %v5652_v30, %v5570_v38  ;;  %3633 = vpow2.f32 %v3330_v57  ;;  %v5674_v23 = vadd.f32 %v4548_v33, %v1611_v7 }
 0x34b   :  { %v2958_v21 = vadd.f32 %v2957_v10, %v2863_v18  ;;  %v2352_v14 = vand.u32 2147483648, %v5330_v51  ;;  %v5683_v46 = vadd.f32 1.0, %v3628_v54  ;;  %v2699_v25 = vmul.f32 %v2324_v59, %v6351_v52  ;;  %v6355_v54 = vld [vmem:[#allocation8_spill] sm:$0xff]  ;;  %v6356_v59 = vld [vmem:[#allocation18_spill] sm:$0xff] }
 0x34c   :  { %vm2346_vm9 = vweird.f32 %v5330_v51  ;;  %v2350_v15 = vand.u32 2147483647, %v5330_v51  ;;  %v5688_v45 = vpop.eup %3629  ;;  %v2399_v41 = vsel %vm5610_vm14, %v5538_v42, %v2394_v62  ;;  %v2424_v58 = vsel %vm5679_vm8, %v5468_v3, %v2420_v44 }
 0x34d   :  { %3135 = vst [vmem:[%s6239_s6 + $0x28] sm:$0xff] %v2958_v21  ;;  %v2428_v49 = vor.u32 1.1754944e-38, %v2427_v56  ;;  %3635 = vpow2.f32 %v3329_v9  ;;  %vm5698_vm10 = vmor %vm2346_vm9, %vm2347_vm3  ;;  %v3632_v51 = vpop.eup %3631  ;;  %v2374_v19 = vmul.f32 %v5561_v36, %v2373_v43  ;;  %v2402_v3 = vmul.f32 %v5618_v50, %v5549_v24  ;;  %v1521_v9 = vpop.f32.mrf.mxu2 }
 0x34e   :  { %v2349_v42 = vsel %vm5698_vm10, %v5405_v22, %v2345_v40  ;;  %v2448_v20 = vsub.f32 1.0, %v2447_v1  ;;  %v5710_v56 = vadd.f32 %v6334_v60, %v1516_v34  ;;  %v3332_v61 = vmul.f32 -1.442695, %v5674_v23  ;;  %v6357_v40 = vld [vmem:[#allocation20_spill] sm:$0xff] }
 0x34f   :  { %2888 = vmatmul.f32.gmra.mxu0 %v2699_v25  ;;  %v2353_v35 = vor.u32 1.1754944e-38, %v2352_v14  ;;  %v2455_v18 = vand.u32 2147483647, %v5570_v38  ;;  %3637 = vrcp.f32 %v5683_v46  ;;  %vm2351_vm11 = vcmp.eq.f32.partialorder %v2350_v15, 8.507059e+37  ;;  %v6360_v15 = vld [vmem:[#allocation22_spill] sm:$0xff] }
 0x350   :  { %v2865_v8 = vpop.f32.mrf.mxu0  ;;  %3355 = vmatmul.msk.f32.gmra.mxu1 %vm2751_vm5, %v5524_v11  ;;  %v2960_v10 = vpop.f32.mrf.mxu1  ;;  %v2429_v26 = vsel %vm5658_vm4, %v2428_v49, %v2424_v58  ;;  %v2457_v27 = vand.u32 2147483648, %v5570_v38  ;;  %v5720_v0 = vadd.f32 1.0, %v3632_v51  ;;  %v1614_v7 = vadd.f32 %v1613_v6, %v6354_v31  ;;  %v6367_v31 = vld [vmem:[#allocation21_spill] sm:$0xff] }
 0x351   :  { %v2866_v55 = vadd.f32 %v5301_v16, %v2865_v8  ;;  %v3634_v29 = vpop.eup %3633  ;;  %v2354_v57 = vsel %vm2351_vm11, %v2353_v35, %v2349_v42  ;;  %v2375_v11 = vadd.f32 %v5561_v36, %v2374_v19  ;;  %vm2377_vm12 = vweird.f32 %v5561_v36  ;;  %v6363_v35 = vld [vmem:[#allocation10_spill] sm:$0xff] }
 0x352   :  { %v2403_v4 = vsub.f32 1.0, %v2402_v3  ;;  %v2449_v62 = vmul.f32 %v5652_v30, %v2448_v20  ;;  %v3331_v17 = vmul.f32 -1.442695, %v5710_v56  ;;  %3639 = vpow2.f32 %v3332_v61 }
 0x353   :  { %v2961_v22 = vadd.f32 %v2960_v10, %v2866_v55  ;;  %v3636_v48 = vpop.eup %3635  ;;  %v2382_v21 = vand.u32 2147483648, %v5389_v63  ;;  %v1519_v44 = vadd.f32 %v1518_v13, %v6355_v54  ;;  %v2701_v53 = vmul.f32 %v2354_v57, %v6356_v59 }
 0x354   :  { %vm2376_vm13 = vweird.f32 %v5389_v63  ;;  %v2380_v34 = vand.u32 2147483647, %v5389_v63  ;;  %v2704_v43 = vmul.f32 %v2399_v41, %v6357_v40  ;;  %vm2451_vm14 = vweird.f32 %v5570_v38  ;;  %v1616_v63 = vpop.f32.mrf.mxu3 }
 0x355   :  { %3137 = vst [vmem:[%s6239_s6 + $0x30] sm:$0xff] %v2961_v22  ;;  %3641 = vrcp.f32 %v5720_v0  ;;  %v5738_v1 = vadd.f32 1.0, %v3634_v29  ;;  %vm5742_vm15 = vmor %vm2376_vm13, %vm2377_vm12  ;;  %v5746_v13 = vpop.eup %3637  ;;  %v5749_v5 = vadd.f32 %v4548_v33, %v1614_v7  ;;  %v2404_v52 = vmul.f32 %v5618_v50, %v2403_v4  ;;  %v6364_v22 = vld [vmem:[#allocation9_spill] sm:$0xff] }
 0x356   :  { %v2379_v6 = vsel %vm5742_vm15, %v5561_v36, %v2375_v11  ;;  %v2432_v25 = vmul.f32 %v5688_v45, %v5604_v12  ;;  %v5758_v41 = vmul.f32 %v2429_v26, %v6360_v15  ;;  %vm2452_vm0 = vweird.f32 %v5652_v30 }
 0x357   :  { %2891 = vmatmul.f32.gmra.mxu0 %v2701_v53  ;;  %vm5761_vm1 = vcmp.eq.f32.partialorder %v2455_v18, 8.507059e+37  ;;  %v2458_v49 = vor.u32 1.1754944e-38, %v2457_v27  ;;  %v2383_v8 = vor.u32 1.1754944e-38, %v2382_v21  ;;  %v2450_v36 = vadd.f32 %v5652_v30, %v2449_v62  ;;  %vm5789_vm6 = vmor %vm2451_vm14, %vm2452_vm0  ;;  %v1524_v21 = vpop.f32.mrf.mxu2 }
 0x358   :  { %3356 = vmatmul.msk.f32.gmra.mxu1 %vm2751_vm5, %v5564_v39  ;;  %3643 = vpow2.f32 %v3331_v17  ;;  %v5769_v32 = vadd.f32 %v6334_v60, %v1519_v44  ;;  %vm2381_vm2 = vcmp.eq.f32.partialorder %v2380_v34, 8.507059e+37  ;;  %v3640_v51 = vpop.eup %3639  ;;  %v2477_v55 = vmul.f32 %v5746_v13, %v5683_v46 }
 0x359   :  { %v5773_v42 = vadd.f32 1.0, %v3636_v48  ;;  %3645 = vrcp.f32 %v5738_v1  ;;  %v2384_v19 = vsel %vm2381_vm2, %v2383_v8, %v2379_v6  ;;  %v3334_v3 = vmul.f32 -1.442695, %v5749_v5 }
 0x35a   :  { %v2405_v39 = vadd.f32 %v5618_v50, %v2404_v52  ;;  %vm2407_vm4 = vweird.f32 %v5618_v50  ;;  %v2433_v20 = vsub.f32 1.0, %v2432_v25  ;;  %v2487_v10 = vand.u32 2147483648, %v5683_v46 }
 0x35b   :  { %v5779_v61 = vpop.eup %3641  ;;  %v1522_v18 = vadd.f32 %v1521_v9, %v6363_v35  ;;  %v1617_v29 = vadd.f32 %v1616_v63, %v6364_v22  ;;  %v2412_v26 = vand.u32 2147483648, %v5549_v24  ;;  %v3333_v57 = vmul.f32 -1.442695, %v5769_v32  ;;  %v6373_v22 = vld [vmem:[#allocation11_spill] sm:$0xff] }
 0x35c   :  { %v2703_v7 = vmul.f32 %v2384_v19, %v6367_v31  ;;  %vm2406_vm7 = vweird.f32 %v5549_v24  ;;  %v2410_v11 = vand.u32 2147483647, %v5549_v24  ;;  %v2454_v4 = vsel %vm5789_vm6, %v5652_v30, %v2450_v36  ;;  %v1619_v14 = vpop.f32.mrf.mxu3 }
 0x35d   :  { %v2478_v48 = vsub.f32 1.0, %v2477_v55  ;;  %3647 = vrcp.f32 %v5773_v42  ;;  %v5801_v38 = vadd.f32 1.0, %v3640_v51  ;;  %vm5805_vm3 = vmor %vm2406_vm7, %vm2407_vm4  ;;  %v2434_v30 = vmul.f32 %v5688_v45, %v2433_v20  ;;  %v6372_v20 = vld [vmem:[#allocation23_spill] sm:$0xff] }
 0x35e   :  { %v3644_v17 = vpop.eup %3643  ;;  %3649 = vpow2.f32 %v3334_v3  ;;  %v2409_v24 = vsel %vm5805_vm3, %v5618_v50, %v2405_v39  ;;  %v2462_v54 = vmul.f32 %v5779_v61, %v5720_v0  ;;  %vm2481_vm8 = vweird.f32 %v5683_v46  ;;  %v6371_v3 = vld [vmem:[#allocation12_spill] sm:$0xff] }
 0x35f   :  { %2894 = vmatmul.f32.gmra.mxu0 %v2703_v7  ;;  %v5815_v44 = vpop.eup %3645  ;;  %v2485_v9 = vand.u32 2147483647, %v5683_v46  ;;  %v5820_v59 = vadd.f32 %v6334_v60, %v1522_v18  ;;  %v5823_v53 = vadd.f32 %v4548_v33, %v1617_v29  ;;  %v2413_v50 = vor.u32 1.1754944e-38, %v2412_v26 }
 0x360   :  { %3357 = vmatmul.msk.f32.gmra.mxu1 %vm2751_vm5, %v2704_v43  ;;  %v2459_v34 = vsel %vm5761_vm1, %v2458_v49, %v2454_v4  ;;  %v5828_v40 = vor.u32 1.1754944e-38, %v2487_v10  ;;  %3651 = vpow2.f32 %v3333_v57  ;;  %vm2411_vm9 = vcmp.eq.f32.partialorder %v2410_v11, 8.507059e+37  ;;  %v6370_v49 = vld [vmem:[#allocation24_spill] sm:$0xff] }
 0x361   :  { %v2479_v63 = vmul.f32 %v5746_v13, %v2478_v48  ;;  %v5831_v6 = vadd.f32 1.0, %v3644_v17  ;;  %3653 = vrcp.f32 %v5801_v38  ;;  %v2414_v52 = vsel %vm2411_vm9, %v2413_v50, %v2409_v24 }
 0x362   :  { %v2507_v25 = vmul.f32 %v5815_v44, %v5738_v1  ;;  %v2435_v43 = vadd.f32 %v5688_v45, %v2434_v30  ;;  %vm2437_vm10 = vweird.f32 %v5688_v45  ;;  %v2463_v15 = vsub.f32 1.0, %v2462_v54  ;;  %v1527_v30 = vpop.f32.mrf.mxu2 }
 0x363   :  { %v5838_v58 = vpop.eup %3647  ;;  %v5841_v8 = vmul.f32 %v2459_v34, %v6370_v49  ;;  %v3335_v36 = vmul.f32 -1.442695, %v5820_v59  ;;  %v3336_v51 = vmul.f32 -1.442695, %v5823_v53  ;;  %v2442_v55 = vand.u32 2147483648, %v5604_v12 }
 0x364   :  { %v3650_v19 = vpop.eup %3649  ;;  %v1525_v39 = vadd.f32 %v1524_v21, %v6371_v3  ;;  %v2705_v10 = vmul.f32 %v2414_v52, %v6372_v20  ;;  %vm2436_vm11 = vweird.f32 %v5604_v12  ;;  %v2440_v35 = vand.u32 2147483647, %v5604_v12  ;;  %v1622_v34 = vpop.f32.mrf.mxu3  ;;  %v6382_v20 = vld [vmem:[#allocation13_spill] sm:$0xff] }
 0x365   :  { %v2480_v18 = vadd.f32 %v5746_v13, %v2479_v63  ;;  %vm2482_vm12 = vweird.f32 %v5746_v13  ;;  %3655 = vrcp.f32 %v5831_v6  ;;  %v1620_v29 = vadd.f32 %v1619_v14, %v6373_v22  ;;  %vm5856_vm13 = vmor %vm2436_vm11, %vm2437_vm10 }
 0x366   :  { %v3652_v27 = vpop.eup %3651  ;;  %vm5860_vm14 = vcmp.eq.f32.partialorder %v2485_v9, 8.507059e+37  ;;  %v2508_v12 = vsub.f32 1.0, %v2507_v25  ;;  %v2439_v31 = vsel %vm5856_vm13, %v5688_v45, %v2435_v43  ;;  %v2464_v7 = vmul.f32 %v5779_v61, %v2463_v15  ;;  %vm5881_vm15 = vmor %vm2481_vm8, %vm2482_vm12  ;;  %v6380_v25 = vld [vmem:[#allocation14_spill] sm:$0xff] }
 0x367   :  { %2897 = vmatmul.f32.gmra.mxu0 %v2705_v10  ;;  %v2492_v11 = vmul.f32 %v5838_v58, %v5773_v42  ;;  %v5870_v4 = vpop.eup %3653  ;;  %v2515_v48 = vand.u32 2147483647, %v5738_v1  ;;  %v5873_v62 = vadd.f32 1.0, %v3650_v19  ;;  %3657 = vpow2.f32 %v3335_v36  ;;  %v6381_v36 = vld [vmem:[#allocation26_spill] sm:$0xff] }
 0x368   :  { %3358 = vmatmul.msk.f32.gmra.mxu1 %vm2751_vm5, %v5758_v41  ;;  %v2443_v17 = vor.u32 1.1754944e-38, %v2442_v55  ;;  %v2517_v21 = vand.u32 2147483648, %v5738_v1  ;;  %3659 = vpow2.f32 %v3336_v51  ;;  %v5887_v24 = vadd.f32 %v6334_v60, %v1525_v39 }
 0x369   :  { %vm2441_vm0 = vcmp.eq.f32.partialorder %v2440_v35, 8.507059e+37  ;;  %v2484_v41 = vsel %vm5881_vm15, %v5746_v13, %v2480_v18  ;;  %v5892_v54 = vadd.f32 1.0, %v3652_v27  ;;  %v5895_v46 = vadd.f32 %v4548_v33, %v1620_v29 }
 0x36a   :  { %v2444_v9 = vsel %vm2441_vm0, %v2443_v17, %v2439_v31  ;;  %v2509_v50 = vmul.f32 %v5815_v44, %v2508_v12  ;;  %v2465_v14 = vadd.f32 %v5779_v61, %v2464_v7  ;;  %vm2467_vm1 = vweird.f32 %v5779_v61 }
 0x36b   :  { %v2493_v63 = vsub.f32 1.0, %v2492_v11  ;;  %v5900_v52 = vpop.eup %3655  ;;  %vm2511_vm2 = vweird.f32 %v5738_v1  ;;  %v2537_v13 = vmul.f32 %v5870_v4, %v5801_v38  ;;  %3661 = vrcp.f32 %v5873_v62 }
 0x36c   :  { %v1528_v43 = vadd.f32 %v1527_v30, %v6380_v25  ;;  %v2472_v15 = vand.u32 2147483648, %v5720_v0  ;;  %v3337_v49 = vmul.f32 -1.442695, %v5887_v24  ;;  %v2707_v51 = vmul.f32 %v2444_v9, %v6381_v36 }
 0x36d   :  { %vm2466_vm4 = vweird.f32 %v5720_v0  ;;  %v2470_v55 = vand.u32 2147483647, %v5720_v0  ;;  %v3658_v19 = vpop.eup %3657  ;;  %v2518_v3 = vor.u32 1.1754944e-38, %v2517_v21  ;;  %3663 = vrcp.f32 %v5892_v54 }
 0x36e   :  { %v3338_v39 = vmul.f32 -1.442695, %v5895_v46  ;;  %v1623_v10 = vadd.f32 %v1622_v34, %v6382_v20  ;;  %vm5917_vm6 = vmor %vm2466_vm4, %vm2467_vm1  ;;  %v3660_v18 = vpop.eup %3659  ;;  %vm2512_vm7 = vweird.f32 %v5815_v44  ;;  %v2494_v22 = vmul.f32 %v5838_v58, %v2493_v63  ;;  %v2963_v34 = vpop.f32.mrf.mxu1 }
 0x36f   :  { %2900 = vmatmul.f32.gmra.mxu0 %v2707_v51  ;;  %v2469_v0 = vsel %vm5917_vm6, %v5779_v61, %v2465_v14  ;;  %v2522_v29 = vmul.f32 %v5900_v52, %v5831_v6  ;;  %v2489_v26 = vsel %vm5860_vm14, %v5828_v40, %v2484_v41  ;;  %v2538_v27 = vsub.f32 1.0, %v2537_v13  ;;  %vm5959_vm9 = vmor %vm2511_vm2, %vm2512_vm7 }
 0x370   :  { %v5932_v12 = vadd.f32 %v6334_v60, %v1528_v43  ;;  %3359 = vmatmul.msk.f32.gmra.mxu1 %vm2751_vm5, %v5841_v8  ;;  %v2473_v31 = vor.u32 1.1754944e-38, %v2472_v15  ;;  %v2510_v7 = vadd.f32 %v5815_v44, %v2509_v50  ;;  %v5937_v61 = vadd.f32 1.0, %v3658_v19 }
 0x371   :  { %3665 = vpow2.f32 %v3337_v49  ;;  %vm2471_vm3 = vcmp.eq.f32.partialorder %v2470_v55, 8.507059e+37  ;;  %v5939_v11 = vpop.eup %3661  ;;  %v5941_v17 = vadd.f32 1.0, %v3660_v18  ;;  %v5944_v40 = vadd.f32 %v4548_v33, %v1623_v10 }
 0x372   :  { %3667 = vpow2.f32 %v3338_v39  ;;  %v2868_v60 = vpop.f32.mrf.mxu0  ;;  %v2474_v57 = vsel %vm2471_vm3, %v2473_v31, %v2469_v0  ;;  %v2495_v8 = vadd.f32 %v5838_v58, %v2494_v22  ;;  %vm2497_vm8 = vweird.f32 %v5838_v58 }
 0x373   :  { %v2869_v45 = vadd.f32 %v5301_v16, %v2868_v60  ;;  %v2523_v21 = vsub.f32 1.0, %v2522_v29  ;;  %v5949_v30 = vpop.eup %3663  ;;  %v2710_v41 = vmul.f32 %v2489_v26, %v5552_v28  ;;  %v2539_v9 = vmul.f32 %v5870_v4, %v2538_v27 }
 0x374   :  { %v3339_v50 = vmul.f32 -1.442695, %v5932_v12  ;;  %v2502_v33 = vand.u32 2147483648, %v5773_v42  ;;  %v2709_v63 = vmul.f32 %v2474_v57, %v5592_v2  ;;  %vm2496_vm10 = vweird.f32 %v5773_v42 }
 0x375   :  { %v2964_v14 = vadd.f32 %v2963_v34, %v2869_v45  ;;  %v2500_v28 = vand.u32 2147483647, %v5773_v42  ;;  %v2514_v13 = vsel %vm5959_vm9, %v5815_v44, %v2510_v7  ;;  %v2567_v25 = vmul.f32 %v5939_v11, %v5873_v62  ;;  %vm5975_vm11 = vmor %vm2496_vm10, %vm2497_vm8 }
 0x376   :  { %3669 = vrcp.f32 %v5937_v61  ;;  %v3340_v43 = vmul.f32 -1.442695, %v5944_v40  ;;  %v2499_v42 = vsel %vm5975_vm11, %v5838_v58, %v2495_v8  ;;  %v2524_v44 = vmul.f32 %v5900_v52, %v2523_v21 }
 0x377   :  { %v3666_v2 = vpop.eup %3665  ;;  %3671 = vrcp.f32 %v5941_v17  ;;  %3139 = vst [vmem:[%s6239_s6 + $0x38] sm:$0xff] %v2964_v14  ;;  %2903 = vmatmul.f32.gmra.mxu0 %v2709_v63  ;;  %v2552_v49 = vmul.f32 %v5949_v30, %v5892_v54  ;;  %vm2516_vm12 = vcmp.eq.f32.partialorder %v2515_v48, 8.507059e+37  ;;  %vm2542_vm13 = vweird.f32 %v5870_v4 }
 0x378   :  { %v3668_v36 = vpop.eup %3667  ;;  %v2547_v51 = vand.u32 2147483648, %v5801_v38  ;;  %3360 = vmatmul.msk.f32.gmra.mxu1 %vm2751_vm5, %v2710_v41  ;;  %v2503_v55 = vor.u32 1.1754944e-38, %v2502_v33  ;;  %v2519_v19 = vsel %vm2516_vm12, %v2518_v3, %v2514_v13  ;;  %v2540_v39 = vadd.f32 %v5870_v4, %v2539_v9 }
 0x379   :  { %3673 = vpow2.f32 %v3339_v50  ;;  %vm2501_vm14 = vcmp.eq.f32.partialorder %v2500_v28, 8.507059e+37  ;;  %v2568_v58 = vsub.f32 1.0, %v2567_v25  ;;  %v5995_v20 = vadd.f32 1.0, %v3666_v2 }
 0x37a   :  { %3675 = vpow2.f32 %v3340_v43  ;;  %v2504_v10 = vsel %vm2501_vm14, %v2503_v55, %v2499_v42  ;;  %v5997_v35 = vadd.f32 1.0, %v3668_v36  ;;  %v2525_v1 = vadd.f32 %v5900_v52, %v2524_v44  ;;  %v6070_v36 = vld [vmem:[%s6238_s5] ss:$0 sm:$0xff] }
 0x37b   :  { %vm2527_vm15 = vweird.f32 %v5900_v52  ;;  %v2553_v48 = vsub.f32 1.0, %v2552_v49  ;;  %vm2541_vm0 = vweird.f32 %v5801_v38  ;;  %v2545_v3 = vand.u32 2147483647, %v5801_v38 }
 0x37c   :  { %v6001_v18 = vpop.eup %3669  ;;  %v2532_v0 = vand.u32 2147483648, %v5831_v6  ;;  %vm6010_vm1 = vmor %vm2541_vm0, %vm2542_vm13  ;;  %v2548_v26 = vor.u32 1.1754944e-38, %v2547_v51  ;;  %v2711_v27 = vmul.f32 %v2504_v10, %v5624_v47  ;;  %vm2526_vm2 = vweird.f32 %v5831_v6 }
 0x37d   :  { %v6006_v22 = vpop.eup %3671  ;;  %v2530_v31 = vand.u32 2147483647, %v5831_v6  ;;  %v2712_v7 = vmul.f32 %v2519_v19, %v5607_v37  ;;  %v2544_v38 = vsel %vm6010_vm1, %v5870_v4, %v2540_v39  ;;  %v2569_v60 = vmul.f32 %v5939_v11, %v2568_v58  ;;  %vm6025_vm4 = vmor %vm2526_vm2, %vm2527_vm15 }
 0x37e   :  { %3677 = vrcp.f32 %v5995_v20  ;;  %v2529_v37 = vsel %vm6025_vm4, %v5900_v52, %v2525_v1  ;;  %v2554_v6 = vmul.f32 %v5949_v30, %v2553_v48  ;;  %v2582_v4 = vmul.f32 %v6001_v18, %v5937_v61  ;;  %v2871_v2 = vpop.f32.mrf.mxu0 }
 0x37f   :  { %v3674_v47 = vpop.eup %3673  ;;  %3679 = vrcp.f32 %v5997_v35  ;;  %2906 = vmatmul.f32.gmra.mxu0 %v2711_v27  ;;  %vm2546_vm6 = vcmp.eq.f32.partialorder %v2545_v3, 8.507059e+37  ;;  %v2597_v8 = vmul.f32 %v6006_v22, %v5941_v17  ;;  %v2533_v21 = vor.u32 1.1754944e-38, %v2532_v0 }
 0x380   :  { %v3676_v45 = vpop.eup %3675  ;;  %3361 = vmatmul.msk.f32.gmra.mxu1 %vm2751_vm5, %v2712_v7  ;;  %v2549_v41 = vsel %vm2546_vm6, %v2548_v26, %v2544_v38  ;;  %vm2531_vm7 = vcmp.eq.f32.partialorder %v2530_v31, 8.507059e+37  ;;  %v2570_v9 = vadd.f32 %v5939_v11, %v2569_v60  ;;  %vm2572_vm3 = vweird.f32 %v5939_v11 }
 0x381   :  { %v6041_v52 = vadd.f32 1.0, %v3674_v47  ;;  %v2534_v50 = vsel %vm2531_vm7, %v2533_v21, %v2529_v37  ;;  %v6043_v34 = vadd.f32 1.0, %v3676_v45  ;;  %v2555_v33 = vadd.f32 %v5949_v30, %v2554_v6 }
 0x382   :  { %vm2557_vm8 = vweird.f32 %v5949_v30  ;;  %v2583_v16 = vsub.f32 1.0, %v2582_v4  ;;  %v2714_v63 = vmul.f32 %v2549_v41, %v5674_v23  ;;  %vm2571_vm9 = vweird.f32 %v5873_v62 }
 0x383   :  { %v2598_v28 = vsub.f32 1.0, %v2597_v8  ;;  %v2562_v13 = vand.u32 2147483648, %v5892_v54  ;;  %vm6054_vm10 = vmor %vm2571_vm9, %vm2572_vm3  ;;  %v2577_v15 = vand.u32 2147483648, %v5873_v62  ;;  %v2713_v42 = vmul.f32 %v2534_v50, %v5710_v56 }
 0x384   :  { %v6047_v14 = vpop.eup %3677  ;;  %vm2556_vm11 = vweird.f32 %v5892_v54  ;;  %v2560_v23 = vand.u32 2147483647, %v5892_v54  ;;  %v2574_v44 = vsel %vm6054_vm10, %v5939_v11, %v2570_v9  ;;  %v2575_v49 = vand.u32 2147483647, %v5873_v62  ;;  %v2966_v54 = vpop.f32.mrf.mxu1 }
 0x385   :  { %v6052_v25 = vpop.eup %3679  ;;  %3681 = vrcp.f32 %v6041_v52  ;;  %v2872_v51 = vadd.f32 %v6070_v36, %v2871_v2  ;;  %vm6075_vm12 = vmor %vm2556_vm11, %vm2557_vm8  ;;  %v2584_v11 = vmul.f32 %v6001_v18, %v2583_v16  ;;  %v2612_v55 = vmul.f32 %v6047_v14, %v5995_v20 }
 0x386   :  { %3683 = vrcp.f32 %v6043_v34  ;;  %v2559_v62 = vsel %vm6075_vm12, %v5949_v30, %v2555_v33  ;;  %v2599_v19 = vmul.f32 %v6006_v22, %v2598_v28  ;;  %v2627_v39 = vmul.f32 %v6052_v25, %v5997_v35 }
 0x387   :  { %2909 = vmatmul.f32.gmra.mxu0 %v2713_v42  ;;  %v2967_v58 = vadd.f32 %v2966_v54, %v2872_v51  ;;  %v2563_v10 = vor.u32 1.1754944e-38, %v2562_v13  ;;  %v2578_v1 = vor.u32 1.1754944e-38, %v2577_v15  ;;  %vm2561_vm13 = vcmp.eq.f32.partialorder %v2560_v23, 8.507059e+37 }
 0x388   :  { %3362 = vmatmul.msk.f32.gmra.mxu1 %vm2751_vm5, %v2714_v63  ;;  %vm2576_vm14 = vcmp.eq.f32.partialorder %v2575_v49, 8.507059e+37  ;;  %v2585_v3 = vadd.f32 %v6001_v18, %v2584_v11  ;;  %vm2587_vm15 = vweird.f32 %v6001_v18  ;;  %v2613_v0 = vsub.f32 1.0, %v2612_v55 }
 0x389   :  { %3141 = vst [vmem:[%s6239_s6 + $0x40] sm:$0xff] %v2967_v58  ;;  %v2564_v30 = vsel %vm2561_vm13, %v2563_v10, %v2559_v62  ;;  %v2579_v48 = vsel %vm2576_vm14, %v2578_v1, %v2574_v44  ;;  %v2600_v26 = vadd.f32 %v6006_v22, %v2599_v19  ;;  %vm2602_vm0 = vweird.f32 %v6006_v22 }
 0x38a   :  { %v2628_v27 = vsub.f32 1.0, %v2627_v39  ;;  %v2592_v31 = vand.u32 2147483648, %v5937_v61  ;;  %v2607_v38 = vand.u32 2147483648, %v5941_v17  ;;  %v2715_v60 = vmul.f32 %v2564_v30, %v5769_v32 }
 0x38b   :  { %v6095_v29 = vpop.eup %3681  ;;  %vm2586_vm1 = vweird.f32 %v5937_v61  ;;  %v2590_v57 = vand.u32 2147483647, %v5937_v61  ;;  %v2716_v47 = vmul.f32 %v2579_v48, %v5749_v5  ;;  %vm2601_vm2 = vweird.f32 %v5941_v17 }
 0x38c   :  { %v6100_v7 = vpop.eup %3683  ;;  %v2605_v37 = vand.u32 2147483647, %v5941_v17  ;;  %vm6111_vm4 = vmor %vm2586_vm1, %vm2587_vm15  ;;  %v2614_v5 = vmul.f32 %v6047_v14, %v2613_v0  ;;  %v2642_v61 = vmul.f32 %v6095_v29, %v6041_v52  ;;  %v2629_v45 = vmul.f32 %v6052_v25, %v2628_v27  ;;  %v2874_v28 = vpop.f32.mrf.mxu0 }
 0x38d   :  { %vm6115_vm6 = vmor %vm2601_vm2, %vm2602_vm0  ;;  %v2589_v32 = vsel %vm6111_vm4, %v6001_v18, %v2585_v3  ;;  %v2657_v8 = vmul.f32 %v6100_v7, %v6043_v34  ;;  %v2593_v21 = vor.u32 1.1754944e-38, %v2592_v31  ;;  %v2608_v41 = vor.u32 1.1754944e-38, %v2607_v38  ;;  %v2969_v13 = vpop.f32.mrf.mxu1 }
 0x38e   :  { %v2604_v17 = vsel %vm6115_vm6, %v6006_v22, %v2600_v26  ;;  %vm2591_vm7 = vcmp.eq.f32.partialorder %v2590_v57, 8.507059e+37  ;;  %vm2606_vm3 = vcmp.eq.f32.partialorder %v2605_v37, 8.507059e+37  ;;  %v2637_v18 = vand.u32 2147483648, %v5997_v35 }
 0x38f   :  { %2912 = vmatmul.f32.gmra.mxu0 %v2715_v60  ;;  %v2594_v9 = vsel %vm2591_vm7, %v2593_v21, %v2589_v32  ;;  %v2609_v50 = vsel %vm2606_vm3, %v2608_v41, %v2604_v17  ;;  %v2615_v33 = vadd.f32 %v6047_v14, %v2614_v5  ;;  %vm2617_vm8 = vweird.f32 %v6047_v14 }
 0x390   :  { %3363 = vmatmul.msk.f32.gmra.mxu1 %vm2751_vm5, %v2716_v47  ;;  %v2643_v22 = vsub.f32 1.0, %v2642_v61  ;;  %v2630_v16 = vadd.f32 %v6052_v25, %v2629_v45  ;;  %vm2632_vm9 = vweird.f32 %v6052_v25  ;;  %v2658_v63 = vsub.f32 1.0, %v2657_v8 }
 0x391   :  { %v2622_v43 = vand.u32 2147483648, %v5995_v20  ;;  %v2875_v15 = vadd.f32 %v6070_v36, %v2874_v28  ;;  %v2717_v2 = vmul.f32 %v2594_v9, %v5820_v59  ;;  %vm2616_vm10 = vweird.f32 %v5995_v20 }
 0x392   :  { %v2620_v42 = vand.u32 2147483647, %v5995_v20  ;;  %v2718_v23 = vmul.f32 %v2609_v50, %v5823_v53  ;;  %vm2631_vm11 = vweird.f32 %v5997_v35  ;;  %v2635_v44 = vand.u32 2147483647, %v5997_v35  ;;  %vm2618_vm12 = vmor %vm2616_vm10, %vm2617_vm8 }
 0x393   :  { %vm2633_vm13 = vmor %vm2631_vm11, %vm2632_vm9  ;;  %v2970_v49 = vadd.f32 %v2969_v13, %v2875_v15  ;;  %v2619_v51 = vsel %vm2618_vm12, %v6047_v14, %v2615_v33  ;;  %v2644_v59 = vmul.f32 %v6095_v29, %v2643_v22  ;;  %v2659_v20 = vmul.f32 %v6100_v7, %v2658_v63 }
 0x394   :  { %v2634_v56 = vsel %vm2633_vm13, %v6052_v25, %v2630_v16  ;;  %v2623_v53 = vor.u32 1.1754944e-38, %v2622_v43  ;;  %v2638_v54 = vor.u32 1.1754944e-38, %v2637_v18  ;;  %vm2621_vm14 = vcmp.eq.f32.partialorder %v2620_v42, 8.507059e+37  ;;  %v2877_v55 = vpop.f32.mrf.mxu0 }
 0x395   :  { %3143 = vst [vmem:[%s6239_s6 + $0x48] sm:$0xff] %v2970_v49  ;;  %vm2636_vm15 = vcmp.eq.f32.partialorder %v2635_v44, 8.507059e+37  ;;  %v2645_v14 = vadd.f32 %v6095_v29, %v2644_v59  ;;  %vm2647_vm0 = vweird.f32 %v6095_v29  ;;  %v2660_v25 = vadd.f32 %v6100_v7, %v2659_v20  ;;  %v2972_v48 = vpop.f32.mrf.mxu1 }
 0x396   :  { %v2624_v35 = vsel %vm2621_vm14, %v2623_v53, %v2619_v51  ;;  %v2639_v62 = vsel %vm2636_vm15, %v2638_v54, %v2634_v56  ;;  %vm2662_vm1 = vweird.f32 %v6100_v7  ;;  %v2667_v11 = vand.u32 2147483648, %v6043_v34 }
 0x397   :  { %2915 = vmatmul.f32.gmra.mxu0 %v2717_v2  ;;  %v2652_v19 = vand.u32 2147483648, %v6041_v52  ;;  %v2878_v39 = vadd.f32 %v6070_v36, %v2877_v55  ;;  %v2719_v58 = vmul.f32 %v2624_v35, %v5887_v24  ;;  %vm2646_vm2 = vweird.f32 %v6041_v52 }
 0x398   :  { %3364 = vmatmul.msk.f32.gmra.mxu1 %vm2751_vm5, %v2718_v23  ;;  %v2650_v10 = vand.u32 2147483647, %v6041_v52  ;;  %v2720_v1 = vmul.f32 %v2639_v62, %v5895_v46  ;;  %vm2661_vm4 = vweird.f32 %v6043_v34  ;;  %v2665_v30 = vand.u32 2147483647, %v6043_v34  ;;  %vm2648_vm6 = vmor %vm2646_vm2, %vm2647_vm0 }
 0x399   :  { %vm2663_vm7 = vmor %vm2661_vm4, %vm2662_vm1  ;;  %v2973_v3 = vadd.f32 %v2972_v48, %v2878_v39  ;;  %v2649_v0 = vsel %vm2648_vm6, %v6095_v29, %v2645_v14  ;;  %v2653_v24 = vor.u32 1.1754944e-38, %v2652_v19  ;;  %v2668_v27 = vor.u32 1.1754944e-38, %v2667_v11 }
 0x39a   :  { %v2664_v26 = vsel %vm2663_vm7, %v6100_v7, %v2660_v25  ;;  %vm2651_vm3 = vcmp.eq.f32.partialorder %v2650_v10, 8.507059e+37  ;;  %vm2666_vm8 = vcmp.eq.f32.partialorder %v2665_v30, 8.507059e+37 }
 0x39b   :  { %3145 = vst [vmem:[%s6239_s6 + $0x50] sm:$0xff] %v2973_v3  ;;  %v2654_v46 = vsel %vm2651_vm3, %v2653_v24, %v2649_v0  ;;  %v2669_v52 = vsel %vm2666_vm8, %v2668_v27, %v2664_v26 }
 0x39c   :  { %v2721_v34 = vmul.f32 %v2654_v46, %v5932_v12  ;;  %v2722_v31 = vmul.f32 %v2669_v52, %v5944_v40 }
 0x39f   :  { %2918 = vmatmul.f32.gmra.mxu0 %v2719_v58 }
 0x3a0   :  { %3365 = vmatmul.msk.f32.gmra.mxu1 %vm2751_vm5, %v2720_v1 }
 0x3a7   :  { %2921 = vmatmul.f32.gmra.mxu0 %v2721_v34 }
 0x3a8   :  { %3366 = vmatmul.msk.f32.gmra.mxu1 %vm2751_vm5, %v2722_v31 }
 0x3b4   :  { %v2880_v29 = vpop.f32.mrf.mxu0 }
 0x3b5   :  { %v2881_v7 = vadd.f32 %v6070_v36, %v2880_v29  ;;  %v2975_v38 = vpop.f32.mrf.mxu1 }
 0x3b7   :  { %v2976_v60 = vadd.f32 %v2975_v38, %v2881_v7 }
 0x3b9   :  { %3147 = vst [vmem:[%s6239_s6 + $0x58] sm:$0xff] %v2976_v60 }
 0x3bc   :  { %v2883_v57 = vpop.f32.mrf.mxu0 }
 0x3bd   :  { %v2884_v47 = vadd.f32 %v6070_v36, %v2883_v57  ;;  %v2978_v37 = vpop.f32.mrf.mxu1 }
 0x3bf   :  { %v2979_v6 = vadd.f32 %v2978_v37, %v2884_v47 }
 0x3c1   :  { %3149 = vst [vmem:[%s6239_s6 + $0x60] sm:$0xff] %v2979_v6 }
 0x3c4   :  { %v2886_v12 = vpop.f32.mrf.mxu0 }
 0x3c5   :  { %v2887_v40 = vadd.f32 %v6070_v36, %v2886_v12  ;;  %v2981_v4 = vpop.f32.mrf.mxu1 }
 0x3c7   :  { %v2982_v32 = vadd.f32 %v2981_v4, %v2887_v40 }
 0x3c9   :  { %3151 = vst [vmem:[%s6239_s6 + $0x68] sm:$0xff] %v2982_v32 }
 0x3cc   :  { %v2889_v5 = vpop.f32.mrf.mxu0 }
 0x3cd   :  { %v2890_v61 = vadd.f32 %v6070_v36, %v2889_v5  ;;  %v2984_v17 = vpop.f32.mrf.mxu1 }
 0x3cf   :  { %v2985_v45 = vadd.f32 %v2984_v17, %v2890_v61 }
 0x3d1   :  { %3153 = vst [vmem:[%s6239_s6 + $0x70] sm:$0xff] %v2985_v45 }
 0x3d4   :  { %v2892_v8 = vpop.f32.mrf.mxu0 }
 0x3d5   :  { %v2893_v21 = vadd.f32 %v6070_v36, %v2892_v8  ;;  %v2987_v41 = vpop.f32.mrf.mxu1 }
 0x3d7   :  { %v2988_v18 = vadd.f32 %v2987_v41, %v2893_v21 }
 0x3d9   :  { %3155 = vst [vmem:[%s6239_s6 + $0x78] sm:$0xff] %v2988_v18 }
 0x3dc   :  { %v2895_v9 = vpop.f32.mrf.mxu0 }
 0x3dd   :  { %v2896_v50 = vadd.f32 %v6070_v36, %v2895_v9  ;;  %v2990_v33 = vpop.f32.mrf.mxu1 }
 0x3df   :  { %v2991_v22 = vadd.f32 %v2990_v33, %v2896_v50 }
 0x3e1   :  { %3157 = vst [vmem:[%s6239_s6 + $0x80] sm:$0xff] %v2991_v22 }
 0x3e4   :  { %v2898_v16 = vpop.f32.mrf.mxu0 }
 0x3e5   :  { %v2899_v63 = vadd.f32 %v6070_v36, %v2898_v16  ;;  %v2993_v28 = vpop.f32.mrf.mxu1 }
 0x3e7   :  { %v2994_v13 = vadd.f32 %v2993_v28, %v2899_v63 }
 0x3e9   :  { %3159 = vst [vmem:[%s6239_s6 + $0x88] sm:$0xff] %v2994_v13 }
 0x3ec   :  { %v2901_v43 = vpop.f32.mrf.mxu0 }
 0x3ed   :  { %v2902_v15 = vadd.f32 %v6070_v36, %v2901_v43  ;;  %v2996_v2 = vpop.f32.mrf.mxu1 }
 0x3ef   :  { %v2997_v42 = vadd.f32 %v2996_v2, %v2902_v15 }
 0x3f1   :  { %3161 = vst [vmem:[%s6239_s6 + $0x90] sm:$0xff] %v2997_v42 }
 0x3f4   :  { %v2904_v23 = vpop.f32.mrf.mxu0 }
 0x3f5   :  { %v2905_v44 = vadd.f32 %v6070_v36, %v2904_v23  ;;  %v2999_v49 = vpop.f32.mrf.mxu1 }
 0x3f7   :  { %v3000_v51 = vadd.f32 %v2999_v49, %v2905_v44 }
 0x3f9   :  { %3163 = vst [vmem:[%s6239_s6 + $0x98] sm:$0xff] %v3000_v51 }
 0x3fc   :  { %v2907_v59 = vpop.f32.mrf.mxu0 }
 0x3fd   :  { %v2908_v56 = vadd.f32 %v6070_v36, %v2907_v59  ;;  %v3002_v20 = vpop.f32.mrf.mxu1 }
 0x3ff   :  { %v3003_v53 = vadd.f32 %v3002_v20, %v2908_v56 }
 0x401   :  { %3165 = vst [vmem:[%s6239_s6 + $0xa0] sm:$0xff] %v3003_v53 }
 0x404   :  { %v2910_v54 = vpop.f32.mrf.mxu0 }
 0x405   :  { %v2911_v35 = vadd.f32 %v6070_v36, %v2910_v54  ;;  %v3005_v62 = vpop.f32.mrf.mxu1 }
 0x407   :  { %v3006_v14 = vadd.f32 %v3005_v62, %v2911_v35 }
 0x409   :  { %3167 = vst [vmem:[%s6239_s6 + $0xa8] sm:$0xff] %v3006_v14 }
 0x40c   :  { %v2913_v25 = vpop.f32.mrf.mxu0 }
 0x40d   :  { %v2914_v11 = vadd.f32 %v6070_v36, %v2913_v25  ;;  %v3008_v55 = vpop.f32.mrf.mxu1 }
 0x40f   :  { %v3009_v19 = vadd.f32 %v3008_v55, %v2914_v11 }
 0x411   :  { %3169 = vst [vmem:[%s6239_s6 + $0xb0] sm:$0xff] %v3009_v19 }
 0x414   :  { %v2916_v39 = vpop.f32.mrf.mxu0 }
 0x415   :  { %v2917_v58 = vadd.f32 %v6070_v36, %v2916_v39  ;;  %v3011_v10 = vpop.f32.mrf.mxu1 }
 0x417   :  { %v3012_v1 = vadd.f32 %v3011_v10, %v2917_v58 }
 0x419   :  { %3171 = vst [vmem:[%s6239_s6 + $0xb8] sm:$0xff] %v3012_v1 }
 0x41c   :  { %v2919_v30 = vpop.f32.mrf.mxu0 }
 0x41d   :  { %v2920_v48 = vadd.f32 %v6070_v36, %v2919_v30  ;;  %v3014_v3 = vpop.f32.mrf.mxu1 }
 0x41f   :  { %v3015_v0 = vadd.f32 %v3014_v3, %v2920_v48 }
 0x421   :  { %3173 = vst [vmem:[%s6239_s6 + $0xc0] sm:$0xff] %v3015_v0 }
 0x424   :  { %v2922_v26 = vpop.f32.mrf.mxu0 }
 0x425   :  { %v3017_v24 = vpop.f32.mrf.mxu1 }

</bundles_post_ra>
